<compile_context>
chip_gen: v7x
topology: tpu7x:2x2x1
jax: 0.10.0
libtpu: 0.0.40
codegen_flags: <defaults>
</compile_context>

<pallas_src>
from functools import partial

import jax
import jax.numpy as jnp
from jax.experimental import pallas as pl
from jax.experimental.pallas import tpu as pltpu


def _attention_kernel(tb, n_tok, num_heads, head_dim, dim, exp_in_bf16,
                      x_ref, wqkv_ref, wproj_ref, bproj_ref, bias_ref, o_ref):
    """One grid step: `tb` batch elements, full attention + both projections.

    Every contraction is a 3-D matmul with a single leading batch dimension
    G = tb * num_heads (the Mosaic-validated einsum form); heads are never
    sliced out of / concatenated into the lane dimension.
    """
    G = tb * num_heads

    xb = x_ref[...].astype(jnp.bfloat16)                          # (tb, N, C)
    # Head-batch the activations once (leading-axis broadcast + free reshape).
    xg = jnp.broadcast_to(xb[:, None], (tb, num_heads, n_tok, dim)
                          ).reshape(G, n_tok, dim)                # (G, N, C)

    wqkv = wqkv_ref[...]                                          # (3, H, C, hd)

    def project(w):                                               # w: (H, C, hd)
        wg = jnp.broadcast_to(w[None], (tb, num_heads, dim, head_dim)
                              ).reshape(G, dim, head_dim)
        r = jnp.einsum("gnc,gcd->gnd", xg, wg,
                       preferred_element_type=jnp.float32)
        return r.astype(jnp.bfloat16)                             # (G, N, hd)

    q = project(wqkv[0])        # softmax scale already folded into wq (host)
    k = project(wqkv[1])
    v = project(wqkv[2])

    # scores = q @ k^T + rpe bias (bias stays bf16; the VPU upcasts on the add)
    s = jnp.einsum("gnd,gmd->gnm", q, k,
                   preferred_element_type=jnp.float32)            # (G, N, N) f32
    s = (s.reshape(tb, num_heads, n_tok, n_tok) + bias_ref[...]
         ).reshape(G, n_tok, n_tok)

    # Max-shifted, UNnormalized softmax; normalization deferred past p @ v.
    s = s - jnp.max(s, axis=-1, keepdims=True)
    if exp_in_bf16:             # v6e / v7x have a bf16 EUP
        p = jnp.exp(s.astype(jnp.bfloat16))
    else:                       # v5e: keep exp in f32
        p = jnp.exp(s).astype(jnp.bfloat16)                       # (G, N, N)
    # Numerator and denominator use the same bf16-rounded probabilities.
    denom = jnp.sum(p, axis=-1, keepdims=True, dtype=jnp.float32)  # (G, N, 1)
    # attn_drop: Dropout(0.0) -> identity

    pv = jnp.einsum("gnm,gmd->gnd", p, v,
                    preferred_element_type=jnp.float32)           # (G, N, hd)
    pv = (pv * pl.reciprocal(denom, approx=True)).astype(jnp.bfloat16)

    # Output projection: per-head (N, hd) @ (hd, C); the head merge is a
    # reduction (no lane concatenation of heads).
    wpg = jnp.broadcast_to(wproj_ref[...][None],
                           (tb, num_heads, head_dim, dim)
                           ).reshape(G, head_dim, dim)            # (G, hd, C)
    outg = jnp.einsum("gnd,gdc->gnc", pv, wpg,
                      preferred_element_type=jnp.float32)         # (G, N, C) f32
    outg = outg.reshape(tb, num_heads, n_tok, dim)
    out = outg[:, 0]
    for h in range(1, num_heads):                                 # H-1 VPU adds
        out = out + outg[:, h]

    out = out + bproj_ref[...]          # proj bias added exactly once per step
    # proj_drop: Dropout(0.0) -> identity
    o_ref[...] = out.astype(o_ref.dtype)


def _device_kind():
    try:
        return jax.devices()[0].device_kind.lower()
    except Exception:
        return ""


def _step_vmem_bytes(tb, n, c, h, x_bytes):
    """Rough per-grid-step VMEM footprint (inputs/outputs + temporaries)."""
    hd = max(1, c // h)
    g = tb * h
    io = 2 * 2 * tb * n * c * x_bytes                 # x + out blocks, 2-buffered
    consts = (4 * c * c + h * n * n) * 2 + 4 * c      # wqkv + wproj + bias + bproj
    tmp = (g * n * c * 2                              # head-broadcast x (bf16)
           + 3 * g * n * hd * 2                       # q, k, v (bf16)
           + g * n * n * (4 + 2 + 4)                  # scores f32 + p bf16 + sum tmp
           + g * n * hd * (4 + 2)                     # pv f32 + bf16
           + g * hd * c * 2                           # broadcast proj weight
           + g * n * c * 4 + tb * n * c * 4)          # per-head proj out + head sum
    return io + consts + tmp


def _pick_batch_tile(batch, n_tok, dim, num_heads, x_bytes, two_tc,
                     target_rows=512, vmem_budget=40 * 2**20):
    """Batch elements per grid step: amortize the ~0.35us/step overhead by
    targeting ~target_rows projection rows, keep >=2 steps only on 2-TC chips,
    and shrink until the per-step VMEM estimate fits the budget."""
    if batch <= 1:
        return 1
    cap = max(1, batch // 2) if two_tc else batch
    want = max(1, -(-target_rows // n_tok))           # ceil(target_rows / n_tok)
    tb = min(cap, want)
    while batch % tb:
        tb -= 1
    while tb > 1 and _step_vmem_bytes(tb, n_tok, dim, num_heads, x_bytes) > vmem_budget:
        tb -= 1
        while batch % tb:
            tb -= 1
    return tb


def prepare_attention_params(w_qkv, w_proj, b_proj, bias, *, num_heads, scale):
    """Host-side, one-time parameter prep (do NOT redo this per forward call).

    w_qkv: (C, 3C) pre-transposed qkv weight (x @ W layout).
    w_proj: (C, C) pre-transposed proj weight.  b_proj: (C,).
    bias: dense (num_heads, N, N) relative-position bias.
    """
    C = w_qkv.shape[0]
    hd = C // num_heads
    wqkv = w_qkv.reshape(C, 3, num_heads, hd).transpose(1, 2, 0, 3)  # (3, H, C, hd)
    wqkv = wqkv.at[0].multiply(scale).astype(jnp.bfloat16)           # fold scale
    wproj = w_proj.reshape(num_heads, hd, C).astype(jnp.bfloat16)    # (H, hd, C)
    bproj = jnp.asarray(b_proj, jnp.float32).reshape(1, C)
    bias = bias.astype(jnp.bfloat16)
    return wqkv, wproj, bproj, bias


def attention_forward(x, wqkv, wproj, bproj, bias, *, num_heads):
    """x: (B, N, C); remaining args come from prepare_attention_params."""
    B, N, C = x.shape
    head_dim = C // num_heads

    kind = _device_kind()
    two_tc = ("v7" in kind) or ("7x" in kind)          # 2 TensorCores per chip
    exp_in_bf16 = ("v6" in kind) or two_tc             # bf16 EUP generations

    tb = _pick_batch_tile(B, N, C, num_heads, x.dtype.itemsize, two_tc)
    est = _step_vmem_bytes(tb, N, C, num_heads, x.dtype.itemsize)
    vmem_limit = int(min(48 * 2**20, max(32 * 2**20, 2 * est)))

    kernel = partial(_attention_kernel, tb, N, num_heads, head_dim, C, exp_in_bf16)

    def build(single_buffer_consts):
        const_kw = ({"pipeline_mode": pl.Buffered(1)}
                    if single_buffer_consts else {})
        grid_spec = pltpu.PrefetchScalarGridSpec(
            num_scalar_prefetch=0,
            grid=(B // tb,),
            in_specs=[
                pl.BlockSpec((tb, N, C), lambda b: (b, 0, 0)),                     # x
                pl.BlockSpec((3, num_heads, C, head_dim),
                             lambda b: (0, 0, 0, 0), **const_kw),                  # qkv w
                pl.BlockSpec((num_heads, head_dim, C),
                             lambda b: (0, 0, 0), **const_kw),                     # proj w
                pl.BlockSpec((1, C), lambda b: (0, 0), **const_kw),                # proj b
                pl.BlockSpec((num_heads, N, N), lambda b: (0, 0, 0), **const_kw),  # rpe bias
            ],
            out_specs=pl.BlockSpec((tb, N, C), lambda b: (b, 0, 0)),
        )
        return pl.pallas_call(
            kernel,
            out_shape=jax.ShapeDtypeStruct((B, N, C), x.dtype),
            grid_spec=grid_spec,
            compiler_params=pltpu.CompilerParams(
                dimension_semantics=("parallel",),
                vmem_limit_bytes=vmem_limit),
        )

    try:
        return build(True)(x, wqkv, wproj, bproj, bias)
    except Exception:
        # TODO(synk): pl.Buffered(1) single-buffering of grid-invariant operands
        # unavailable on this jax version; fall back to default double-buffering.
        return build(False)(x, wqkv, wproj, bproj, bias)


def build_rpe_bias(table, g2l, g2g, wx, wy, nglo, num_heads):
    """Reproduces the rpe bias construction (relative_position_index gather +
    global/local concatenation) from the PyTorch module, in plain JAX glue."""
    coords_h = jnp.arange(wx)
    coords_w = jnp.arange(wy)
    coords = jnp.stack(jnp.meshgrid(coords_h, coords_w, indexing="ij"))  # (2, wx, wy)
    coords_flat = coords.reshape(2, -1)                                  # (2, wx*wy)
    rel = coords_flat[:, :, None] - coords_flat[:, None, :]              # (2, P, P)
    rel = jnp.transpose(rel, (1, 2, 0))
    rel = rel.at[:, :, 0].add(wx - 1)
    rel = rel.at[:, :, 1].add(wy - 1)
    rel = rel.at[:, :, 0].multiply(2 * wy - 1)
    rel_index = rel.sum(-1)                                              # (P, P)

    P = wx * wy
    local = table[rel_index.reshape(-1)].reshape(P, P, num_heads)        # (P, P, H)
    # TODO(synk): bicubic interpolate_pos_encoding path (only taken when the
    # runtime patch count differs from wx*wy) is not implemented.
    rel_bias = jnp.transpose(local, (2, 0, 1))                           # (H, P, P)

    if nglo > 0:
        g2l_part = jnp.broadcast_to(g2l[0][:, :, None], (num_heads, nglo, P))
        global_bias = jnp.concatenate([g2g, g2l_part], axis=-1)          # (H, nglo, N)
        l2g_part = jnp.broadcast_to(g2l[1][:, None, :], (num_heads, P, nglo))
        local_bias = jnp.concatenate([l2g_part, rel_bias], axis=-1)      # (H, P, N)
        bias = jnp.concatenate([global_bias, local_bias], axis=1)        # (H, N, N)
    else:
        bias = rel_bias
    return bias


def _reference(x, w_qkv, w_proj, b_proj, bias, num_heads, scale):
    """Pure-JAX (f32) mirror of the PyTorch forward, for verification."""
    B, N, C = x.shape
    hd = C // num_heads
    qkv = x @ w_qkv                                                    # (B, N, 3C)
    qkv = qkv.reshape(B, N, 3, num_heads, hd).transpose(2, 0, 3, 1, 4)
    q, k, v = qkv[0], qkv[1], qkv[2]                                   # (B, H, N, hd)
    attn = jnp.einsum("bhqd,bhkd->bhqk", q, k) * scale
    attn = attn + bias[None]
    attn = jax.nn.softmax(attn - attn.max(-1, keepdims=True), axis=-1)
    out = jnp.einsum("bhqk,bhkd->bhqd", attn, v)
    out = out.transpose(0, 2, 1, 3).reshape(B, N, C)
    return out @ w_proj + b_proj


if __name__ == "__main__":
    key = jax.random.PRNGKey(0)
    B = 2
    num_heads = 4
    head_dim = 8
    dim = num_heads * head_dim           # C = 32
    wx = wy = 4
    nglo = 1
    N = wx * wy + nglo                   # 17 tokens (1 global + 16 local)
    scale = head_dim ** (-0.5)

    k0, k1, k2, k3, k4, k5, k6 = jax.random.split(key, 7)
    x = jax.random.normal(k0, (B, N, dim), jnp.float32)

    # nn.Linear(dim, 3*dim, bias=False): torch weight is (3C, C); store transposed.
    w_qkv = (jax.random.normal(k1, (3 * dim, dim), jnp.float32) * 0.05).T
    # nn.Linear(dim, dim): weight (C, C) + bias (C,)
    w_proj = (jax.random.normal(k2, (dim, dim), jnp.float32) * 0.05).T
    b_proj = jax.random.normal(k3, (dim,), jnp.float32) * 0.05

    # rpe parameters (trunc_normal(std=0.02) approximated with normal * 0.02)
    table = jax.random.normal(k4, ((2 * wx - 1) * (2 * wy - 1), num_heads),
                              jnp.float32) * 0.02
    g2l = jax.random.normal(k5, (2, num_heads, nglo), jnp.float32) * 0.02
    g2g = jax.random.normal(k6, (num_heads, nglo, nglo), jnp.float32) * 0.02

    bias = build_rpe_bias(table, g2l, g2g, wx, wy, nglo, num_heads)   # (H, N, N)

    # One-time host-side parameter prep (scale folding, head-major reshapes, bf16).
    wqkv_p, wproj_p, bproj_p, bias_p = prepare_attention_params(
        w_qkv, w_proj, b_proj, bias, num_heads=num_heads, scale=scale)

    out = attention_forward(x, wqkv_p, wproj_p, bproj_p, bias_p,
                            num_heads=num_heads)
    out = jax.block_until_ready(out)

    ref = _reference(x, w_qkv, w_proj, b_proj, bias, num_heads, scale)
    max_err = float(jnp.max(jnp.abs(out - ref)))
    # bf16 MXU operands + bf16 rpe bias + bf16 probabilities + approx reciprocal.
    assert jnp.allclose(out, ref, atol=2e-2, rtol=2e-2), f"max err {max_err}"

    print("KERNEL_OK")
</pallas_src>

<mosaic_0001>
module attributes {stable_mosaic.version = 11 : i64} {
  func.func @_attention_kernel(%arg0: i32, %arg1: memref<2x17x32xf32, #tpu.memory_space<vmem>>, %arg2: memref<3x4x32x8xbf16, #tpu.memory_space<vmem>>, %arg3: memref<4x8x32xbf16, #tpu.memory_space<vmem>>, %arg4: memref<1x32xf32, #tpu.memory_space<vmem>>, %arg5: memref<4x17x17xbf16, #tpu.memory_space<vmem>>, %arg6: memref<2x17x32xf32, #tpu.memory_space<vmem>>) attributes {dimension_semantics = [#tpu.dimension_semantics<parallel>], iteration_bounds = array<i64: 1>, scalar_prefetch = 0 : i64, scratch_operands = 0 : i64, tpu.core_type = #tpu.core_type<tc>, window_params = [{transform_indices = @transform_0, window_bounds = array<i64: 2, 17, 32>}, {pipeline_mode = #tpu.pipeline_mode<synchronous>, transform_indices = @transform_1, window_bounds = array<i64: 3, 4, 32, 8>}, {pipeline_mode = #tpu.pipeline_mode<synchronous>, transform_indices = @transform_2, window_bounds = array<i64: 4, 8, 32>}, {pipeline_mode = #tpu.pipeline_mode<synchronous>, transform_indices = @transform_3, window_bounds = array<i64: 1, 32>}, {pipeline_mode = #tpu.pipeline_mode<synchronous>, transform_indices = @transform_4, window_bounds = array<i64: 4, 17, 17>}, {transform_indices = @transform_5, window_bounds = array<i64: 2, 17, 32>}]} {
    %c0 = arith.constant 0 : index
    %c0_0 = arith.constant 0 : index
    %c0_1 = arith.constant 0 : index
    %0 = vector.load %arg1[%c0, %c0_0, %c0_1] : memref<2x17x32xf32, #tpu.memory_space<vmem>>, vector<2x17x32xf32>
    %1 = arith.truncf %0 : vector<2x17x32xf32> to vector<2x17x32xbf16>
    %2 = vector.shape_cast %1 : vector<2x17x32xbf16> to vector<2x1x17x32xbf16>
    %3 = vector.shape_cast %2 : vector<2x1x17x32xbf16> to vector<2x1x17x32xbf16>
    %4 = vector.broadcast %3 : vector<2x1x17x32xbf16> to vector<2x4x17x32xbf16>
    %5 = vector.shape_cast %4 : vector<2x4x17x32xbf16> to vector<8x17x32xbf16>
    %c0_2 = arith.constant 0 : index
    %c0_3 = arith.constant 0 : index
    %c0_4 = arith.constant 0 : index
    %c0_5 = arith.constant 0 : index
    %6 = vector.load %arg2[%c0_2, %c0_3, %c0_4, %c0_5] : memref<3x4x32x8xbf16, #tpu.memory_space<vmem>>, vector<3x4x32x8xbf16>
    %7 = vector.extract_strided_slice %6 {offsets = [0, 0, 0, 0], sizes = [1, 4, 32, 8], strides = [1, 1, 1, 1]} : vector<3x4x32x8xbf16> to vector<1x4x32x8xbf16>
    %8 = vector.shape_cast %7 : vector<1x4x32x8xbf16> to vector<4x32x8xbf16>
    %9 = vector.shape_cast %8 : vector<4x32x8xbf16> to vector<1x4x32x8xbf16>
    %10 = vector.shape_cast %9 : vector<1x4x32x8xbf16> to vector<1x4x32x8xbf16>
    %11 = vector.broadcast %10 : vector<1x4x32x8xbf16> to vector<2x4x32x8xbf16>
    %12 = vector.shape_cast %11 : vector<2x4x32x8xbf16> to vector<8x32x8xbf16>
    "tpu.trace_start"() <{level = 10 : i32, message = "gnc,gcd->gnd"}> : () -> ()
    %cst = arith.constant dense<0.000000e+00> : vector<8x17x8xf32>
    %13 = tpu.matmul %5, %12, %cst {dimension_numbers = #tpu.dot_dimension_numbers<[2], [1], [1], [2], [0, 0, 0, 1, 1, 2], [0], [0]>} : vector<8x17x32xbf16>, vector<8x32x8xbf16>, vector<8x17x8xf32> -> vector<8x17x8xf32>
    "tpu.trace_stop"() : () -> ()
    %14 = arith.truncf %13 : vector<8x17x8xf32> to vector<8x17x8xbf16>
    %15 = vector.extract_strided_slice %6 {offsets = [1, 0, 0, 0], sizes = [1, 4, 32, 8], strides = [1, 1, 1, 1]} : vector<3x4x32x8xbf16> to vector<1x4x32x8xbf16>
    %16 = vector.shape_cast %15 : vector<1x4x32x8xbf16> to vector<4x32x8xbf16>
    %17 = vector.shape_cast %16 : vector<4x32x8xbf16> to vector<1x4x32x8xbf16>
    %18 = vector.shape_cast %17 : vector<1x4x32x8xbf16> to vector<1x4x32x8xbf16>
    %19 = vector.broadcast %18 : vector<1x4x32x8xbf16> to vector<2x4x32x8xbf16>
    %20 = vector.shape_cast %19 : vector<2x4x32x8xbf16> to vector<8x32x8xbf16>
    "tpu.trace_start"() <{level = 10 : i32, message = "gnc,gcd->gnd"}> : () -> ()
    %cst_6 = arith.constant dense<0.000000e+00> : vector<8x17x8xf32>
    %21 = tpu.matmul %5, %20, %cst_6 {dimension_numbers = #tpu.dot_dimension_numbers<[2], [1], [1], [2], [0, 0, 0, 1, 1, 2], [0], [0]>} : vector<8x17x32xbf16>, vector<8x32x8xbf16>, vector<8x17x8xf32> -> vector<8x17x8xf32>
    "tpu.trace_stop"() : () -> ()
    %22 = arith.truncf %21 : vector<8x17x8xf32> to vector<8x17x8xbf16>
    %23 = vector.extract_strided_slice %6 {offsets = [2, 0, 0, 0], sizes = [1, 4, 32, 8], strides = [1, 1, 1, 1]} : vector<3x4x32x8xbf16> to vector<1x4x32x8xbf16>
    %24 = vector.shape_cast %23 : vector<1x4x32x8xbf16> to vector<4x32x8xbf16>
    %25 = vector.shape_cast %24 : vector<4x32x8xbf16> to vector<1x4x32x8xbf16>
    %26 = vector.shape_cast %25 : vector<1x4x32x8xbf16> to vector<1x4x32x8xbf16>
    %27 = vector.broadcast %26 : vector<1x4x32x8xbf16> to vector<2x4x32x8xbf16>
    %28 = vector.shape_cast %27 : vector<2x4x32x8xbf16> to vector<8x32x8xbf16>
    "tpu.trace_start"() <{level = 10 : i32, message = "gnc,gcd->gnd"}> : () -> ()
    %cst_7 = arith.constant dense<0.000000e+00> : vector<8x17x8xf32>
    %29 = tpu.matmul %5, %28, %cst_7 {dimension_numbers = #tpu.dot_dimension_numbers<[2], [1], [1], [2], [0, 0, 0, 1, 1, 2], [0], [0]>} : vector<8x17x32xbf16>, vector<8x32x8xbf16>, vector<8x17x8xf32> -> vector<8x17x8xf32>
    "tpu.trace_stop"() : () -> ()
    %30 = arith.truncf %29 : vector<8x17x8xf32> to vector<8x17x8xbf16>
    "tpu.trace_start"() <{level = 10 : i32, message = "gnd,gmd->gnm"}> : () -> ()
    %cst_8 = arith.constant dense<0.000000e+00> : vector<8x17x17xf32>
    %31 = tpu.matmul %14, %22, %cst_8 {dimension_numbers = #tpu.dot_dimension_numbers<[2], [2], [1], [1], [0, 0, 0, 1, 1, 1], [0], [0]>} : vector<8x17x8xbf16>, vector<8x17x8xbf16>, vector<8x17x17xf32> -> vector<8x17x17xf32>
    "tpu.trace_stop"() : () -> ()
    %32 = vector.shape_cast %31 : vector<8x17x17xf32> to vector<2x4x17x17xf32>
    %c0_9 = arith.constant 0 : index
    %c0_10 = arith.constant 0 : index
    %c0_11 = arith.constant 0 : index
    %33 = vector.load %arg5[%c0_9, %c0_10, %c0_11] : memref<4x17x17xbf16, #tpu.memory_space<vmem>>, vector<4x17x17xbf16>
    %34 = arith.extf %33 : vector<4x17x17xbf16> to vector<4x17x17xf32>
    %35 = vector.shape_cast %34 : vector<4x17x17xf32> to vector<1x4x17x17xf32>
    %36 = vector.broadcast %35 : vector<1x4x17x17xf32> to vector<2x4x17x17xf32>
    %37 = arith.addf %32, %36 : vector<2x4x17x17xf32>
    %38 = vector.shape_cast %37 : vector<2x4x17x17xf32> to vector<8x17x17xf32>
    %cst_12 = arith.constant dense<0xFF800000> : vector<8x17xf32>
    %39 = vector.multi_reduction <maximumf>, %38, %cst_12 [2] : vector<8x17x17xf32> to vector<8x17xf32>
    %40 = vector.shape_cast %39 : vector<8x17xf32> to vector<8x17x1xf32>
    %41 = vector.broadcast %40 : vector<8x17x1xf32> to vector<8x17x17xf32>
    %42 = arith.subf %38, %41 : vector<8x17x17xf32>
    %43 = math.exp %42 : vector<8x17x17xf32>
    %44 = arith.truncf %43 : vector<8x17x17xf32> to vector<8x17x17xbf16>
    %45 = arith.extf %44 : vector<8x17x17xbf16> to vector<8x17x17xf32>
    %cst_13 = arith.constant dense<0.000000e+00> : vector<8x17xf32>
    %46 = vector.multi_reduction <add>, %45, %cst_13 [2] : vector<8x17x17xf32> to vector<8x17xf32>
    %47 = vector.shape_cast %46 : vector<8x17xf32> to vector<8x17x1xf32>
    "tpu.trace_start"() <{level = 10 : i32, message = "gnm,gmd->gnd"}> : () -> ()
    %cst_14 = arith.constant dense<0.000000e+00> : vector<8x17x8xf32>
    %48 = tpu.matmul %44, %30, %cst_14 {dimension_numbers = #tpu.dot_dimension_numbers<[2], [1], [1], [2], [0, 0, 0, 1, 1, 2], [0], [0]>} : vector<8x17x17xbf16>, vector<8x17x8xbf16>, vector<8x17x8xf32> -> vector<8x17x8xf32>
    "tpu.trace_stop"() : () -> ()
    %49 = tpu.reciprocal %47 {approx = true} : vector<8x17x1xf32> -> vector<8x17x1xf32>
    %50 = vector.broadcast %49 : vector<8x17x1xf32> to vector<8x17x8xf32>
    %51 = arith.mulf %48, %50 : vector<8x17x8xf32>
    %52 = arith.truncf %51 : vector<8x17x8xf32> to vector<8x17x8xbf16>
    %c0_15 = arith.constant 0 : index
    %c0_16 = arith.constant 0 : index
    %c0_17 = arith.constant 0 : index
    %53 = vector.load %arg3[%c0_15, %c0_16, %c0_17] : memref<4x8x32xbf16, #tpu.memory_space<vmem>>, vector<4x8x32xbf16>
    %54 = vector.shape_cast %53 : vector<4x8x32xbf16> to vector<1x4x8x32xbf16>
    %55 = vector.shape_cast %54 : vector<1x4x8x32xbf16> to vector<1x4x8x32xbf16>
    %56 = vector.broadcast %55 : vector<1x4x8x32xbf16> to vector<2x4x8x32xbf16>
    %57 = vector.shape_cast %56 : vector<2x4x8x32xbf16> to vector<8x8x32xbf16>
    "tpu.trace_start"() <{level = 10 : i32, message = "gnd,gdc->gnc"}> : () -> ()
    %cst_18 = arith.constant dense<0.000000e+00> : vector<8x17x32xf32>
    %58 = tpu.matmul %52, %57, %cst_18 {dimension_numbers = #tpu.dot_dimension_numbers<[2], [1], [1], [2], [0, 0, 0, 1, 1, 2], [0], [0]>} : vector<8x17x8xbf16>, vector<8x8x32xbf16>, vector<8x17x32xf32> -> vector<8x17x32xf32>
    "tpu.trace_stop"() : () -> ()
    %59 = vector.shape_cast %58 : vector<8x17x32xf32> to vector<2x4x17x32xf32>
    %60 = vector.extract_strided_slice %59 {offsets = [0, 0, 0, 0], sizes = [2, 1, 17, 32], strides = [1, 1, 1, 1]} : vector<2x4x17x32xf32> to vector<2x1x17x32xf32>
    %61 = vector.shape_cast %60 : vector<2x1x17x32xf32> to vector<2x17x32xf32>
    %62 = vector.extract_strided_slice %59 {offsets = [0, 1, 0, 0], sizes = [2, 1, 17, 32], strides = [1, 1, 1, 1]} : vector<2x4x17x32xf32> to vector<2x1x17x32xf32>
    %63 = vector.shape_cast %62 : vector<2x1x17x32xf32> to vector<2x17x32xf32>
    %64 = arith.addf %61, %63 : vector<2x17x32xf32>
    %65 = vector.extract_strided_slice %59 {offsets = [0, 2, 0, 0], sizes = [2, 1, 17, 32], strides = [1, 1, 1, 1]} : vector<2x4x17x32xf32> to vector<2x1x17x32xf32>
    %66 = vector.shape_cast %65 : vector<2x1x17x32xf32> to vector<2x17x32xf32>
    %67 = arith.addf %64, %66 : vector<2x17x32xf32>
    %68 = vector.extract_strided_slice %59 {offsets = [0, 3, 0, 0], sizes = [2, 1, 17, 32], strides = [1, 1, 1, 1]} : vector<2x4x17x32xf32> to vector<2x1x17x32xf32>
    %69 = vector.shape_cast %68 : vector<2x1x17x32xf32> to vector<2x17x32xf32>
    %70 = arith.addf %67, %69 : vector<2x17x32xf32>
    %c0_19 = arith.constant 0 : index
    %c0_20 = arith.constant 0 : index
    %71 = vector.load %arg4[%c0_19, %c0_20] : memref<1x32xf32, #tpu.memory_space<vmem>>, vector<1x32xf32>
    %72 = vector.shape_cast %71 : vector<1x32xf32> to vector<1x1x32xf32>
    %73 = vector.broadcast %72 : vector<1x1x32xf32> to vector<2x17x32xf32>
    %74 = arith.addf %70, %73 : vector<2x17x32xf32>
    %c0_21 = arith.constant 0 : index
    %c0_22 = arith.constant 0 : index
    %c0_23 = arith.constant 0 : index
    %75 = vector.load %arg6[%c0_21, %c0_22, %c0_23] : memref<2x17x32xf32, #tpu.memory_space<vmem>>, vector<2x17x32xf32>
    tpu.vector_store %arg6[%c0_21, %c0_22, %c0_23], %74 {strides = array<i32>} : memref<2x17x32xf32, #tpu.memory_space<vmem>>, vector<2x17x32xf32>,
    return
  }
  func.func @transform_0(%arg0: i32) -> (i32, i32, i32) {
    %c0_i32 = arith.constant 0 : i32
    %c0_i32_0 = arith.constant 0 : i32
    %c0_i32_1 = arith.constant 0 : i32
    return %arg0, %c0_i32, %c0_i32_0 : i32, i32, i32
  }
  func.func @transform_1(%arg0: i32) -> (i32, i32, i32, i32) {
    %c0_i32 = arith.constant 0 : i32
    %c0_i32_0 = arith.constant 0 : i32
    %c0_i32_1 = arith.constant 0 : i32
    %c0_i32_2 = arith.constant 0 : i32
    %c0_i32_3 = arith.constant 0 : i32
    return %c0_i32, %c0_i32_0, %c0_i32_1, %c0_i32_2 : i32, i32, i32, i32
  }
  func.func @transform_2(%arg0: i32) -> (i32, i32, i32) {
    %c0_i32 = arith.constant 0 : i32
    %c0_i32_0 = arith.constant 0 : i32
    %c0_i32_1 = arith.constant 0 : i32
    %c0_i32_2 = arith.constant 0 : i32
    return %c0_i32, %c0_i32_0, %c0_i32_1 : i32, i32, i32
  }
  func.func @transform_3(%arg0: i32) -> (i32, i32) {
    %c0_i32 = arith.constant 0 : i32
    %c0_i32_0 = arith.constant 0 : i32
    %c0_i32_1 = arith.constant 0 : i32
    return %c0_i32, %c0_i32_0 : i32, i32
  }
  func.func @transform_4(%arg0: i32) -> (i32, i32, i32) {
    %c0_i32 = arith.constant 0 : i32
    %c0_i32_0 = arith.constant 0 : i32
    %c0_i32_1 = arith.constant 0 : i32
    %c0_i32_2 = arith.constant 0 : i32
    return %c0_i32, %c0_i32_0, %c0_i32_1 : i32, i32, i32
  }
  func.func @transform_5(%arg0: i32) -> (i32, i32, i32) {
    %c0_i32 = arith.constant 0 : i32
    %c0_i32_0 = arith.constant 0 : i32
    %c0_i32_1 = arith.constant 0 : i32
    return %arg0, %c0_i32, %c0_i32_0 : i32, i32, i32
  }
}

module attributes {stable_mosaic.version = 11 : i64} {
  func.func @_attention_kernel(%arg0: i32, %arg1: memref<2x17x32xf32, #tpu.memory_space<vmem>>, %arg2: memref<3x4x32x8xbf16, #tpu.memory_space<vmem>>, %arg3: memref<4x8x32xbf16, #tpu.memory_space<vmem>>, %arg4: memref<1x32xf32, #tpu.memory_space<vmem>>, %arg5: memref<4x17x17xbf16, #tpu.memory_space<vmem>>, %arg6: memref<2x17x32xf32, #tpu.memory_space<vmem>>) attributes {dimension_semantics = [#tpu.dimension_semantics<parallel>], iteration_bounds = array<i64: 1>, scalar_prefetch = 0 : i64, scratch_operands = 0 : i64, tpu.core_type = #tpu.core_type<tc>, window_params = [{transform_indices = @transform_0, window_bounds = array<i64: 2, 17, 32>}, {pipeline_mode = #tpu.pipeline_mode<synchronous>, transform_indices = @transform_1, window_bounds = array<i64: 3, 4, 32, 8>}, {pipeline_mode = #tpu.pipeline_mode<synchronous>, transform_indices = @transform_2, window_bounds = array<i64: 4, 8, 32>}, {pipeline_mode = #tpu.pipeline_mode<synchronous>, transform_indices = @transform_3, window_bounds = array<i64: 1, 32>}, {pipeline_mode = #tpu.pipeline_mode<synchronous>, transform_indices = @transform_4, window_bounds = array<i64: 4, 17, 17>}, {transform_indices = @transform_5, window_bounds = array<i64: 2, 17, 32>}]} {
    %c0 = arith.constant 0 : index
    %c0_0 = arith.constant 0 : index
    %c0_1 = arith.constant 0 : index
    %0 = vector.load %arg1[%c0, %c0_0, %c0_1] : memref<2x17x32xf32, #tpu.memory_space<vmem>>, vector<2x17x32xf32>
    %1 = arith.truncf %0 : vector<2x17x32xf32> to vector<2x17x32xbf16>
    %2 = vector.shape_cast %1 : vector<2x17x32xbf16> to vector<2x1x17x32xbf16>
    %3 = vector.shape_cast %2 : vector<2x1x17x32xbf16> to vector<2x1x17x32xbf16>
    %4 = vector.broadcast %3 : vector<2x1x17x32xbf16> to vector<2x4x17x32xbf16>
    %5 = vector.shape_cast %4 : vector<2x4x17x32xbf16> to vector<8x17x32xbf16>
    %c0_2 = arith.constant 0 : index
    %c0_3 = arith.constant 0 : index
    %c0_4 = arith.constant 0 : index
    %c0_5 = arith.constant 0 : index
    %6 = vector.load %arg2[%c0_2, %c0_3, %c0_4, %c0_5] : memref<3x4x32x8xbf16, #tpu.memory_space<vmem>>, vector<3x4x32x8xbf16>
    %7 = vector.extract_strided_slice %6 {offsets = [0, 0, 0, 0], sizes = [1, 4, 32, 8], strides = [1, 1, 1, 1]} : vector<3x4x32x8xbf16> to vector<1x4x32x8xbf16>
    %8 = vector.shape_cast %7 : vector<1x4x32x8xbf16> to vector<4x32x8xbf16>
    %9 = vector.shape_cast %8 : vector<4x32x8xbf16> to vector<1x4x32x8xbf16>
    %10 = vector.shape_cast %9 : vector<1x4x32x8xbf16> to vector<1x4x32x8xbf16>
    %11 = vector.broadcast %10 : vector<1x4x32x8xbf16> to vector<2x4x32x8xbf16>
    %12 = vector.shape_cast %11 : vector<2x4x32x8xbf16> to vector<8x32x8xbf16>
    "tpu.trace_start"() <{level = 10 : i32, message = "gnc,gcd->gnd"}> : () -> ()
    %cst = arith.constant dense<0.000000e+00> : vector<8x17x8xf32>
    %13 = tpu.matmul %5, %12, %cst {dimension_numbers = #tpu.dot_dimension_numbers<[2], [1], [1], [2], [0, 0, 0, 1, 1, 2], [0], [0]>} : vector<8x17x32xbf16>, vector<8x32x8xbf16>, vector<8x17x8xf32> -> vector<8x17x8xf32>
    "tpu.trace_stop"() : () -> ()
    %14 = arith.truncf %13 : vector<8x17x8xf32> to vector<8x17x8xbf16>
    %15 = vector.extract_strided_slice %6 {offsets = [1, 0, 0, 0], sizes = [1, 4, 32, 8], strides = [1, 1, 1, 1]} : vector<3x4x32x8xbf16> to vector<1x4x32x8xbf16>
    %16 = vector.shape_cast %15 : vector<1x4x32x8xbf16> to vector<4x32x8xbf16>
    %17 = vector.shape_cast %16 : vector<4x32x8xbf16> to vector<1x4x32x8xbf16>
    %18 = vector.shape_cast %17 : vector<1x4x32x8xbf16> to vector<1x4x32x8xbf16>
    %19 = vector.broadcast %18 : vector<1x4x32x8xbf16> to vector<2x4x32x8xbf16>
    %20 = vector.shape_cast %19 : vector<2x4x32x8xbf16> to vector<8x32x8xbf16>
    "tpu.trace_start"() <{level = 10 : i32, message = "gnc,gcd->gnd"}> : () -> ()
    %cst_6 = arith.constant dense<0.000000e+00> : vector<8x17x8xf32>
    %21 = tpu.matmul %5, %20, %cst_6 {dimension_numbers = #tpu.dot_dimension_numbers<[2], [1], [1], [2], [0, 0, 0, 1, 1, 2], [0], [0]>} : vector<8x17x32xbf16>, vector<8x32x8xbf16>, vector<8x17x8xf32> -> vector<8x17x8xf32>
    "tpu.trace_stop"() : () -> ()
    %22 = arith.truncf %21 : vector<8x17x8xf32> to vector<8x17x8xbf16>
    %23 = vector.extract_strided_slice %6 {offsets = [2, 0, 0, 0], sizes = [1, 4, 32, 8], strides = [1, 1, 1, 1]} : vector<3x4x32x8xbf16> to vector<1x4x32x8xbf16>
    %24 = vector.shape_cast %23 : vector<1x4x32x8xbf16> to vector<4x32x8xbf16>
    %25 = vector.shape_cast %24 : vector<4x32x8xbf16> to vector<1x4x32x8xbf16>
    %26 = vector.shape_cast %25 : vector<1x4x32x8xbf16> to vector<1x4x32x8xbf16>
    %27 = vector.broadcast %26 : vector<1x4x32x8xbf16> to vector<2x4x32x8xbf16>
    %28 = vector.shape_cast %27 : vector<2x4x32x8xbf16> to vector<8x32x8xbf16>
    "tpu.trace_start"() <{level = 10 : i32, message = "gnc,gcd->gnd"}> : () -> ()
    %cst_7 = arith.constant dense<0.000000e+00> : vector<8x17x8xf32>
    %29 = tpu.matmul %5, %28, %cst_7 {dimension_numbers = #tpu.dot_dimension_numbers<[2], [1], [1], [2], [0, 0, 0, 1, 1, 2], [0], [0]>} : vector<8x17x32xbf16>, vector<8x32x8xbf16>, vector<8x17x8xf32> -> vector<8x17x8xf32>
    "tpu.trace_stop"() : () -> ()
    %30 = arith.truncf %29 : vector<8x17x8xf32> to vector<8x17x8xbf16>
    "tpu.trace_start"() <{level = 10 : i32, message = "gnd,gmd->gnm"}> : () -> ()
    %cst_8 = arith.constant dense<0.000000e+00> : vector<8x17x17xf32>
    %31 = tpu.matmul %14, %22, %cst_8 {dimension_numbers = #tpu.dot_dimension_numbers<[2], [2], [1], [1], [0, 0, 0, 1, 1, 1], [0], [0]>} : vector<8x17x8xbf16>, vector<8x17x8xbf16>, vector<8x17x17xf32> -> vector<8x17x17xf32>
    "tpu.trace_stop"() : () -> ()
    %32 = vector.shape_cast %31 : vector<8x17x17xf32> to vector<2x4x17x17xf32>
    %c0_9 = arith.constant 0 : index
    %c0_10 = arith.constant 0 : index
    %c0_11 = arith.constant 0 : index
    %33 = vector.load %arg5[%c0_9, %c0_10, %c0_11] : memref<4x17x17xbf16, #tpu.memory_space<vmem>>, vector<4x17x17xbf16>
    %34 = arith.extf %33 : vector<4x17x17xbf16> to vector<4x17x17xf32>
    %35 = vector.shape_cast %34 : vector<4x17x17xf32> to vector<1x4x17x17xf32>
    %36 = vector.broadcast %35 : vector<1x4x17x17xf32> to vector<2x4x17x17xf32>
    %37 = arith.addf %32, %36 : vector<2x4x17x17xf32>
    %38 = vector.shape_cast %37 : vector<2x4x17x17xf32> to vector<8x17x17xf32>
    %cst_12 = arith.constant dense<0xFF800000> : vector<8x17xf32>
    %39 = vector.multi_reduction <maximumf>, %38, %cst_12 [2] : vector<8x17x17xf32> to vector<8x17xf32>
    %40 = vector.shape_cast %39 : vector<8x17xf32> to vector<8x17x1xf32>
    %41 = vector.broadcast %40 : vector<8x17x1xf32> to vector<8x17x17xf32>
    %42 = arith.subf %38, %41 : vector<8x17x17xf32>
    %43 = math.exp %42 : vector<8x17x17xf32>
    %44 = arith.truncf %43 : vector<8x17x17xf32> to vector<8x17x17xbf16>
    %45 = arith.extf %44 : vector<8x17x17xbf16> to vector<8x17x17xf32>
    %cst_13 = arith.constant dense<0.000000e+00> : vector<8x17xf32>
    %46 = vector.multi_reduction <add>, %45, %cst_13 [2] : vector<8x17x17xf32> to vector<8x17xf32>
    %47 = vector.shape_cast %46 : vector<8x17xf32> to vector<8x17x1xf32>
    "tpu.trace_start"() <{level = 10 : i32, message = "gnm,gmd->gnd"}> : () -> ()
    %cst_14 = arith.constant dense<0.000000e+00> : vector<8x17x8xf32>
    %48 = tpu.matmul %44, %30, %cst_14 {dimension_numbers = #tpu.dot_dimension_numbers<[2], [1], [1], [2], [0, 0, 0, 1, 1, 2], [0], [0]>} : vector<8x17x17xbf16>, vector<8x17x8xbf16>, vector<8x17x8xf32> -> vector<8x17x8xf32>
    "tpu.trace_stop"() : () -> ()
    %49 = tpu.reciprocal %47 {approx = true} : vector<8x17x1xf32> -> vector<8x17x1xf32>
    %50 = vector.broadcast %49 : vector<8x17x1xf32> to vector<8x17x8xf32>
    %51 = arith.mulf %48, %50 : vector<8x17x8xf32>
    %52 = arith.truncf %51 : vector<8x17x8xf32> to vector<8x17x8xbf16>
    %c0_15 = arith.constant 0 : index
    %c0_16 = arith.constant 0 : index
    %c0_17 = arith.constant 0 : index
    %53 = vector.load %arg3[%c0_15, %c0_16, %c0_17] : memref<4x8x32xbf16, #tpu.memory_space<vmem>>, vector<4x8x32xbf16>
    %54 = vector.shape_cast %53 : vector<4x8x32xbf16> to vector<1x4x8x32xbf16>
    %55 = vector.shape_cast %54 : vector<1x4x8x32xbf16> to vector<1x4x8x32xbf16>
    %56 = vector.broadcast %55 : vector<1x4x8x32xbf16> to vector<2x4x8x32xbf16>
    %57 = vector.shape_cast %56 : vector<2x4x8x32xbf16> to vector<8x8x32xbf16>
    "tpu.trace_start"() <{level = 10 : i32, message = "gnd,gdc->gnc"}> : () -> ()
    %cst_18 = arith.constant dense<0.000000e+00> : vector<8x17x32xf32>
    %58 = tpu.matmul %52, %57, %cst_18 {dimension_numbers = #tpu.dot_dimension_numbers<[2], [1], [1], [2], [0, 0, 0, 1, 1, 2], [0], [0]>} : vector<8x17x8xbf16>, vector<8x8x32xbf16>, vector<8x17x32xf32> -> vector<8x17x32xf32>
    "tpu.trace_stop"() : () -> ()
    %59 = vector.shape_cast %58 : vector<8x17x32xf32> to vector<2x4x17x32xf32>
    %60 = vector.extract_strided_slice %59 {offsets = [0, 0, 0, 0], sizes = [2, 1, 17, 32], strides = [1, 1, 1, 1]} : vector<2x4x17x32xf32> to vector<2x1x17x32xf32>
    %61 = vector.shape_cast %60 : vector<2x1x17x32xf32> to vector<2x17x32xf32>
    %62 = vector.extract_strided_slice %59 {offsets = [0, 1, 0, 0], sizes = [2, 1, 17, 32], strides = [1, 1, 1, 1]} : vector<2x4x17x32xf32> to vector<2x1x17x32xf32>
    %63 = vector.shape_cast %62 : vector<2x1x17x32xf32> to vector<2x17x32xf32>
    %64 = arith.addf %61, %63 : vector<2x17x32xf32>
    %65 = vector.extract_strided_slice %59 {offsets = [0, 2, 0, 0], sizes = [2, 1, 17, 32], strides = [1, 1, 1, 1]} : vector<2x4x17x32xf32> to vector<2x1x17x32xf32>
    %66 = vector.shape_cast %65 : vector<2x1x17x32xf32> to vector<2x17x32xf32>
    %67 = arith.addf %64, %66 : vector<2x17x32xf32>
    %68 = vector.extract_strided_slice %59 {offsets = [0, 3, 0, 0], sizes = [2, 1, 17, 32], strides = [1, 1, 1, 1]} : vector<2x4x17x32xf32> to vector<2x1x17x32xf32>
    %69 = vector.shape_cast %68 : vector<2x1x17x32xf32> to vector<2x17x32xf32>
    %70 = arith.addf %67, %69 : vector<2x17x32xf32>
    %c0_19 = arith.constant 0 : index
    %c0_20 = arith.constant 0 : index
    %71 = vector.load %arg4[%c0_19, %c0_20] : memref<1x32xf32, #tpu.memory_space<vmem>>, vector<1x32xf32>
    %72 = vector.shape_cast %71 : vector<1x32xf32> to vector<1x1x32xf32>
    %73 = vector.broadcast %72 : vector<1x1x32xf32> to vector<2x17x32xf32>
    %74 = arith.addf %70, %73 : vector<2x17x32xf32>
    %c0_21 = arith.constant 0 : index
    %c0_22 = arith.constant 0 : index
    %c0_23 = arith.constant 0 : index
    %75 = vector.load %arg6[%c0_21, %c0_22, %c0_23] : memref<2x17x32xf32, #tpu.memory_space<vmem>>, vector<2x17x32xf32>
    tpu.vector_store %arg6[%c0_21, %c0_22, %c0_23], %74 {strides = array<i32>} : memref<2x17x32xf32, #tpu.memory_space<vmem>>, vector<2x17x32xf32>,
    return
  }
  func.func @transform_0(%arg0: i32) -> (i32, i32, i32) {
    %c0_i32 = arith.constant 0 : i32
    %c0_i32_0 = arith.constant 0 : i32
    %c0_i32_1 = arith.constant 0 : i32
    return %arg0, %c0_i32, %c0_i32_0 : i32, i32, i32
  }
  func.func @transform_1(%arg0: i32) -> (i32, i32, i32, i32) {
    %c0_i32 = arith.constant 0 : i32
    %c0_i32_0 = arith.constant 0 : i32
    %c0_i32_1 = arith.constant 0 : i32
    %c0_i32_2 = arith.constant 0 : i32
    %c0_i32_3 = arith.constant 0 : i32
    return %c0_i32, %c0_i32_0, %c0_i32_1, %c0_i32_2 : i32, i32, i32, i32
  }
  func.func @transform_2(%arg0: i32) -> (i32, i32, i32) {
    %c0_i32 = arith.constant 0 : i32
    %c0_i32_0 = arith.constant 0 : i32
    %c0_i32_1 = arith.constant 0 : i32
    %c0_i32_2 = arith.constant 0 : i32
    return %c0_i32, %c0_i32_0, %c0_i32_1 : i32, i32, i32
  }
  func.func @transform_3(%arg0: i32) -> (i32, i32) {
    %c0_i32 = arith.constant 0 : i32
    %c0_i32_0 = arith.constant 0 : i32
    %c0_i32_1 = arith.constant 0 : i32
    return %c0_i32, %c0_i32_0 : i32, i32
  }
  func.func @transform_4(%arg0: i32) -> (i32, i32, i32) {
    %c0_i32 = arith.constant 0 : i32
    %c0_i32_0 = arith.constant 0 : i32
    %c0_i32_1 = arith.constant 0 : i32
    %c0_i32_2 = arith.constant 0 : i32
    return %c0_i32, %c0_i32_0, %c0_i32_1 : i32, i32, i32
  }
  func.func @transform_5(%arg0: i32) -> (i32, i32, i32) {
    %c0_i32 = arith.constant 0 : i32
    %c0_i32_0 = arith.constant 0 : i32
    %c0_i32_1 = arith.constant 0 : i32
    return %arg0, %c0_i32, %c0_i32_0 : i32, i32, i32
  }
}

</mosaic_0001>

<bundles_post_ra>
// kernel: tpu_custom_call.1
= control target key start
LH: loop header
LB: loop body
LE: loop exit
PB: predicated region body
PF: predicated region fallthrough
CT: control target
= control target key end

     0   :  { %vm91_vm0 = vcmask 261120   ;;  %vm1436_vm1 = vcmask 64512   ;;  %vm2229_vm2 = vcmask 1040384   ;;  %vm1972_vm3 = vcmask 131072   ;;  %s4856_s1 = inlined_call_operand.vmem [shape: bf16[3,4,32,8], index: 1, kind: input, shape index: {}]   ;;  %s4857_s0 = inlined_call_operand.vmem [shape: f32[2,17,32], index: 0, kind: input, shape index: {}]   ;;  %s4858_s4 = inlined_call_operand.vmem [shape: bf16[4,17,17], index: 4, kind: input, shape index: {}]   ;;  %s4859_s2 = inlined_call_operand.vmem [shape: bf16[4,8,32], index: 2, kind: input, shape index: {}]   ;;  %s4860_s3 = inlined_call_operand.vmem [shape: f32[1,32], index: 3, kind: input, shape index: {}]   ;;  %s4861_s5 = inlined_call_operand.vmem [shape: f32[2,17,32], index: 5, kind: output, shape index: {}]  }
   0x1   :  { %v3944_v0 = vld [vmem:[%s4856_s1] sm:$0xff]   ;;  %v3945_v1 = vld [vmem:[%s4856_s1 + $0x10] sm:$0xff]   ;;  %v3946_v2 = vld [vmem:[%s4856_s1 + $0x8] sm:$0xff]   ;;  %vm1965_vm4 = vcmask 138240   ;;  %vm2756_vm5 = vcmask 1043456   ;;  %vm3228_vm6 = vcmask 253952  }
   0x2   :  { %3551 = vmatprep.subr.bf16.mxu0 %v3944_v0  ;;  %3559 = vmatprep.subr.bf16.mxu1 %v3945_v1  ;;  %v3947_v3 = vld [vmem:[%s4856_s1 + $0x18] sm:$0xff]   ;;  %v21_v4 = vld [vmem:[%s4857_s0] sm:$0xff]  ;;  %v22_v5 = vld [vmem:[%s4857_s0 + $0x8] sm:$0xff] }
   0x3   :  { %3552 = vmatpush3.bf16.msra.mxu0 %v3944_v0  ;;  %3560 = vmatpush3.bf16.msra.mxu1 %v3945_v1  ;;  %v23_v6 = vld [vmem:[%s4857_s0 + $0x10] sm:$0x1]  ;;  %v4116_v7 = vpack.c.bf16 %v22_v5, %v21_v4  ;;  %v3948_v8 = vld [vmem:[%s4856_s1 + $0x20] sm:$0xff]   ;;  %v3950_v11 = vld [vmem:[%s4856_s1 + $0x28] sm:$0xff]  }
   0x4   :  { %3553 = vmatprep.subr.bf16.mxu0 %v3946_v2  ;;  %3561 = vmatprep.subr.bf16.mxu1 %v3947_v3  ;;  %v4121_v9 = vpack.c.bf16 %v23_v6, %v23_v6  ;;  %v3949_v10 = vld [vmem:[%s4856_s1 + $0x30] sm:$0xff]   ;;  %v3951_v12 = vld [vmem:[%s4856_s1 + $0x38] sm:$0xff]   ;;  %v25_v14 = vld [vmem:[%s4857_s0 + $0x20] sm:$0xff] }
   0x5   :  { %3555 = vmatprep.mubr.msk.bf16.mxu0 %vm91_vm0, %v4116_v7  ;;  %3563 = vmatprep.mubr.msk.bf16.mxu1 %vm91_vm0, %v4116_v7  ;;  %v24_v13 = vld [vmem:[%s4857_s0 + $0x18] sm:$0xff]  ;;  %v26_v16 = vld [vmem:[%s4857_s0 + $0x28] sm:$0x1]  ;;  %v3952_v18 = vld [vmem:[%s4856_s1 + $0x40] sm:$0xff]  }
   0x6   :  { %v4150_v15 = vpack.c.bf16 %v25_v14, %v24_v13  ;;  %v4163_v17 = vpack.c.bf16 %v26_v16, %v26_v16  ;;  %v3953_v19 = vld [vmem:[%s4856_s1 + $0x50] sm:$0xff]   ;;  %v3954_v20 = vld [vmem:[%s4856_s1 + $0x48] sm:$0xff]   ;;  %v3955_v21 = vld [vmem:[%s4856_s1 + $0x58] sm:$0xff]  }
   0x7   :  { %3554 = vmatpush3.bf16.msra.mxu0 %v3946_v2  ;;  %3562 = vmatpush3.bf16.msra.mxu1 %v3947_v3  ;;  %v3956_v22 = vld [vmem:[%s4856_s1 + $0x60] sm:$0xff]   ;;  %v3957_v23 = vld [vmem:[%s4856_s1 + $0x70] sm:$0xff]   ;;  %v3958_v24 = vld [vmem:[%s4856_s1 + $0x68] sm:$0xff]  }
   0x8   :  { %3567 = vmatprep.subr.bf16.mxu0 %v3948_v8  ;;  %3575 = vmatprep.subr.bf16.mxu1 %v3949_v10  ;;  %v3959_v25 = vld [vmem:[%s4856_s1 + $0x78] sm:$0xff]   ;;  %v3960_v26 = vld [vmem:[%s4856_s1 + $0x80] sm:$0xff]   ;;  %v3961_v27 = vld [vmem:[%s4856_s1 + $0x90] sm:$0xff]  }
   0x9   :  { %v3962_v28 = vld [vmem:[%s4856_s1 + $0x88] sm:$0xff]   ;;  %v3963_v29 = vld [vmem:[%s4856_s1 + $0x98] sm:$0xff]   ;;  %v3964_v30 = vld [vmem:[%s4856_s1 + $0xa0] sm:$0xff]  }
   0xa   :  { %3556 = vmatmul.mubr.msk.bf16.vlgmr.msra.gmra.mrb[0].mxu0 %vm91_vm0, %v4121_v9  ;;  %3564 = vmatmul.mubr.msk.bf16.vlgmr.msra.gmra.mrb[0].mxu1 %vm91_vm0, %v4121_v9  ;;  %v3965_v31 = vld [vmem:[%s4856_s1 + $0xb0] sm:$0xff]   ;;  %v3966_v32 = vld [vmem:[%s4856_s1 + $0xa8] sm:$0xff]   ;;  %v3967_v33 = vld [vmem:[%s4856_s1 + $0xb8] sm:$0xff]  }
   0xb   :  { %3568 = vmatpush3.bf16.msra.mxu0 %v3948_v8  ;;  %3576 = vmatpush3.bf16.msra.mxu1 %v3949_v10 }
   0xc   :  { %3569 = vmatprep.subr.bf16.mxu0 %v3950_v11  ;;  %3577 = vmatprep.subr.bf16.mxu1 %v3951_v12 }
   0xd   :  { %3571 = vmatprep.mubr.msk.bf16.mxu0 %vm91_vm0, %v4116_v7  ;;  %3579 = vmatprep.mubr.msk.bf16.mxu1 %vm91_vm0, %v4116_v7 }
   0xf   :  { %3570 = vmatpush3.bf16.msra.mxu0 %v3950_v11  ;;  %3578 = vmatpush3.bf16.msra.mxu1 %v3951_v12 }
  0x10   :  { %3583 = vmatprep.subr.bf16.mxu0 %v3944_v0  ;;  %3591 = vmatprep.subr.bf16.mxu1 %v3945_v1 }
  0x12   :  { %3572 = vmatmul.mubr.msk.bf16.vlgmr.msra.gmra.mrb[4].mxu0 %vm91_vm0, %v4121_v9  ;;  %3580 = vmatmul.mubr.msk.bf16.vlgmr.msra.gmra.mrb[4].mxu1 %vm91_vm0, %v4121_v9 }
  0x13   :  { %3584 = vmatpush3.bf16.msra.mxu0 %v3944_v0  ;;  %3592 = vmatpush3.bf16.msra.mxu1 %v3945_v1 }
  0x14   :  { %3585 = vmatprep.subr.bf16.mxu0 %v3946_v2  ;;  %3593 = vmatprep.subr.bf16.mxu1 %v3947_v3 }
  0x15   :  { %3587 = vmatprep.mubr.msk.bf16.mxu0 %vm91_vm0, %v4150_v15  ;;  %3595 = vmatprep.mubr.msk.bf16.mxu1 %vm91_vm0, %v4150_v15 }
  0x17   :  { %3586 = vmatpush3.bf16.msra.mxu0 %v3946_v2  ;;  %3594 = vmatpush3.bf16.msra.mxu1 %v3947_v3 }
  0x18   :  { %3599 = vmatprep.subr.bf16.mxu0 %v3948_v8  ;;  %3607 = vmatprep.subr.bf16.mxu1 %v3949_v10 }
  0x1a   :  { %3588 = vmatmul.mubr.msk.bf16.vlgmr.msra.gmra.mrb[8].mxu0 %vm91_vm0, %v4163_v17  ;;  %3596 = vmatmul.mubr.msk.bf16.vlgmr.msra.gmra.mrb[8].mxu1 %vm91_vm0, %v4163_v17 }
  0x1b   :  { %3600 = vmatpush3.bf16.msra.mxu0 %v3948_v8  ;;  %3608 = vmatpush3.bf16.msra.mxu1 %v3949_v10 }
  0x1c   :  { %3601 = vmatprep.subr.bf16.mxu0 %v3950_v11  ;;  %3609 = vmatprep.subr.bf16.mxu1 %v3951_v12 }
  0x1d   :  { %3603 = vmatprep.mubr.msk.bf16.mxu0 %vm91_vm0, %v4150_v15  ;;  %3611 = vmatprep.mubr.msk.bf16.mxu1 %vm91_vm0, %v4150_v15 }
  0x1f   :  { %3602 = vmatpush3.bf16.msra.mxu0 %v3950_v11  ;;  %3610 = vmatpush3.bf16.msra.mxu1 %v3951_v12 }
  0x20   :  { %3615 = vmatprep.subr.bf16.mxu0 %v3952_v18  ;;  %3623 = vmatprep.subr.bf16.mxu1 %v3953_v19 }
  0x22   :  { %3604 = vmatmul.mubr.msk.bf16.vlgmr.msra.gmra.mrb[12].mxu0 %vm91_vm0, %v4163_v17  ;;  %3612 = vmatmul.mubr.msk.bf16.vlgmr.msra.gmra.mrb[12].mxu1 %vm91_vm0, %v4163_v17 }
  0x23   :  { %3616 = vmatpush3.bf16.msra.mxu0 %v3952_v18  ;;  %3624 = vmatpush3.bf16.msra.mxu1 %v3953_v19 }
  0x24   :  { %3617 = vmatprep.subr.bf16.mxu0 %v3954_v20  ;;  %3625 = vmatprep.subr.bf16.mxu1 %v3955_v21 }
  0x25   :  { %3619 = vmatprep.mubr.msk.bf16.mxu0 %vm91_vm0, %v4116_v7  ;;  %3627 = vmatprep.mubr.msk.bf16.mxu1 %vm91_vm0, %v4116_v7 }
  0x27   :  { %3618 = vmatpush3.bf16.msra.mxu0 %v3954_v20  ;;  %3626 = vmatpush3.bf16.msra.mxu1 %v3955_v21 }
  0x28   :  { %3631 = vmatprep.subr.bf16.mxu0 %v3956_v22  ;;  %3639 = vmatprep.subr.bf16.mxu1 %v3957_v23 }
  0x2a   :  { %3620 = vmatmul.mubr.msk.bf16.vlgmr.msra.gmra.mrb[16].mxu0 %vm91_vm0, %v4121_v9  ;;  %3628 = vmatmul.mubr.msk.bf16.vlgmr.msra.gmra.mrb[16].mxu1 %vm91_vm0, %v4121_v9 }
  0x2b   :  { %3632 = vmatpush3.bf16.msra.mxu0 %v3956_v22  ;;  %3640 = vmatpush3.bf16.msra.mxu1 %v3957_v23 }
  0x2c   :  { %3633 = vmatprep.subr.bf16.mxu0 %v3958_v24  ;;  %3641 = vmatprep.subr.bf16.mxu1 %v3959_v25 }
  0x2d   :  { %3635 = vmatprep.mubr.msk.bf16.mxu0 %vm91_vm0, %v4116_v7  ;;  %3643 = vmatprep.mubr.msk.bf16.mxu1 %vm91_vm0, %v4116_v7 }
  0x2f   :  { %3634 = vmatpush3.bf16.msra.mxu0 %v3958_v24  ;;  %3642 = vmatpush3.bf16.msra.mxu1 %v3959_v25 }
  0x30   :  { %3647 = vmatprep.subr.bf16.mxu0 %v3952_v18  ;;  %3655 = vmatprep.subr.bf16.mxu1 %v3953_v19 }
  0x32   :  { %3636 = vmatmul.mubr.msk.bf16.vlgmr.msra.gmra.mrb[20].mxu0 %vm91_vm0, %v4121_v9  ;;  %3644 = vmatmul.mubr.msk.bf16.vlgmr.msra.gmra.mrb[20].mxu1 %vm91_vm0, %v4121_v9 }
  0x33   :  { %3648 = vmatpush3.bf16.msra.mxu0 %v3952_v18  ;;  %3656 = vmatpush3.bf16.msra.mxu1 %v3953_v19 }
  0x34   :  { %3649 = vmatprep.subr.bf16.mxu0 %v3954_v20  ;;  %3657 = vmatprep.subr.bf16.mxu1 %v3955_v21 }
  0x35   :  { %3651 = vmatprep.mubr.msk.bf16.mxu0 %vm91_vm0, %v4150_v15  ;;  %3659 = vmatprep.mubr.msk.bf16.mxu1 %vm91_vm0, %v4150_v15 }
  0x37   :  { %3650 = vmatpush3.bf16.msra.mxu0 %v3954_v20  ;;  %3658 = vmatpush3.bf16.msra.mxu1 %v3955_v21 }
  0x38   :  { %3663 = vmatprep.subr.bf16.mxu0 %v3956_v22  ;;  %3671 = vmatprep.subr.bf16.mxu1 %v3957_v23 }
  0x3a   :  { %3652 = vmatmul.mubr.msk.bf16.vlgmr.msra.gmra.mrb[24].mxu0 %vm91_vm0, %v4163_v17  ;;  %3660 = vmatmul.mubr.msk.bf16.vlgmr.msra.gmra.mrb[24].mxu1 %vm91_vm0, %v4163_v17 }
  0x3b   :  { %3664 = vmatpush3.bf16.msra.mxu0 %v3956_v22  ;;  %3672 = vmatpush3.bf16.msra.mxu1 %v3957_v23 }
  0x3c   :  { %3665 = vmatprep.subr.bf16.mxu0 %v3958_v24  ;;  %3673 = vmatprep.subr.bf16.mxu1 %v3959_v25 }
  0x3d   :  { %3667 = vmatprep.mubr.msk.bf16.mxu0 %vm91_vm0, %v4150_v15  ;;  %3675 = vmatprep.mubr.msk.bf16.mxu1 %vm91_vm0, %v4150_v15 }
  0x3f   :  { %3666 = vmatpush3.bf16.msra.mxu0 %v3958_v24  ;;  %3674 = vmatpush3.bf16.msra.mxu1 %v3959_v25 }
  0x40   :  { %3679 = vmatprep.subr.bf16.mxu0 %v3960_v26  ;;  %3687 = vmatprep.subr.bf16.mxu1 %v3961_v27 }
  0x42   :  { %3668 = vmatmul.mubr.msk.bf16.vlgmr.msra.gmra.mrb[28].mxu0 %vm91_vm0, %v4163_v17  ;;  %3676 = vmatmul.mubr.msk.bf16.vlgmr.msra.gmra.mrb[28].mxu1 %vm91_vm0, %v4163_v17 }
  0x43   :  { %3680 = vmatpush3.bf16.msra.mxu0 %v3960_v26  ;;  %3688 = vmatpush3.bf16.msra.mxu1 %v3961_v27 }
  0x44   :  { %3681 = vmatprep.subr.bf16.mxu0 %v3962_v28  ;;  %3689 = vmatprep.subr.bf16.mxu1 %v3963_v29 }
  0x45   :  { %3683 = vmatprep.mubr.msk.bf16.mxu0 %vm91_vm0, %v4116_v7  ;;  %3691 = vmatprep.mubr.msk.bf16.mxu1 %vm91_vm0, %v4116_v7 }
  0x47   :  { %3682 = vmatpush3.bf16.msra.mxu0 %v3962_v28  ;;  %3690 = vmatpush3.bf16.msra.mxu1 %v3963_v29 }
  0x48   :  { %3695 = vmatprep.subr.bf16.mxu0 %v3964_v30  ;;  %3703 = vmatprep.subr.bf16.mxu1 %v3965_v31 }
  0x4a   :  { %3684 = vmatmul.mubr.msk.bf16.vlgmr.msra.gmra.mrb[32].mxu0 %vm91_vm0, %v4121_v9  ;;  %3692 = vmatmul.mubr.msk.bf16.vlgmr.msra.gmra.mrb[32].mxu1 %vm91_vm0, %v4121_v9 }
  0x4b   :  { %3696 = vmatpush3.bf16.msra.mxu0 %v3964_v30  ;;  %3704 = vmatpush3.bf16.msra.mxu1 %v3965_v31 }
  0x4c   :  { %3697 = vmatprep.subr.bf16.mxu0 %v3966_v32  ;;  %3705 = vmatprep.subr.bf16.mxu1 %v3967_v33 }
  0x4d   :  { %3699 = vmatprep.mubr.msk.bf16.mxu0 %vm91_vm0, %v4116_v7  ;;  %3707 = vmatprep.mubr.msk.bf16.mxu1 %vm91_vm0, %v4116_v7 }
  0x4f   :  { %3698 = vmatpush3.bf16.msra.mxu0 %v3966_v32  ;;  %3706 = vmatpush3.bf16.msra.mxu1 %v3967_v33 }
  0x50   :  { %3711 = vmatprep.subr.bf16.mxu0 %v3960_v26  ;;  %3719 = vmatprep.subr.bf16.mxu1 %v3961_v27 }
  0x52   :  { %3700 = vmatmul.mubr.msk.bf16.vlgmr.msra.gmra.mrb[36].mxu0 %vm91_vm0, %v4121_v9  ;;  %3708 = vmatmul.mubr.msk.bf16.vlgmr.msra.gmra.mrb[36].mxu1 %vm91_vm0, %v4121_v9 }
  0x53   :  { %3712 = vmatpush3.bf16.msra.mxu0 %v3960_v26  ;;  %3720 = vmatpush3.bf16.msra.mxu1 %v3961_v27 }
  0x54   :  { %3713 = vmatprep.subr.bf16.mxu0 %v3962_v28  ;;  %3721 = vmatprep.subr.bf16.mxu1 %v3963_v29 }
  0x55   :  { %3715 = vmatprep.mubr.msk.bf16.mxu0 %vm91_vm0, %v4150_v15  ;;  %3723 = vmatprep.mubr.msk.bf16.mxu1 %vm91_vm0, %v4150_v15 }
  0x57   :  { %3714 = vmatpush3.bf16.msra.mxu0 %v3962_v28  ;;  %3722 = vmatpush3.bf16.msra.mxu1 %v3963_v29 }
  0x58   :  { %3727 = vmatprep.subr.bf16.mxu0 %v3964_v30  ;;  %3735 = vmatprep.subr.bf16.mxu1 %v3965_v31 }
  0x5a   :  { %3716 = vmatmul.mubr.msk.bf16.vlgmr.msra.gmra.mrb[40].mxu0 %vm91_vm0, %v4163_v17  ;;  %3724 = vmatmul.mubr.msk.bf16.vlgmr.msra.gmra.mrb[40].mxu1 %vm91_vm0, %v4163_v17 }
  0x5b   :  { %3728 = vmatpush3.bf16.msra.mxu0 %v3964_v30  ;;  %3736 = vmatpush3.bf16.msra.mxu1 %v3965_v31 }
  0x5c   :  { %3729 = vmatprep.subr.bf16.mxu0 %v3966_v32  ;;  %3737 = vmatprep.subr.bf16.mxu1 %v3967_v33 }
  0x5d   :  { %3731 = vmatprep.mubr.msk.bf16.mxu0 %vm91_vm0, %v4150_v15  ;;  %3739 = vmatprep.mubr.msk.bf16.mxu1 %vm91_vm0, %v4150_v15 }
  0x5f   :  { %3730 = vmatpush3.bf16.msra.mxu0 %v3966_v32  ;;  %3738 = vmatpush3.bf16.msra.mxu1 %v3967_v33 }
  0x62   :  { %3732 = vmatmul.mubr.msk.bf16.vlgmr.msra.gmra.mrb[44].mxu0 %vm91_vm0, %v4163_v17  ;;  %3740 = vmatmul.mubr.msk.bf16.vlgmr.msra.gmra.mrb[44].mxu1 %vm91_vm0, %v4163_v17 }
  0xdd   :  { %v4289_v34 = vpop.f32.mrb[0].mxu0  ;;  %v4291_v35 = vpop.f32.mrb[0].mxu1 }
  0xde   :  { %v132_v36 = vpop.f32.mrb[1].mxu0  ;;  %v192_v37 = vpop.f32.mrb[1].mxu1 }
  0xdf   :  { %v3558_v38 = vpop.f32.mrb[2].mxu0  ;;  %v3566_v39 = vpop.f32.mrb[2].mxu1 }
  0xe0   :  { %v135_v40 = vpop.f32.mrb[3].mxu0  ;;  %v195_v42 = vpop.f32.mrb[3].mxu1 }
  0xe1   :  { %v524_v41 = vpack.c.bf16 %v135_v40, %v132_v36  ;;  %v526_v43 = vpack.c.bf16 %v195_v42, %v192_v37 }
  0xe3   :  { %3747 = vmatprep.mubr.msk.bf16.mxu0 %vm1436_vm1, %v524_v41  ;;  %3755 = vmatprep.mubr.msk.bf16.mxu1 %vm1436_vm1, %v526_v43 }
  0xe5   :  { %v4295_v44 = vpop.f32.mrb[4].mxu0  ;;  %v4297_v45 = vpop.f32.mrb[4].mxu1 }
  0xe6   :  { %v4299_v46 = vpop.f32.mrb[5].mxu0  ;;  %v4301_v47 = vpop.f32.mrb[5].mxu1 }
  0xe7   :  { %v3574_v48 = vpop.f32.mrb[6].mxu0  ;;  %v3582_v49 = vpop.f32.mrb[6].mxu1 }
  0xe8   :  { %v4303_v50 = vpop.f32.mrb[7].mxu0  ;;  %v4307_v52 = vpop.f32.mrb[7].mxu1  ;;  %v525_v49 = vpack.c.bf16 %v4289_v34, %v4289_v34 }
  0xe9   :  { %v528_v51 = vpack.c.bf16 %v4303_v50, %v4299_v46  ;;  %v530_v53 = vpack.c.bf16 %v4307_v52, %v4301_v47 }
  0xed   :  { %v4311_v54 = vpop.f32.mrb[8].mxu0  ;;  %v4313_v55 = vpop.f32.mrb[8].mxu1 }
  0xee   :  { %v4315_v56 = vpop.f32.mrb[9].mxu0  ;;  %v4317_v57 = vpop.f32.mrb[9].mxu1 }
  0xef   :  { %v3590_v58 = vpop.f32.mrb[10].mxu0  ;;  %v3598_v59 = vpop.f32.mrb[10].mxu1 }
  0xf0   :  { %v4319_v60 = vpop.f32.mrb[11].mxu0  ;;  %v4323_v62 = vpop.f32.mrb[11].mxu1 }
  0xf1   :  { %v532_v61 = vpack.c.bf16 %v4319_v60, %v4315_v56  ;;  %v534_v63 = vpack.c.bf16 %v4323_v62, %v4317_v57 }
  0xf5   :  { %v4327_v0 = vpop.f32.mrb[12].mxu0  ;;  %v4329_v1 = vpop.f32.mrb[12].mxu1 }
  0xf6   :  { %v4331_v2 = vpop.f32.mrb[13].mxu0  ;;  %v4333_v3 = vpop.f32.mrb[13].mxu1 }
  0xf7   :  { %v3606_v4 = vpop.f32.mrb[14].mxu0  ;;  %v3614_v5 = vpop.f32.mrb[14].mxu1 }
  0xf8   :  { %v4335_v6 = vpop.f32.mrb[15].mxu0  ;;  %v4339_v8 = vpop.f32.mrb[15].mxu1  ;;  %v527_v4 = vpack.c.bf16 %v4291_v35, %v4291_v35 }
  0xf9   :  { %v536_v7 = vpack.c.bf16 %v4335_v6, %v4331_v2  ;;  %v538_v9 = vpack.c.bf16 %v4339_v8, %v4333_v3 }
  0xfd   :  { %v3621_v10 = vpop.f32.mrb[16].mxu0  ;;  %v3629_v11 = vpop.f32.mrb[16].mxu1 }
  0xfe   :  { %v586_v12 = vpop.f32.mrb[17].mxu0  ;;  %v646_v13 = vpop.f32.mrb[17].mxu1  ;;  %v973_v20 = vpack.c.bf16 %v3621_v10, %v3621_v10  ;;  %v975_v22 = vpack.c.bf16 %v3629_v11, %v3629_v11 }
  0xff   :  { %v3622_v14 = vpop.f32.mrb[18].mxu0  ;;  %v3630_v15 = vpop.f32.mrb[18].mxu1 }
 0x100   :  { %v589_v16 = vpop.f32.mrb[19].mxu0  ;;  %v649_v18 = vpop.f32.mrb[19].mxu1  ;;  %v1447_v36 = vsel %vm1436_vm1, %v973_v20, 0  ;;  %v1507_v37 = vsel %vm1436_vm1, %v975_v22, 0 }
 0x101   :  { %v972_v17 = vpack.c.bf16 %v589_v16, %v586_v12  ;;  %v974_v19 = vpack.c.bf16 %v649_v18, %v646_v13 }
 0x103   :  { %v1444_v21 = vsel %vm1436_vm1, %v972_v17, 0  ;;  %3919 = vmatprep.subr.msk.bf16.mxu0 %vm1436_vm1, %v972_v17  ;;  %v1504_v23 = vsel %vm1436_vm1, %v974_v19, 0  ;;  %3921 = vmatprep.subr.msk.bf16.mxu1 %vm1436_vm1, %v974_v19 }
 0x104   :  { %3744 = vmatpush3.bf16.xpose.msra.mxu0 %v1444_v21  ;;  %3752 = vmatpush3.bf16.xpose.msra.mxu1 %v1504_v23 }
 0x105   :  { %3920 = vmatprep.subr.msk.bf16.mxu0 %vm1436_vm1, %v973_v20  ;;  %v3637_v24 = vpop.f32.mrb[20].mxu0  ;;  %3922 = vmatprep.subr.msk.bf16.mxu1 %vm1436_vm1, %v975_v22  ;;  %v3645_v25 = vpop.f32.mrb[20].mxu1 }
 0x106   :  { %v706_v26 = vpop.f32.mrb[21].mxu0  ;;  %v766_v27 = vpop.f32.mrb[21].mxu1  ;;  %v977_v11 = vpack.c.bf16 %v3637_v24, %v3637_v24  ;;  %v979_v13 = vpack.c.bf16 %v3645_v25, %v3645_v25  ;;  %v529_v25 = vpack.c.bf16 %v4295_v44, %v4295_v44 }
 0x107   :  { %v3638_v28 = vpop.f32.mrb[22].mxu0  ;;  %v3646_v29 = vpop.f32.mrb[22].mxu1 }
 0x108   :  { %v709_v30 = vpop.f32.mrb[23].mxu0  ;;  %v769_v32 = vpop.f32.mrb[23].mxu1  ;;  %v1567_v47 = vsel %vm1436_vm1, %v977_v11, 0  ;;  %v1627_v52 = vsel %vm1436_vm1, %v979_v13, 0  ;;  %v531_v28 = vpack.c.bf16 %v4297_v45, %v4297_v45 }
 0x109   :  { %v976_v31 = vpack.c.bf16 %v709_v30, %v706_v26  ;;  %v978_v33 = vpack.c.bf16 %v769_v32, %v766_v27 }
 0x10b   :  { %v1564_v10 = vsel %vm1436_vm1, %v976_v31, 0  ;;  %v1624_v12 = vsel %vm1436_vm1, %v978_v33, 0 }
 0x10c   :  { %3746 = vmatpush3.bf16.xpose.msra.mxu0 %v1447_v36  ;;  %3754 = vmatpush3.bf16.xpose.msra.mxu1 %v1507_v37 }
 0x10d   :  { %3923 = vmatprep.subr.msk.bf16.mxu0 %vm1436_vm1, %v976_v31  ;;  %v3653_v38 = vpop.f32.mrb[24].mxu0  ;;  %3925 = vmatprep.subr.msk.bf16.mxu1 %vm1436_vm1, %v978_v33  ;;  %v3661_v39 = vpop.f32.mrb[24].mxu1 }
 0x10e   :  { %v814_v40 = vpop.f32.mrb[25].mxu0  ;;  %v862_v41 = vpop.f32.mrb[25].mxu1  ;;  %v981_v31 = vpack.c.bf16 %v3653_v38, %v3653_v38  ;;  %v983_v44 = vpack.c.bf16 %v3661_v39, %v3661_v39  ;;  %v4064_v38 = vmov 0  }
 0x10f   :  { %v3654_v42 = vpop.f32.mrb[26].mxu0  ;;  %v3662_v43 = vpop.f32.mrb[26].mxu1  ;;  %v4409_v39 = vsel %vm2229_vm2, 65535, %v4064_v38 }
 0x110   :  { %v817_v48 = vpop.f32.mrb[27].mxu0  ;;  %v865_v59 = vpop.f32.mrb[27].mxu1 }
 0x111   :  { %v980_v58 = vpack.c.bf16 %v817_v48, %v814_v40  ;;  %v982_v5 = vpack.c.bf16 %v865_v59, %v862_v41  ;;  %v1687_v48 = vsel %vm1436_vm1, %v981_v31, 0 }
 0x113   :  { %3748 = vmatmul.mubr.msk.bf16.vlgmr.msra.gmra.mrb[48].mxu0 %vm1436_vm1, %v525_v49  ;;  %3756 = vmatmul.mubr.msk.bf16.vlgmr.msra.gmra.mrb[48].mxu1 %vm1436_vm1, %v527_v4  ;;  %v1684_v30 = vsel %vm1436_vm1, %v980_v58, 0  ;;  %v1744_v32 = vsel %vm1436_vm1, %v982_v5, 0  ;;  %v1747_v49 = vsel %vm1436_vm1, %v983_v44, 0 }
 0x114   :  { %3760 = vmatpush3.bf16.xpose.msra.mxu0 %v1564_v10  ;;  %3763 = vmatprep.mubr.msk.bf16.mxu0 %vm1436_vm1, %v528_v51 }
 0x115   :  { %3768 = vmatpush3.bf16.xpose.msra.mxu1 %v1624_v12  ;;  %v4365_v34 = vpop.f32.mrb[28].mxu0  ;;  %3771 = vmatprep.mubr.msk.bf16.mxu1 %vm1436_vm1, %v530_v53  ;;  %v4372_v35 = vpop.f32.mrb[28].mxu1 }
 0x116   :  { %3924 = vmatprep.subr.msk.bf16.mxu0 %vm1436_vm1, %v977_v11  ;;  %v910_v14 = vpop.f32.mrb[29].mxu0  ;;  %3926 = vmatprep.subr.msk.bf16.mxu1 %vm1436_vm1, %v979_v13  ;;  %v958_v15 = vpop.f32.mrb[29].mxu1 }
 0x117   :  { %v3670_v16 = vpop.f32.mrb[30].mxu0  ;;  %v3678_v46 = vpop.f32.mrb[30].mxu1 }
 0x118   :  { %v913_v50 = vpop.f32.mrb[31].mxu0  ;;  %v961_v17 = vpop.f32.mrb[31].mxu1  ;;  %v533_v16 = vpack.c.bf16 %v4311_v54, %v4311_v54 }
 0x119   :  { %v4375_v51 = vpack.c.bf16 %v913_v50, %v910_v14  ;;  %v4377_v18 = vpack.c.bf16 %v961_v17, %v958_v15 }
 0x11b   :  { %v1864_v54 = vsel %vm1436_vm1, %v4377_v18, 0 }
 0x11c   :  { %3762 = vmatpush3.bf16.xpose.msra.mxu0 %v1567_v47  ;;  %v535_v47 = vpack.c.bf16 %v4313_v55, %v4313_v55 }
 0x11d   :  { %3770 = vmatpush3.bf16.xpose.msra.mxu1 %v1627_v52  ;;  %3927 = vmatprep.subr.msk.bf16.mxu0 %vm1436_vm1, %v980_v58  ;;  %v4382_v53 = vpop.f32.mrb[32].mxu0  ;;  %v4385_v19 = vpop.f32.mrb[32].mxu1 }
 0x11e   :  { %3929 = vmatprep.subr.msk.bf16.mxu1 %vm1436_vm1, %v982_v5  ;;  %v1034_v20 = vpop.f32.mrb[33].mxu0  ;;  %v1094_v21 = vpop.f32.mrb[33].mxu1 }
 0x11f   :  { %v3686_v22 = vpop.f32.mrb[34].mxu0  ;;  %v3694_v23 = vpop.f32.mrb[34].mxu1 }
 0x120   :  { %v1037_v24 = vpop.f32.mrb[35].mxu0  ;;  %v1097_v27 = vpop.f32.mrb[35].mxu1  ;;  %v987_v22 = vpack.c.bf16 %v4372_v35, %v4372_v35 }
 0x121   :  { %v4389_v26 = vpack.c.bf16 %v1037_v24, %v1034_v20  ;;  %v4393_v29 = vpack.c.bf16 %v1097_v27, %v1094_v21  ;;  %v1804_v20 = vsel %vm1436_vm1, %v4375_v51, 0  ;;  %v985_v21 = vpack.c.bf16 %v4365_v34, %v4365_v34 }
 0x123   :  { %3764 = vmatmul.mubr.msk.bf16.vlgmr.msra.gmra.mrb[52].mxu0 %vm1436_vm1, %v529_v25  ;;  %v1807_v27 = vsel %vm1436_vm1, %v985_v21, 0 }
 0x124   :  { %3772 = vmatmul.mubr.msk.bf16.vlgmr.msra.gmra.mrb[52].mxu1 %vm1436_vm1, %v531_v28  ;;  %3776 = vmatpush3.bf16.xpose.msra.mxu0 %v1684_v30  ;;  %v1867_v28 = vsel %vm1436_vm1, %v987_v22, 0  ;;  %v1421_v30 = vpack.c.bf16 %v4382_v53, %v4382_v53  ;;  %v4504_v53 = vld [vmem:[%s4858_s4 + $0x14] sm:$0x1] }
 0x125   :  { %3779 = vmatprep.mubr.msk.bf16.mxu0 %vm1436_vm1, %v532_v61  ;;  %3784 = vmatpush3.bf16.xpose.msra.mxu1 %v1744_v32  ;;  %v3701_v45 = vpop.f32.mrb[36].mxu0  ;;  %v3709_v36 = vpop.f32.mrb[36].mxu1  ;;  %v537_v32 = vpack.c.bf16 %v4327_v0, %v4327_v0  ;;  %v4494_v0 = vld [vmem:[%s4858_s4 + $0x8] sm:$0x1] }
 0x126   :  { %3787 = vmatprep.mubr.msk.bf16.mxu1 %vm1436_vm1, %v534_v63  ;;  %3928 = vmatprep.subr.msk.bf16.mxu0 %vm1436_vm1, %v981_v31  ;;  %v1425_v33 = vpack.c.bf16 %v3701_v45, %v3701_v45  ;;  %v1154_v37 = vpop.f32.mrb[37].mxu0  ;;  %v1427_v56 = vpack.c.bf16 %v3709_v36, %v3709_v36  ;;  %v1214_v60 = vpop.f32.mrb[37].mxu1  ;;  %v1423_v31 = vpack.c.bf16 %v4385_v19, %v4385_v19  ;;  %v1931_v19 = vunpack.c.l.bf16 %v4494_v0 }
 0x127   :  { %3930 = vmatprep.subr.msk.bf16.mxu1 %vm1436_vm1, %v983_v44  ;;  %v3702_v61 = vpop.f32.mrb[38].mxu0  ;;  %v3710_v41 = vpop.f32.mrb[38].mxu1  ;;  %v2233_v44 = vand.u32 %v4409_v39, %v1421_v30  ;;  %v539_v45 = vpack.c.bf16 %v4329_v1, %v4329_v1  ;;  %v4499_v1 = vld [vmem:[%s4858_s4] sm:$0xff]  }
 0x128   :  { %v4412_v40 = vand.u32 %v4409_v39, %v1425_v33  ;;  %v1157_v57 = vpop.f32.mrb[39].mxu0  ;;  %v4415_v62 = vand.u32 %v4409_v39, %v1427_v56  ;;  %v1217_v42 = vpop.f32.mrb[39].mxu1  ;;  %v2290_v33 = vand.u32 %v4409_v39, %v1423_v31  ;;  %v3361_v38 = vunpack.c.h.bf16 %v4499_v1 }
 0x129   :  { %v4417_v63 = vpack.c.bf16 %v1157_v57, %v1154_v37  ;;  %v4419_v43 = vpack.c.bf16 %v1217_v42, %v1214_v60  ;;  %v4512_v37 = vld [vmem:[%s4858_s4 + $0xc] sm:$0xff]  }
 0x12c   :  { %3778 = vmatpush3.bf16.xpose.msra.mxu0 %v1687_v48  ;;  %v1932_v48 = vunpack.c.l.bf16 %v4512_v37 }
 0x12d   :  { %3786 = vmatpush3.bf16.xpose.msra.mxu1 %v1747_v49  ;;  %3931 = vmatprep.subr.msk.bf16.mxu0 %vm1436_vm1, %v4375_v51  ;;  %v3717_v58 = vpop.f32.mrb[40].mxu0  ;;  %v3725_v4 = vpop.f32.mrb[40].mxu1 }
 0x12e   :  { %3933 = vmatprep.subr.msk.bf16.mxu1 %vm1436_vm1, %v4377_v18  ;;  %v1429_v59 = vpack.c.bf16 %v3717_v58, %v3717_v58  ;;  %v1262_v5 = vpop.f32.mrb[41].mxu0  ;;  %v1431_v10 = vpack.c.bf16 %v3725_v4, %v3725_v4  ;;  %v1310_v11 = vpop.f32.mrb[41].mxu1 }
 0x12f   :  { %v3718_v12 = vpop.f32.mrb[42].mxu0  ;;  %v3726_v14 = vpop.f32.mrb[42].mxu1 }
 0x130   :  { %v4428_v13 = vand.u32 %v4409_v39, %v1429_v59  ;;  %v1265_v15 = vpop.f32.mrb[43].mxu0  ;;  %v4433_v46 = vand.u32 %v4409_v39, %v1431_v10  ;;  %v1313_v17 = vpop.f32.mrb[43].mxu1  ;;  %v1933_v10 = vunpack.c.h.bf16 %v4512_v37 }
 0x131   :  { %v4435_v50 = vpack.c.bf16 %v1265_v15, %v1262_v5  ;;  %v4439_v52 = vpack.c.bf16 %v1313_v17, %v1310_v11  ;;  %v4552_v17 = vld [vmem:[%s4858_s4 + $0x20] sm:$0x1] }
 0x133   :  { %3780 = vmatmul.mubr.msk.bf16.vlgmr.msra.gmra.mrb[56].mxu0 %vm1436_vm1, %v533_v16 }
 0x134   :  { %3788 = vmatmul.mubr.msk.bf16.vlgmr.msra.gmra.mrb[56].mxu1 %vm1436_vm1, %v535_v47  ;;  %3792 = vmatpush3.bf16.xpose.msra.mxu0 %v1804_v20  ;;  %v4559_v20 = vld [vmem:[%s4858_s4 + $0x2c] sm:$0x1] }
 0x135   :  { %3795 = vmatprep.mubr.msk.bf16.mxu0 %vm1436_vm1, %v536_v7  ;;  %3800 = vmatpush3.bf16.xpose.msra.mxu1 %v1864_v54  ;;  %v3733_v55 = vpop.f32.mrb[44].mxu0  ;;  %v3741_v51 = vpop.f32.mrb[44].mxu1  ;;  %v4566_v54 = vld [vmem:[%s4858_s4 + $0x18] sm:$0xff]  }
 0x136   :  { %3803 = vmatprep.mubr.msk.bf16.mxu1 %vm1436_vm1, %v538_v9  ;;  %3932 = vmatprep.subr.msk.bf16.mxu0 %vm1436_vm1, %v985_v21  ;;  %v1433_v34 = vpack.c.bf16 %v3733_v55, %v3733_v55  ;;  %v1358_v18 = vpop.f32.mrb[45].mxu0  ;;  %v1435_v35 = vpack.c.bf16 %v3741_v51, %v3741_v51  ;;  %v1406_v23 = vpop.f32.mrb[45].mxu1  ;;  %v4572_v55 = vld [vmem:[%s4858_s4 + $0x24] sm:$0xff]   ;;  %v3364_v51 = vunpack.c.l.bf16 %v4566_v54 }
 0x137   :  { %3934 = vmatprep.subr.msk.bf16.mxu1 %vm1436_vm1, %v987_v22  ;;  %v3734_v24 = vpop.f32.mrb[46].mxu0  ;;  %v3742_v6 = vpop.f32.mrb[46].mxu1  ;;  %v1937_v22 = vunpack.c.l.bf16 %v4552_v17 }
 0x138   :  { %v4462_v2 = vand.u32 %v4409_v39, %v1433_v34  ;;  %v1361_v7 = vpop.f32.mrb[47].mxu0  ;;  %v4465_v25 = vand.u32 %v4409_v39, %v1435_v35  ;;  %v1409_v8 = vpop.f32.mrb[47].mxu1  ;;  %v1940_v34 = vunpack.c.l.bf16 %v4559_v20  ;;  %v1938_v35 = vunpack.c.l.bf16 %v4572_v55 }
 0x139   :  { %v4467_v3 = vpack.c.bf16 %v1361_v7, %v1358_v18  ;;  %v4469_v9 = vpack.c.bf16 %v1409_v8, %v1406_v23 }
 0x13c   :  { %3794 = vmatpush3.bf16.xpose.msra.mxu0 %v1807_v27 }
 0x13d   :  { %3802 = vmatpush3.bf16.xpose.msra.mxu1 %v1867_v28  ;;  %3807 = vmatprep.subr.bf16.mxu0 %v4389_v26 }
 0x13e   :  { %3815 = vmatprep.subr.bf16.mxu1 %v4393_v29 }
 0x143   :  { %3796 = vmatmul.mubr.msk.bf16.vlgmr.msra.gmra.mrb[60].mxu0 %vm1436_vm1, %v537_v32  ;;  %v1939_v32 = vunpack.c.h.bf16 %v4572_v55 }
 0x144   :  { %3804 = vmatmul.mubr.msk.bf16.vlgmr.msra.gmra.mrb[60].mxu1 %vm1436_vm1, %v539_v45  ;;  %3808 = vmatpush3.bf16.msra.mxu0 %v4389_v26  ;;  %v3360_v26 = vunpack.c.l.bf16 %v4499_v1 }
 0x145   :  { %3816 = vmatpush3.bf16.msra.mxu1 %v4393_v29  ;;  %3809 = vmatprep.subr.bf16.mxu0 %v2233_v44  ;;  %v1934_v29 = vunpack.c.l.bf16 %v4504_v53 }
 0x146   :  { %3817 = vmatprep.subr.bf16.mxu1 %v2290_v33 }
 0x148   :  { %3810 = vmatpush3.bf16.msra.mxu0 %v2233_v44 }
 0x149   :  { %3818 = vmatpush3.bf16.msra.mxu1 %v2290_v33  ;;  %3823 = vmatprep.subr.bf16.mxu0 %v4417_v63  ;;  %v3365_v33 = vunpack.c.h.bf16 %v4566_v54 }
 0x14a   :  { %3831 = vmatprep.subr.bf16.mxu1 %v4419_v43 }
 0x1e6   :  { %v3749_v36 = vpop.f32.mrb[48].mxu0  ;;  %v3757_v56 = vpop.f32.mrb[48].mxu1 }
 0x1e7   :  { %v4517_v39 = vadd.f32 %v3749_v36, %v1931_v19  ;;  %v1483_v60 = vpop.f32.mrb[49].mxu0  ;;  %v1543_v41 = vpop.f32.mrb[49].mxu1  ;;  %v4525_v42 = vadd.f32 %v3757_v56, %v1934_v29 }
 0x1e8   :  { %v4521_v61 = vadd.f32 %v3360_v26, %v1483_v60  ;;  %v3750_v57 = vpop.f32.mrb[50].mxu0  ;;  %v3758_v49 = vpop.f32.mrb[50].mxu1  ;;  %v4539_v12 = vadd.f32 %v1932_v48, %v1543_v41 }
 0x1e9   :  { %v1486_v58 = vpop.f32.mrb[51].mxu0  ;;  %v1973_v59 = vsel %vm1972_vm3, %v4517_v39, -inf  ;;  %v1546_v5 = vpop.f32.mrb[51].mxu1  ;;  %v1982_v14 = vsel %vm1972_vm3, %v4525_v42, -inf }
 0x1ea   :  { %v4532_v4 = vadd.f32 %v3361_v38, %v1486_v58  ;;  %1974 = vmax.xlane.f32.xlu1 %v1973_v59  ;;  %v1966_v11 = vsel %vm1965_vm4, %v4521_v61, -inf  ;;  %v4545_v15 = vadd.f32 %v1933_v10, %v1546_v5  ;;  %v1976_v47 = vsel %vm1965_vm4, %v4539_v12, -inf }
 0x1eb   :  { %1967 = vmax.xlane.f32.xlu0 %v1966_v11 }
 0x1ec   :  { %v1969_v16 = vsel %vm1965_vm4, %v4532_v4, -inf  ;;  %v1979_v21 = vsel %vm1965_vm4, %v4545_v15, -inf }
 0x1ee   :  { %1983 = vmax.xlane.f32.xlu1 %v1982_v14 }
 0x1ef   :  { %1970 = vmax.xlane.f32.xlu0 %v1969_v16 }
 0x1f2   :  { %1977 = vmax.xlane.f32.xlu1 %v1976_v47 }
 0x1f3   :  { %1980 = vmax.xlane.f32.xlu0 %v1979_v21 }
 0x1f6   :  { %v3765_v18 = vpop.f32.mrb[52].mxu0 }
 0x1f7   :  { %v4577_v23 = vadd.f32 %v3765_v18, %v1937_v22  ;;  %v3773_v24 = vpop.f32.mrb[52].mxu1  ;;  %v1603_v6 = vpop.f32.mrb[53].mxu0 }
 0x1f8   :  { %v4581_v7 = vadd.f32 %v3773_v24, %v1940_v34  ;;  %v1663_v8 = vpop.f32.mrb[53].mxu1  ;;  %v3766_v27 = vpop.f32.mrb[54].mxu0  ;;  %v4583_v28 = vadd.f32 %v3364_v51, %v1603_v6 }
 0x1f9   :  { %v3774_v30 = vpop.f32.mrb[54].mxu1  ;;  %v1606_v31 = vpop.f32.mrb[55].mxu0  ;;  %v1991_v44 = vsel %vm1972_vm3, %v4577_v23, -inf  ;;  %v4588_v45 = vadd.f32 %v1938_v35, %v1663_v8 }
 0x1fa   :  { %v1666_v36 = vpop.f32.mrb[55].mxu1  ;;  %v2000_v56 = vsel %vm1972_vm3, %v4581_v7, -inf  ;;  %1992 = vmax.xlane.f32.xlu0 %v1991_v44  ;;  %v1985_v41 = vsel %vm1965_vm4, %v4583_v28, -inf  ;;  %v4597_v57 = vadd.f32 %v3365_v33, %v1606_v31 }
 0x1fb   :  { %2001 = vmax.xlane.f32.xlu1 %v2000_v56  ;;  %v4593_v60 = vadd.f32 %v1939_v32, %v1666_v36  ;;  %v1994_v49 = vsel %vm1965_vm4, %v4588_v45, -inf }
 0x1fc   :  { %v1988_v59 = vsel %vm1965_vm4, %v4597_v57, -inf }
 0x1fd   :  { %v1997_v58 = vsel %vm1965_vm4, %v4593_v60, -inf }
 0x1fe   :  { %1986 = vmax.xlane.f32.xlu0 %v1985_v41 }
 0x1ff   :  { %1995 = vmax.xlane.f32.xlu1 %v1994_v49 }
 0x202   :  { %1998 = vmax.xlane.f32.xlu0 %v1997_v58 }
 0x203   :  { %1989 = vmax.xlane.f32.xlu1 %v1988_v59 }
 0x206   :  { %v3781_v5 = vpop.f32.mrb[56].mxu0 }
 0x207   :  { %v4607_v11 = vadd.f32 %v3781_v5, %v1931_v19  ;;  %v3789_v14 = vpop.f32.mrb[56].mxu1  ;;  %v1723_v16 = vpop.f32.mrb[57].mxu0 }
 0x208   :  { %v4611_v17 = vadd.f32 %v3789_v14, %v1934_v29  ;;  %v1783_v47 = vpop.f32.mrb[57].mxu1  ;;  %v3782_v21 = vpop.f32.mrb[58].mxu0  ;;  %v4615_v54 = vadd.f32 %v3360_v26, %v1723_v16 }
 0x209   :  { %v3790_v55 = vpop.f32.mrb[58].mxu1  ;;  %v1726_v18 = vpop.f32.mrb[59].mxu0  ;;  %v2009_v24 = vsel %vm1972_vm3, %v4607_v11, -inf  ;;  %v4621_v0 = vadd.f32 %v1932_v48, %v1783_v47 }
 0x20a   :  { %v1786_v19 = vpop.f32.mrb[59].mxu1  ;;  %v2018_v53 = vsel %vm1972_vm3, %v4611_v17, -inf  ;;  %2010 = vmax.xlane.f32.xlu0 %v2009_v24  ;;  %v2003_v26 = vsel %vm1965_vm4, %v4615_v54, -inf  ;;  %v4633_v6 = vadd.f32 %v3361_v38, %v1726_v18 }
 0x20b   :  { %2019 = vmax.xlane.f32.xlu1 %v2018_v53  ;;  %v4627_v29 = vadd.f32 %v1933_v10, %v1786_v19  ;;  %v2012_v48 = vsel %vm1965_vm4, %v4621_v0, -inf }
 0x20c   :  { %v2006_v37 = vsel %vm1965_vm4, %v4633_v6, -inf }
 0x20d   :  { %v2015_v8 = vsel %vm1965_vm4, %v4627_v29, -inf }
 0x20e   :  { %2004 = vmax.xlane.f32.xlu0 %v2003_v26 }
 0x20f   :  { %2013 = vmax.xlane.f32.xlu1 %v2012_v48 }
 0x212   :  { %2016 = vmax.xlane.f32.xlu0 %v2015_v8 }
 0x213   :  { %2007 = vmax.xlane.f32.xlu1 %v2006_v37 }
 0x216   :  { %v3797_v10 = vpop.f32.mrb[60].mxu0 }
 0x217   :  { %v4641_v27 = vadd.f32 %v3797_v10, %v1937_v22  ;;  %v3805_v30 = vpop.f32.mrb[60].mxu1  ;;  %v1843_v1 = vpop.f32.mrb[61].mxu0 }
 0x218   :  { %v1903_v38 = vpop.f32.mrb[61].mxu1  ;;  %v3798_v31 = vpop.f32.mrb[62].mxu0  ;;  %v4643_v44 = vadd.f32 %v3364_v51, %v1843_v1 }
 0x219   :  { %v4645_v36 = vadd.f32 %v1938_v35, %v1903_v38  ;;  %v3806_v56 = vpop.f32.mrb[62].mxu1  ;;  %v1846_v41 = vpop.f32.mrb[63].mxu0  ;;  %v2027_v49 = vsel %vm1972_vm3, %v4641_v27, -inf  ;;  %v4659_v35 = vadd.f32 %v3805_v30, %v1940_v34 }
 0x21a   :  { %v1906_v58 = vpop.f32.mrb[63].mxu1  ;;  %2028 = vmax.xlane.f32.xlu0 %v2027_v49  ;;  %v4649_v59 = vadd.f32 %v3365_v33, %v1846_v41  ;;  %v2021_v51 = vsel %vm1965_vm4, %v4643_v44, -inf }
 0x21b   :  { %v2030_v22 = vsel %vm1965_vm4, %v4645_v36, -inf  ;;  %v4653_v5 = vadd.f32 %v1939_v32, %v1906_v58  ;;  %v2036_v32 = vsel %vm1972_vm3, %v4659_v35, -inf }
 0x21c   :  { %2031 = vmax.xlane.f32.xlu1 %v2030_v22  ;;  %v2024_v14 = vsel %vm1965_vm4, %v4649_v59, -inf }
 0x21d   :  { %v2033_v33 = vsel %vm1965_vm4, %v4653_v5, -inf }
 0x21e   :  { %2022 = vmax.xlane.f32.xlu0 %v2021_v51 }
 0x220   :  { %2025 = vmax.xlane.f32.xlu1 %v2024_v14 }
 0x222   :  { %2034 = vmax.xlane.f32.xlu0 %v2033_v33 }
 0x224   :  { %2037 = vmax.xlane.f32.xlu1 %v2036_v32 }
 0x277   :  { %v1975_v16 = vpop.xlane.xlu1 %1974 }
 0x278   :  { %v2041_v47 = vsub.f32 %v4517_v39, %v1975_v16  ;;  %v1968_v21 = vpop.xlane.xlu0 %1967 }
 0x279   :  { %v2039_v20 = vsub.f32 %v4521_v61, %v1968_v21 }
 0x27a   :  { %v2067_v34 = vmul.f32 1.442695, %v2041_v47 }
 0x27b   :  { %v2063_v55 = vmul.f32 1.442695, %v2039_v20  ;;  %v1984_v18 = vpop.xlane.xlu1 %1983 }
 0x27c   :  { %3968 = vpow2.f32 %v2067_v34  ;;  %v2044_v24 = vsub.f32 %v4525_v42, %v1984_v18  ;;  %v1971_v19 = vpop.xlane.xlu0 %1970 }
 0x27d   :  { %v2040_v53 = vsub.f32 %v4532_v4, %v1971_v19  ;;  %3970 = vpow2.f32 %v2063_v55 }
 0x27e   :  { %v2073_v26 = vmul.f32 1.442695, %v2044_v24 }
 0x27f   :  { %v2065_v48 = vmul.f32 1.442695, %v2040_v53  ;;  %v1978_v8 = vpop.xlane.xlu1 %1977 }
 0x280   :  { %3972 = vpow2.f32 %v2073_v26  ;;  %v2042_v37 = vsub.f32 %v4539_v12, %v1978_v8  ;;  %v1981_v39 = vpop.xlane.xlu0 %1980 }
 0x281   :  { %3974 = vpow2.f32 %v2065_v48  ;;  %v2043_v61 = vsub.f32 %v4545_v15, %v1981_v39 }
 0x282   :  { %v2069_v10 = vmul.f32 1.442695, %v2042_v37 }
 0x283   :  { %v2071_v30 = vmul.f32 1.442695, %v2043_v61 }
 0x284   :  { %3976 = vpow2.f32 %v2069_v10 }
 0x285   :  { %3978 = vpow2.f32 %v2071_v30 }
 0x286   :  { %v3969_v1 = vpop.eup %3968 }
 0x287   :  { %v2112_v42 = vpack.c.bf16 %v3969_v1, %v3969_v1  ;;  %v1993_v38 = vpop.xlane.xlu0 %1992  ;;  %v3971_v56 = vpop.eup %3970 }
 0x288   :  { %v2002_v31 = vpop.xlane.xlu1 %2001  ;;  %v2047_v4 = vsub.f32 %v4577_v23, %v1993_v38 }
 0x289   :  { %v2050_v41 = vsub.f32 %v4581_v7, %v2002_v31  ;;  %v2129_v49 = vunpack.c.l.bf16 %v2112_v42 }
 0x28a   :  { %v3973_v58 = vpop.eup %3972  ;;  %v2079_v12 = vmul.f32 1.442695, %v2047_v4 }
 0x28b   :  { %v3975_v22 = vpop.eup %3974  ;;  %v2114_v51 = vpack.c.bf16 %v3973_v58, %v3973_v58  ;;  %v2085_v14 = vmul.f32 1.442695, %v2050_v41  ;;  %v1987_v15 = vpop.xlane.xlu0 %1986  ;;  %v2157_v33 = vsel %vm1972_vm3, %v2129_v49, 0.0 }
 0x28c   :  { %3980 = vpow2.f32 %v2079_v12  ;;  %v1996_v32 = vpop.xlane.xlu1 %1995  ;;  %v2045_v16 = vsub.f32 %v4583_v28, %v1987_v15  ;;  %2158 = vadd.xlane.f32.xlu0 %v2157_v33  ;;  %v2111_v47 = vpack.c.bf16 %v3975_v22, %v3971_v56 }
 0x28d   :  { %3982 = vpow2.f32 %v2085_v14  ;;  %v2048_v23 = vsub.f32 %v4588_v45, %v1996_v32  ;;  %v2132_v21 = vunpack.c.l.bf16 %v2114_v51 }
 0x28e   :  { %v3977_v7 = vpop.eup %3976  ;;  %v2075_v20 = vmul.f32 1.442695, %v2045_v16  ;;  %3811 = vmatprep.mubr.msk.bf16.mxu0 %vm1965_vm4, %v2111_v47  ;;  %v2127_v34 = vunpack.c.l.bf16 %v2111_v47  ;;  %v2128_v8 = vunpack.c.h.bf16 %v2111_v47 }
 0x28f   :  { %v3979_v55 = vpop.eup %3978  ;;  %v2081_v18 = vmul.f32 1.442695, %v2048_v23  ;;  %v1999_v24 = vpop.xlane.xlu0 %1998  ;;  %3812 = vmatmul.mubr.msk.bf16.vlgmr.msra.gmra.mrb[64].mxu0 %vm1965_vm4, %v2112_v42  ;;  %v2166_v19 = vsel %vm1972_vm3, %v2132_v21, 0.0 }
 0x290   :  { %v2049_v28 = vsub.f32 %v4593_v60, %v1999_v24  ;;  %v1990_v53 = vpop.xlane.xlu1 %1989  ;;  %3824 = vmatpush3.bf16.msra.mxu0 %v4417_v63  ;;  %2167 = vadd.xlane.f32.xlu1 %v2166_v19  ;;  %v2151_v45 = vsel %vm1965_vm4, %v2127_v34, 0.0  ;;  %v2113_v26 = vpack.c.bf16 %v3979_v55, %v3977_v7  ;;  %3984 = vpow2.f32 %v2075_v20 }
 0x291   :  { %v2046_v48 = vsub.f32 %v4597_v57, %v1990_v53  ;;  %3825 = vmatprep.subr.bf16.mxu0 %v4412_v40  ;;  %2152 = vadd.xlane.f32.xlu0 %v2151_v45  ;;  %3986 = vpow2.f32 %v2081_v18  ;;  %v2154_v57 = vsel %vm1965_vm4, %v2128_v8, 0.0 }
 0x292   :  { %v2083_v37 = vmul.f32 1.442695, %v2049_v28  ;;  %3819 = vmatprep.mubr.msk.bf16.mxu1 %vm1965_vm4, %v2113_v26  ;;  %v2131_v39 = vunpack.c.h.bf16 %v2113_v26  ;;  %v2130_v61 = vunpack.c.l.bf16 %v2113_v26 }
 0x293   :  { %v2077_v60 = vmul.f32 1.442695, %v2046_v48  ;;  %3820 = vmatmul.mubr.msk.bf16.vlgmr.msra.gmra.mrb[64].mxu1 %vm1965_vm4, %v2114_v51 }
 0x294   :  { %3988 = vpow2.f32 %v2083_v37  ;;  %3826 = vmatpush3.bf16.msra.mxu0 %v4412_v40  ;;  %3832 = vmatpush3.bf16.msra.mxu1 %v4419_v43  ;;  %v2163_v63 = vsel %vm1965_vm4, %v2131_v39, 0.0  ;;  %v2160_v4 = vsel %vm1965_vm4, %v2130_v61, 0.0 }
 0x295   :  { %3990 = vpow2.f32 %v2077_v60  ;;  %3833 = vmatprep.subr.bf16.mxu1 %v4415_v62  ;;  %3839 = vmatprep.subr.bf16.mxu0 %v4435_v50 }
 0x296   :  { %v3981_v10 = vpop.eup %3980  ;;  %2155 = vadd.xlane.f32.xlu1 %v2154_v57  ;;  %2164 = vadd.xlane.f32.xlu0 %v2163_v63 }
 0x297   :  { %v3983_v30 = vpop.eup %3982  ;;  %v2116_v1 = vpack.c.bf16 %v3981_v10, %v3981_v10  ;;  %v2011_v42 = vpop.xlane.xlu0 %2010 }
 0x298   :  { %v2118_v38 = vpack.c.bf16 %v3983_v30, %v3983_v30  ;;  %3834 = vmatpush3.bf16.msra.mxu1 %v4415_v62  ;;  %v2020_v40 = vpop.xlane.xlu1 %2019  ;;  %v2053_v43 = vsub.f32 %v4607_v11, %v2011_v42 }
 0x299   :  { %v2056_v31 = vsub.f32 %v4611_v17, %v2020_v40  ;;  %3847 = vmatprep.subr.bf16.mxu1 %v4439_v52  ;;  %v2135_v56 = vunpack.c.l.bf16 %v2116_v1 }
 0x29a   :  { %v2091_v41 = vmul.f32 1.442695, %v2053_v43  ;;  %2161 = vadd.xlane.f32.xlu1 %v2160_v4  ;;  %v2138_v49 = vunpack.c.l.bf16 %v2118_v38  ;;  %v3985_v51 = vpop.eup %3984 }
 0x29b   :  { %v2097_v58 = vmul.f32 1.442695, %v2056_v31  ;;  %v2005_v12 = vpop.xlane.xlu0 %2004  ;;  %v2175_v22 = vsel %vm1972_vm3, %v2135_v56, 0.0  ;;  %v3987_v17 = vpop.eup %3986 }
 0x29c   :  { %3992 = vpow2.f32 %v2091_v41  ;;  %v2014_v62 = vpop.xlane.xlu1 %2013  ;;  %v2051_v14 = vsub.f32 %v4615_v54, %v2005_v12  ;;  %2176 = vadd.xlane.f32.xlu0 %v2175_v22  ;;  %v2184_v11 = vsel %vm1972_vm3, %v2138_v49, 0.0 }
 0x29d   :  { %3994 = vpow2.f32 %v2097_v58  ;;  %v2054_v15 = vsub.f32 %v4621_v0, %v2014_v62 }
 0x29e   :  { %v3989_v33 = vpop.eup %3988  ;;  %v2087_v32 = vmul.f32 1.442695, %v2051_v14  ;;  %2185 = vadd.xlane.f32.xlu1 %v2184_v11 }
 0x29f   :  { %v3991_v16 = vpop.eup %3990  ;;  %v2093_v47 = vmul.f32 1.442695, %v2054_v15  ;;  %v2017_v23 = vpop.xlane.xlu0 %2016  ;;  %v2117_v21 = vpack.c.bf16 %v3989_v33, %v3987_v17 }
 0x2a0   :  { %v2055_v7 = vsub.f32 %v4627_v29, %v2017_v23  ;;  %v2008_v20 = vpop.xlane.xlu1 %2007  ;;  %v2115_v34 = vpack.c.bf16 %v3991_v16, %v3985_v51  ;;  %3996 = vpow2.f32 %v2087_v32 }
 0x2a1   :  { %v2052_v54 = vsub.f32 %v4633_v6, %v2008_v20  ;;  %3835 = vmatprep.mubr.msk.bf16.mxu1 %vm1965_vm4, %v2117_v21  ;;  %3998 = vpow2.f32 %v2093_v47  ;;  %v2137_v19 = vunpack.c.h.bf16 %v2117_v21  ;;  %v2136_v28 = vunpack.c.l.bf16 %v2117_v21 }
 0x2a2   :  { %v2095_v55 = vmul.f32 1.442695, %v2055_v7  ;;  %3827 = vmatprep.mubr.msk.bf16.mxu0 %vm1965_vm4, %v2115_v34  ;;  %3836 = vmatmul.mubr.msk.bf16.vlgmr.msra.gmra.mrb[68].mxu1 %vm1965_vm4, %v2118_v38  ;;  %v2133_v0 = vunpack.c.l.bf16 %v2115_v34  ;;  %v2134_v18 = vunpack.c.h.bf16 %v2115_v34 }
 0x2a3   :  { %v2089_v24 = vmul.f32 1.442695, %v2052_v54  ;;  %3828 = vmatmul.mubr.msk.bf16.vlgmr.msra.gmra.mrb[68].mxu0 %vm1965_vm4, %v2116_v1  ;;  %3848 = vmatpush3.bf16.msra.mxu1 %v4439_v52  ;;  %v2181_v8 = vsel %vm1965_vm4, %v2137_v19, 0.0  ;;  %v2178_v39 = vsel %vm1965_vm4, %v2136_v28, 0.0 }
 0x2a4   :  { %4000 = vpow2.f32 %v2095_v55  ;;  %3840 = vmatpush3.bf16.msra.mxu0 %v4435_v50  ;;  %3849 = vmatprep.subr.bf16.mxu1 %v4433_v46  ;;  %v2169_v29 = vsel %vm1965_vm4, %v2133_v0, 0.0  ;;  %v2172_v6 = vsel %vm1965_vm4, %v2134_v18, 0.0 }
 0x2a5   :  { %4002 = vpow2.f32 %v2089_v24  ;;  %3841 = vmatprep.subr.bf16.mxu0 %v4428_v13  ;;  %2170 = vadd.xlane.f32.xlu0 %v2169_v29 }
 0x2a6   :  { %v3993_v53 = vpop.eup %3992  ;;  %2173 = vadd.xlane.f32.xlu1 %v2172_v6 }
 0x2a7   :  { %v3995_v45 = vpop.eup %3994  ;;  %v2120_v26 = vpack.c.bf16 %v3993_v53, %v3993_v53  ;;  %3850 = vmatpush3.bf16.msra.mxu1 %v4433_v46  ;;  %v2029_v52 = vpop.xlane.xlu0 %2028  ;;  %v4756_v53 = vld [vmem:[%s4859_s2] sm:$0xf] }
 0x2a8   :  { %v2122_v50 = vpack.c.bf16 %v3995_v45, %v3995_v45  ;;  %3842 = vmatpush3.bf16.msra.mxu0 %v4428_v13  ;;  %3863 = vmatprep.subr.bf16.mxu1 %v4469_v9  ;;  %v2059_v48 = vsub.f32 %v4641_v27, %v2029_v52  ;;  %v4762_v45 = vsel %vm2756_vm5, %v4756_v53, 0 }
 0x2a9   :  { %3855 = vmatprep.subr.bf16.mxu0 %v4467_v3  ;;  %v2032_v37 = vpop.xlane.xlu1 %2031  ;;  %2182 = vadd.xlane.f32.xlu0 %v2181_v8  ;;  %v2141_v60 = vunpack.c.l.bf16 %v2120_v26 }
 0x2aa   :  { %v2103_v63 = vmul.f32 1.442695, %v2059_v48  ;;  %2179 = vadd.xlane.f32.xlu1 %v2178_v39  ;;  %v2144_v46 = vunpack.c.l.bf16 %v2122_v50  ;;  %v2060_v57 = vsub.f32 %v4645_v36, %v2032_v37  ;;  %v3997_v10 = vpop.eup %3996  ;;  %v4785_v48 = vld [vmem:[%s4859_s2 + $0xc] sm:$0xf] }
 0x2ab   :  { %v2023_v61 = vpop.xlane.xlu0 %2022  ;;  %v2193_v13 = vsel %vm1972_vm3, %v2141_v60, 0.0  ;;  %v3999_v1 = vpop.eup %3998 }
 0x2ac   :  { %4004 = vpow2.f32 %v2103_v63  ;;  %v2057_v27 = vsub.f32 %v4643_v44, %v2023_v61  ;;  %v2202_v30 = vsel %vm1972_vm3, %v2144_v46, 0.0  ;;  %v2105_v4 = vmul.f32 1.442695, %v2060_v57 }
 0x2ad   :  { %2194 = vadd.xlane.f32.xlu0 %v2193_v13  ;;  %v2026_v42 = vpop.xlane.xlu1 %2025 }
 0x2ae   :  { %v4001_v38 = vpop.eup %4000  ;;  %v2099_v40 = vmul.f32 1.442695, %v2057_v27  ;;  %2203 = vadd.xlane.f32.xlu1 %v2202_v30  ;;  %v2058_v43 = vsub.f32 %v4649_v59, %v2026_v42 }
 0x2af   :  { %v4003_v31 = vpop.eup %4002  ;;  %v2035_v36 = vpop.xlane.xlu0 %2034  ;;  %v2121_v56 = vpack.c.bf16 %v4001_v38, %v3999_v1 }
 0x2b0   :  { %4006 = vpow2.f32 %v2099_v40  ;;  %v2101_v41 = vmul.f32 1.442695, %v2058_v43  ;;  %v2061_v49 = vsub.f32 %v4653_v5, %v2035_v36  ;;  %v2119_v58 = vpack.c.bf16 %v4003_v31, %v3997_v10 }
 0x2b1   :  { %v2038_v44 = vpop.xlane.xlu1 %2037  ;;  %3851 = vmatprep.mubr.msk.bf16.mxu1 %vm1965_vm4, %v2121_v56  ;;  %v2142_v11 = vunpack.c.l.bf16 %v2121_v56 }
 0x2b2   :  { %4008 = vpow2.f32 %v2101_v41  ;;  %v2107_v12 = vmul.f32 1.442695, %v2061_v49  ;;  %v2062_v22 = vsub.f32 %v4659_v35, %v2038_v44  ;;  %3843 = vmatprep.mubr.msk.bf16.mxu0 %vm1965_vm4, %v2119_v58  ;;  %3852 = vmatmul.mubr.msk.bf16.vlgmr.msra.gmra.mrb[72].mxu1 %vm1965_vm4, %v2122_v50  ;;  %v2139_v59 = vunpack.c.l.bf16 %v2119_v58  ;;  %v4780_v50 = vld [vmem:[%s4859_s2 + $0x8] sm:$0xf] }
 0x2b3   :  { %4010 = vpow2.f32 %v2105_v4  ;;  %3844 = vmatmul.mubr.msk.bf16.vlgmr.msra.gmra.mrb[72].mxu0 %vm1965_vm4, %v2120_v26  ;;  %3864 = vmatpush3.bf16.msra.mxu1 %v4469_v9  ;;  %v2140_v51 = vunpack.c.h.bf16 %v2119_v58  ;;  %v2143_v35 = vunpack.c.h.bf16 %v2121_v56  ;;  %v2196_v15 = vsel %vm1965_vm4, %v2142_v11, 0.0  ;;  %v4768_v26 = vld [vmem:[%s4859_s2 + $0x4] sm:$0xf] }
 0x2b4   :  { %4012 = vpow2.f32 %v2107_v12  ;;  %v2109_v5 = vmul.f32 1.442695, %v2062_v22  ;;  %3856 = vmatpush3.bf16.msra.mxu0 %v4467_v3  ;;  %3865 = vmatprep.subr.bf16.mxu1 %v4465_v25  ;;  %v2187_v62 = vsel %vm1965_vm4, %v2139_v59, 0.0  ;;  %v4774_v52 = vsel %vm2756_vm5, %v4768_v26, 0 }
 0x2b5   :  { %3857 = vmatprep.subr.bf16.mxu0 %v4462_v2  ;;  %2188 = vadd.xlane.f32.xlu0 %v2187_v62  ;;  %v2190_v14 = vsel %vm1965_vm4, %v2140_v51, 0.0  ;;  %v2199_v3 = vsel %vm1965_vm4, %v2143_v35, 0.0  ;;  %v4793_v35 = vsel %vm2756_vm5, %v4780_v50, 0 }
 0x2b6   :  { %v4005_v17 = vpop.eup %4004  ;;  %4014 = vpow2.f32 %v2109_v5  ;;  %2191 = vadd.xlane.f32.xlu1 %v2190_v14 }
 0x2b7   :  { %v2124_v9 = vpack.c.bf16 %v4005_v17, %v4005_v17  ;;  %3866 = vmatpush3.bf16.msra.mxu1 %v4465_v25 }
 0x2b8   :  { %3858 = vmatpush3.bf16.msra.mxu0 %v4462_v2  ;;  %3936 = vmatprep.subr.msk.bf16.mxu1 %vm2756_vm5, %v4768_v26 }
 0x2b9   :  { %2200 = vadd.xlane.f32.xlu0 %v2199_v3  ;;  %v2147_v33 = vunpack.c.l.bf16 %v2124_v9  ;;  %3935 = vmatprep.subr.msk.bf16.mxu0 %vm2756_vm5, %v4756_v53 }
 0x2ba   :  { %v4007_v32 = vpop.eup %4006  ;;  %2197 = vadd.xlane.f32.xlu1 %v2196_v15 }
 0x2bb   :  { %v2211_v16 = vsel %vm1972_vm3, %v2147_v33, 0.0  ;;  %v4800_v33 = vsel %vm2756_vm5, %v4785_v48, 0 }
 0x2bc   :  { %v4009_v47 = vpop.eup %4008 }
 0x2bd   :  { %v4011_v23 = vpop.eup %4010  ;;  %2212 = vadd.xlane.f32.xlu0 %v2211_v16  ;;  %v2123_v21 = vpack.c.bf16 %v4009_v47, %v4007_v32 }
 0x2be   :  { %v4013_v7 = vpop.eup %4012 }
 0x2bf   :  { %3859 = vmatprep.mubr.msk.bf16.mxu0 %vm1965_vm4, %v2123_v21  ;;  %v2125_v25 = vpack.c.bf16 %v4013_v7, %v4011_v23  ;;  %v2146_v20 = vunpack.c.h.bf16 %v2123_v21  ;;  %v2145_v2 = vunpack.c.l.bf16 %v2123_v21 }
 0x2c0   :  { %v4015_v34 = vpop.eup %4014  ;;  %3860 = vmatmul.mubr.msk.bf16.vlgmr.msra.gmra.mrb[76].mxu0 %vm1965_vm4, %v2124_v9 }
 0x2c1   :  { %v2126_v54 = vpack.c.bf16 %v4015_v34, %v4015_v34  ;;  %3867 = vmatprep.mubr.msk.bf16.mxu1 %vm1965_vm4, %v2125_v25  ;;  %v2208_v55 = vsel %vm1965_vm4, %v2146_v20, 0.0  ;;  %v2205_v0 = vsel %vm1965_vm4, %v2145_v2, 0.0  ;;  %v2148_v18 = vunpack.c.l.bf16 %v2125_v25  ;;  %3872 = vmatpush3.bf16.msra.mxu0 %v4762_v45 }
 0x2c2   :  { %2209 = vadd.xlane.f32.xlu1 %v2208_v55  ;;  %2206 = vadd.xlane.f32.xlu0 %v2205_v0  ;;  %v2149_v24 = vunpack.c.h.bf16 %v2125_v25 }
 0x2c3   :  { %3868 = vmatmul.mubr.msk.bf16.vlgmr.msra.gmra.mrb[76].mxu1 %vm1965_vm4, %v2126_v54  ;;  %v2214_v29 = vsel %vm1965_vm4, %v2148_v18, 0.0  ;;  %v2150_v19 = vunpack.c.l.bf16 %v2126_v54  ;;  %3937 = vmatprep.subr.msk.bf16.mxu0 %vm2756_vm5, %v4780_v50 }
 0x2c4   :  { %v2217_v6 = vsel %vm1965_vm4, %v2149_v24, 0.0  ;;  %3878 = vmatpush3.bf16.msra.mxu1 %v4774_v52 }
 0x2c5   :  { %v2220_v28 = vsel %vm1972_vm3, %v2150_v19, 0.0  ;;  %3938 = vmatprep.subr.msk.bf16.mxu1 %vm2756_vm5, %v4785_v48 }
 0x2c6   :  { %2215 = vadd.xlane.f32.xlu1 %v2214_v29  ;;  %2218 = vadd.xlane.f32.xlu0 %v2217_v6 }
 0x2ca   :  { %2221 = vadd.xlane.f32.xlu1 %v2220_v28 }
 0x319   :  { %v2159_v8 = vpop.xlane.xlu0 %2158 }
 0x31a   :  { %4016 = vrcp.f32 %v2159_v8 }
 0x31d   :  { %v2168_v37 = vpop.xlane.xlu1 %2167 }
 0x31e   :  { %v2153_v39 = vpop.xlane.xlu0 %2152 }
 0x31f   :  { %4018 = vrcp.f32 %v2153_v39 }
 0x323   :  { %v2156_v60 = vpop.xlane.xlu1 %2155  ;;  %v2165_v63 = vpop.xlane.xlu0 %2164 }
 0x324   :  { %4020 = vrcp.f32 %v2156_v60  ;;  %v4017_v27 = vpop.eup %4016 }
 0x325   :  { %4022 = vrcp.f32 %v2168_v37 }
 0x326   :  { %4024 = vrcp.f32 %v2165_v63 }
 0x327   :  { %v2162_v46 = vpop.xlane.xlu1 %2161 }
 0x328   :  { %4026 = vrcp.f32 %v2162_v46 }
 0x329   :  { %v2177_v57 = vpop.xlane.xlu0 %2176  ;;  %v4019_v1 = vpop.eup %4018 }
 0x32a   :  { %4028 = vrcp.f32 %v2177_v57 }
 0x32b   :  { %v2186_v13 = vpop.xlane.xlu1 %2185 }
 0x32c   :  { %4030 = vrcp.f32 %v2186_v13 }
 0x32e   :  { %v4021_v40 = vpop.eup %4020 }
 0x32f   :  { %v4023_v49 = vpop.eup %4022 }
 0x330   :  { %v4025_v44 = vpop.eup %4024 }
 0x332   :  { %v2171_v61 = vpop.xlane.xlu0 %2170  ;;  %v4027_v59 = vpop.eup %4026 }
 0x333   :  { %v2174_v42 = vpop.xlane.xlu1 %2173  ;;  %4032 = vrcp.f32 %v2171_v61 }
 0x334   :  { %v4029_v47 = vpop.eup %4028 }
 0x336   :  { %v2183_v43 = vpop.xlane.xlu0 %2182  ;;  %v4031_v21 = vpop.eup %4030 }
 0x337   :  { %v2180_v14 = vpop.xlane.xlu1 %2179  ;;  %4034 = vrcp.f32 %v2183_v43 }
 0x338   :  { %4036 = vrcp.f32 %v2180_v14 }
 0x339   :  { %4038 = vrcp.f32 %v2174_v42 }
 0x33a   :  { %v2195_v9 = vpop.xlane.xlu0 %2194 }
 0x33b   :  { %v2204_v16 = vpop.xlane.xlu1 %2203  ;;  %4040 = vrcp.f32 %v2195_v9 }
 0x33c   :  { %4042 = vrcp.f32 %v2204_v16 }
 0x33d   :  { %v4033_v20 = vpop.eup %4032 }
 0x341   :  { %v4035_v54 = vpop.eup %4034 }
 0x342   :  { %v2189_v32 = vpop.xlane.xlu0 %2188  ;;  %v4037_v18 = vpop.eup %4036 }
 0x343   :  { %v2192_v23 = vpop.xlane.xlu1 %2191  ;;  %v4039_v19 = vpop.eup %4038  ;;  %4044 = vrcp.f32 %v2189_v32 }
 0x346   :  { %v2201_v7 = vpop.xlane.xlu0 %2200 }
 0x347   :  { %v2198_v60 = vpop.xlane.xlu1 %2197  ;;  %4046 = vrcp.f32 %v2201_v7 }
 0x348   :  { %4048 = vrcp.f32 %v2198_v60 }
 0x349   :  { %4050 = vrcp.f32 %v2192_v23 }
 0x34a   :  { %v2213_v13 = vpop.xlane.xlu0 %2212 }
 0x34b   :  { %4052 = vrcp.f32 %v2213_v13 }
 0x362   :  { %v3813_v10 = vpop.f32.mrb[64].mxu0 }
 0x363   :  { %v2269_v30 = vpop.f32.mrb[65].mxu0  ;;  %v2708_v31 = vmul.f32 %v4017_v27, %v3813_v10  ;;  %v2210_v10 = vpop.xlane.xlu1 %2209 }
 0x364   :  { %v3814_v38 = vpop.f32.mrb[66].mxu0  ;;  %v2706_v36 = vmul.f32 %v4019_v1, %v2269_v30  ;;  %v4041_v27 = vpop.eup %4040 }
 0x365   :  { %v2272_v4 = vpop.f32.mrb[67].mxu0  ;;  %v2731_v51 = vpack.c.bf16 %v2708_v31, %v2708_v31  ;;  %v2207_v30 = vpop.xlane.xlu0 %2206 }
 0x366   :  { %v2707_v56 = vmul.f32 %v4021_v40, %v2272_v4  ;;  %v3821_v41 = vpop.f32.mrb[64].mxu1  ;;  %v4043_v1 = vpop.eup %4042  ;;  %4054 = vrcp.f32 %v2207_v30 }
 0x367   :  { %v2326_v58 = vpop.f32.mrb[65].mxu1  ;;  %v2711_v5 = vmul.f32 %v4023_v49, %v3821_v41  ;;  %v2216_v42 = vpop.xlane.xlu1 %2215  ;;  %4056 = vrcp.f32 %v2210_v10 }
 0x368   :  { %v2730_v12 = vpack.c.bf16 %v2707_v56, %v2706_v36  ;;  %v3822_v22 = vpop.f32.mrb[66].mxu1  ;;  %v2709_v11 = vmul.f32 %v4027_v59, %v2326_v58  ;;  %v4045_v40 = vpop.eup %4044 }
 0x369   :  { %v2329_v62 = vpop.f32.mrb[67].mxu1  ;;  %v2733_v15 = vpack.c.bf16 %v2711_v5, %v2711_v5  ;;  %v4047_v4 = vpop.eup %4046 }
 0x36a   :  { %v2710_v17 = vmul.f32 %v4025_v44, %v2329_v62  ;;  %3873 = vmatprep.mubr.msk.bf16.mxu0 %vm1436_vm1, %v2730_v12  ;;  %v2219_v22 = vpop.xlane.xlu0 %2218 }
 0x36b   :  { %3874 = vmatmul.mubr.msk.bf16.vlgmr.msra.gmra.mrb[80].mxu0 %vm1436_vm1, %v2731_v51  ;;  %v2222_v5 = vpop.xlane.xlu1 %2221  ;;  %4058 = vrcp.f32 %v2219_v22 }
 0x36c   :  { %v2732_v3 = vpack.c.bf16 %v2710_v17, %v2709_v11  ;;  %3884 = vmatpush3.bf16.msra.mxu0 %v4793_v35  ;;  %4060 = vrcp.f32 %v2222_v5 }
 0x36d   :  { %3939 = vmatprep.subr.msk.bf16.mxu0 %vm2756_vm5, %v4756_v53  ;;  %4062 = vrcp.f32 %v2216_v42 }
 0x36e   :  { %3879 = vmatprep.mubr.msk.bf16.mxu1 %vm1436_vm1, %v2732_v3 }
 0x36f   :  { %3880 = vmatmul.mubr.msk.bf16.vlgmr.msra.gmra.mrb[80].mxu1 %vm1436_vm1, %v2733_v15 }
 0x370   :  { %3890 = vmatpush3.bf16.msra.mxu1 %v4800_v33 }
 0x371   :  { %3940 = vmatprep.subr.msk.bf16.mxu1 %vm2756_vm5, %v4768_v26 }
 0x375   :  { %v3837_v25 = vpop.f32.mrb[68].mxu1 }
 0x376   :  { %v3829_v2 = vpop.f32.mrb[68].mxu0  ;;  %v2440_v34 = vpop.f32.mrb[69].mxu1  ;;  %v2717_v24 = vmul.f32 %v4031_v21, %v3837_v25 }
 0x377   :  { %v2383_v55 = vpop.f32.mrb[69].mxu0  ;;  %v3838_v0 = vpop.f32.mrb[70].mxu1  ;;  %v2714_v28 = vmul.f32 %v4029_v47, %v3829_v2  ;;  %v2715_v53 = vmul.f32 %v4037_v18, %v2440_v34 }
 0x378   :  { %v3830_v29 = vpop.f32.mrb[70].mxu0  ;;  %v2443_v6 = vpop.f32.mrb[71].mxu1  ;;  %v2712_v37 = vmul.f32 %v4033_v20, %v2383_v55  ;;  %v2737_v46 = vpack.c.bf16 %v2717_v24, %v2717_v24 }
 0x379   :  { %v2386_v8 = vpop.f32.mrb[71].mxu0  ;;  %v2716_v26 = vmul.f32 %v4035_v54, %v2443_v6  ;;  %v2735_v61 = vpack.c.bf16 %v2714_v28, %v2714_v28 }
 0x37a   :  { %v2713_v39 = vmul.f32 %v4039_v19, %v2386_v8 }
 0x37b   :  { %v2736_v63 = vpack.c.bf16 %v2716_v26, %v2715_v53 }
 0x37c   :  { %v2734_v57 = vpack.c.bf16 %v2713_v39, %v2712_v37 }
 0x37d   :  { %3891 = vmatprep.mubr.msk.bf16.mxu1 %vm1436_vm1, %v2736_v63 }
 0x37e   :  { %3885 = vmatprep.mubr.msk.bf16.mxu0 %vm1436_vm1, %v2734_v57  ;;  %3892 = vmatmul.mubr.msk.bf16.vlgmr.msra.gmra.mrb[84].mxu1 %vm1436_vm1, %v2737_v46 }
 0x37f   :  { %3886 = vmatmul.mubr.msk.bf16.vlgmr.msra.gmra.mrb[84].mxu0 %vm1436_vm1, %v2735_v61  ;;  %3902 = vmatpush3.bf16.msra.mxu1 %v4774_v52  ;;  %v4049_v52 = vpop.eup %4048 }
 0x380   :  { %3896 = vmatpush3.bf16.msra.mxu0 %v4762_v45  ;;  %3942 = vmatprep.subr.msk.bf16.mxu1 %vm2756_vm5, %v4785_v48  ;;  %v4051_v58 = vpop.eup %4050 }
 0x381   :  { %3941 = vmatprep.subr.msk.bf16.mxu0 %vm2756_vm5, %v4780_v50  ;;  %v4053_v3 = vpop.eup %4052 }
 0x382   :  { %v4055_v32 = vpop.eup %4054 }
 0x383   :  { %v4057_v47 = vpop.eup %4056 }
 0x384   :  { %v4059_v25 = vpop.eup %4058 }
 0x385   :  { %v3853_v38 = vpop.f32.mrb[72].mxu1  ;;  %v4061_v54 = vpop.eup %4060 }
 0x386   :  { %v3845_v43 = vpop.f32.mrb[72].mxu0  ;;  %v2554_v31 = vpop.f32.mrb[73].mxu1  ;;  %v2723_v41 = vmul.f32 %v4043_v1, %v3853_v38 }
 0x387   :  { %v2497_v36 = vpop.f32.mrb[73].mxu0  ;;  %v3854_v56 = vpop.f32.mrb[74].mxu1  ;;  %v2720_v48 = vmul.f32 %v4041_v27, %v3845_v43  ;;  %v2721_v44 = vmul.f32 %v4049_v52, %v2554_v31 }
 0x388   :  { %v3846_v45 = vpop.f32.mrb[74].mxu0  ;;  %v2557_v49 = vpop.f32.mrb[75].mxu1  ;;  %v2718_v59 = vmul.f32 %v4045_v40, %v2497_v36  ;;  %v2741_v14 = vpack.c.bf16 %v2723_v41, %v2723_v41  ;;  %v3357_v40 = vld [vmem:[%s4860_s3] ss:$0 sm:$0xff] }
 0x389   :  { %v2500_v12 = vpop.f32.mrb[75].mxu0  ;;  %v2722_v50 = vmul.f32 %v4047_v4, %v2557_v49  ;;  %v2739_v17 = vpack.c.bf16 %v2720_v48, %v2720_v48  ;;  %v4063_v0 = vpop.eup %4062 }
 0x38a   :  { %v2719_v51 = vmul.f32 %v4051_v58, %v2500_v12 }
 0x38b   :  { %v2740_v62 = vpack.c.bf16 %v2722_v50, %v2721_v44 }
 0x38c   :  { %v2738_v11 = vpack.c.bf16 %v2719_v51, %v2718_v59 }
 0x38d   :  { %3903 = vmatprep.mubr.msk.bf16.mxu1 %vm1436_vm1, %v2740_v62 }
 0x38e   :  { %3897 = vmatprep.mubr.msk.bf16.mxu0 %vm1436_vm1, %v2738_v11  ;;  %3904 = vmatmul.mubr.msk.bf16.vlgmr.msra.gmra.mrb[88].mxu1 %vm1436_vm1, %v2741_v14 }
 0x38f   :  { %3898 = vmatmul.mubr.msk.bf16.vlgmr.msra.gmra.mrb[88].mxu0 %vm1436_vm1, %v2739_v17  ;;  %3914 = vmatpush3.bf16.msra.mxu1 %v4800_v33 }
 0x390   :  { %3908 = vmatpush3.bf16.msra.mxu0 %v4793_v35 }
 0x393   :  { %v3861_v9 = vpop.f32.mrb[76].mxu0 }
 0x394   :  { %v2611_v15 = vpop.f32.mrb[77].mxu0  ;;  %v2726_v23 = vmul.f32 %v4053_v3, %v3861_v9 }
 0x395   :  { %v3862_v16 = vpop.f32.mrb[78].mxu0  ;;  %v2724_v20 = vmul.f32 %v4055_v32, %v2611_v15 }
 0x396   :  { %v2614_v21 = vpop.f32.mrb[79].mxu0  ;;  %v3869_v7 = vpop.f32.mrb[76].mxu1  ;;  %v2743_v35 = vpack.c.bf16 %v2726_v23, %v2726_v23 }
 0x397   :  { %v2725_v2 = vmul.f32 %v4057_v47, %v2614_v21  ;;  %v2668_v34 = vpop.f32.mrb[77].mxu1  ;;  %v2729_v33 = vmul.f32 %v4061_v54, %v3869_v7 }
 0x398   :  { %v3870_v55 = vpop.f32.mrb[78].mxu1  ;;  %v2727_v29 = vmul.f32 %v4063_v0, %v2668_v34 }
 0x399   :  { %v2742_v18 = vpack.c.bf16 %v2725_v2, %v2724_v20  ;;  %v2671_v24 = vpop.f32.mrb[79].mxu1  ;;  %v2745_v28 = vpack.c.bf16 %v2729_v33, %v2729_v33 }
 0x39a   :  { %v2728_v6 = vmul.f32 %v4059_v25, %v2671_v24 }
 0x39b   :  { %3909 = vmatprep.mubr.msk.bf16.mxu0 %vm1436_vm1, %v2742_v18 }
 0x39c   :  { %v2744_v19 = vpack.c.bf16 %v2728_v6, %v2727_v29  ;;  %3910 = vmatmul.mubr.msk.bf16.vlgmr.msra.gmra.mrb[92].mxu0 %vm1436_vm1, %v2743_v35 }
 0x39e   :  { %3915 = vmatprep.mubr.msk.bf16.mxu1 %vm1436_vm1, %v2744_v19 }
 0x39f   :  { %3916 = vmatmul.mubr.msk.bf16.vlgmr.msra.gmra.mrb[92].mxu1 %vm1436_vm1, %v2745_v28 }
 0x43e   :  { %v3875_v53 = vpop.f32.mrb[80].mxu0 }
 0x43f   :  { %v2794_v8 = vpop.f32.mrb[81].mxu0 }
 0x440   :  { %v3876_v26 = vpop.f32.mrb[82].mxu0 }
 0x441   :  { %v2797_v37 = vpop.f32.mrb[83].mxu0 }
 0x442   :  { %v3881_v39 = vpop.f32.mrb[80].mxu1 }
 0x443   :  { %v3197_v60 = vadd.f32 %v3881_v39, %v3875_v53  ;;  %v2851_v63 = vpop.f32.mrb[81].mxu1 }
 0x444   :  { %v3195_v46 = vadd.f32 %v2851_v63, %v2794_v8  ;;  %v3882_v57 = vpop.f32.mrb[82].mxu1 }
 0x445   :  { %v2854_v61 = vpop.f32.mrb[83].mxu1 }
 0x446   :  { %v3196_v13 = vadd.f32 %v2854_v61, %v2797_v37 }
 0x451   :  { %v3893_v10 = vpop.f32.mrb[84].mxu1 }
 0x452   :  { %v3887_v27 = vpop.f32.mrb[84].mxu0  ;;  %v2965_v30 = vpop.f32.mrb[85].mxu1 }
 0x453   :  { %v3203_v1 = vadd.f32 %v3887_v27, %v3197_v60  ;;  %v2908_v42 = vpop.f32.mrb[85].mxu0  ;;  %v3894_v38 = vpop.f32.mrb[86].mxu1 }
 0x454   :  { %v3201_v43 = vadd.f32 %v3195_v46, %v2908_v42  ;;  %v3888_v31 = vpop.f32.mrb[86].mxu0  ;;  %v2968_v4 = vpop.f32.mrb[87].mxu1 }
 0x455   :  { %v3209_v36 = vadd.f32 %v3893_v10, %v3203_v1  ;;  %v2911_v56 = vpop.f32.mrb[87].mxu0 }
 0x456   :  { %v3207_v52 = vadd.f32 %v3201_v43, %v2965_v30  ;;  %v3202_v41 = vadd.f32 %v3196_v13, %v2911_v56 }
 0x457   :  { %v3222_v45 = vadd.f32 %v3357_v40, %v3209_v36 }
 0x458   :  { %v3220_v49 = vadd.f32 %v3357_v40, %v3207_v52  ;;  %v3208_v58 = vadd.f32 %v3202_v41, %v2968_v4 }
 0x459   :  { %3229 = vst.msk [vmem:[%s4861_s5 + $0x10] sm:$0x1] %vm3228_vm6, %v3222_v45 }
 0x45a   :  { %3226 = vst.msk [vmem:[%s4861_s5] sm:$0xff] %vm91_vm0, %v3220_v49  ;;  %v3221_v48 = vadd.f32 %v3357_v40, %v3208_v58 }
 0x45c   :  { %3227 = vst.msk [vmem:[%s4861_s5 + $0x8] sm:$0xff] %vm91_vm0, %v3221_v48 }
 0x461   :  { %v3905_v44 = vpop.f32.mrb[88].mxu1 }
 0x462   :  { %v3899_v12 = vpop.f32.mrb[88].mxu0  ;;  %v3073_v50 = vpop.f32.mrb[89].mxu1 }
 0x463   :  { %v3200_v22 = vadd.f32 %v3905_v44, %v3899_v12  ;;  %v3019_v59 = vpop.f32.mrb[89].mxu0  ;;  %v3906_v51 = vpop.f32.mrb[90].mxu1 }
 0x464   :  { %v3198_v5 = vadd.f32 %v3073_v50, %v3019_v59  ;;  %v3900_v62 = vpop.f32.mrb[90].mxu0  ;;  %v3076_v14 = vpop.f32.mrb[91].mxu1 }
 0x465   :  { %v3022_v11 = vpop.f32.mrb[91].mxu0 }
 0x466   :  { %v3199_v17 = vadd.f32 %v3076_v14, %v3022_v11 }
 0x46f   :  { %v3911_v9 = vpop.f32.mrb[92].mxu0 }
 0x470   :  { %v3206_v3 = vadd.f32 %v3911_v9, %v3200_v22  ;;  %v3127_v15 = vpop.f32.mrb[93].mxu0 }
 0x471   :  { %v3204_v32 = vadd.f32 %v3198_v5, %v3127_v15  ;;  %v3912_v16 = vpop.f32.mrb[94].mxu0 }
 0x472   :  { %v3130_v47 = vpop.f32.mrb[95].mxu0  ;;  %v3917_v23 = vpop.f32.mrb[92].mxu1 }
 0x473   :  { %v3205_v21 = vadd.f32 %v3199_v17, %v3130_v47  ;;  %v3212_v7 = vadd.f32 %v3917_v23, %v3206_v3  ;;  %v3181_v25 = vpop.f32.mrb[93].mxu1 }
 0x474   :  { %v3210_v20 = vadd.f32 %v3204_v32, %v3181_v25  ;;  %v3918_v2 = vpop.f32.mrb[94].mxu1 }
 0x475   :  { %v3225_v34 = vadd.f32 %v3357_v40, %v3212_v7  ;;  %v3184_v54 = vpop.f32.mrb[95].mxu1 }
 0x476   :  { %v3223_v55 = vadd.f32 %v3357_v40, %v3210_v20  ;;  %v3211_v0 = vadd.f32 %v3205_v21, %v3184_v54 }
 0x477   :  { %3232 = vst.msk [vmem:[%s4861_s5 + $0x28] sm:$0x1] %vm3228_vm6, %v3225_v34 }
 0x478   :  { %3230 = vst.msk [vmem:[%s4861_s5 + $0x18] sm:$0xff] %vm91_vm0, %v3223_v55  ;;  %v3224_v18 = vadd.f32 %v3357_v40, %v3211_v0 }
 0x47a   :  { %3231 = vst.msk [vmem:[%s4861_s5 + $0x20] sm:$0xff] %vm91_vm0, %v3224_v18 }

// kernel: tpu_custom_call.1
= control target key start
LH: loop header
LB: loop body
LE: loop exit
PB: predicated region body
PF: predicated region fallthrough
CT: control target
= control target key end

     0   :  { %vm91_vm0 = vcmask 261120   ;;  %vm1436_vm1 = vcmask 64512   ;;  %vm2229_vm2 = vcmask 1040384   ;;  %vm1972_vm3 = vcmask 131072   ;;  %s4856_s1 = inlined_call_operand.vmem [shape: bf16[3,4,32,8], index: 1, kind: input, shape index: {}]   ;;  %s4857_s0 = inlined_call_operand.vmem [shape: f32[2,17,32], index: 0, kind: input, shape index: {}]   ;;  %s4858_s4 = inlined_call_operand.vmem [shape: bf16[4,17,17], index: 4, kind: input, shape index: {}]   ;;  %s4859_s2 = inlined_call_operand.vmem [shape: bf16[4,8,32], index: 2, kind: input, shape index: {}]   ;;  %s4860_s3 = inlined_call_operand.vmem [shape: f32[1,32], index: 3, kind: input, shape index: {}]   ;;  %s4861_s5 = inlined_call_operand.vmem [shape: f32[2,17,32], index: 5, kind: output, shape index: {}]  }
   0x1   :  { %v3944_v0 = vld [vmem:[%s4856_s1] sm:$0xff]   ;;  %v3945_v1 = vld [vmem:[%s4856_s1 + $0x10] sm:$0xff]   ;;  %v3946_v2 = vld [vmem:[%s4856_s1 + $0x8] sm:$0xff]   ;;  %vm1965_vm4 = vcmask 138240   ;;  %vm2756_vm5 = vcmask 1043456   ;;  %vm3228_vm6 = vcmask 253952  }
   0x2   :  { %3551 = vmatprep.subr.bf16.mxu0 %v3944_v0  ;;  %3559 = vmatprep.subr.bf16.mxu1 %v3945_v1  ;;  %v3947_v3 = vld [vmem:[%s4856_s1 + $0x18] sm:$0xff]   ;;  %v21_v4 = vld [vmem:[%s4857_s0] sm:$0xff]  ;;  %v22_v5 = vld [vmem:[%s4857_s0 + $0x8] sm:$0xff] }
   0x3   :  { %3552 = vmatpush3.bf16.msra.mxu0 %v3944_v0  ;;  %3560 = vmatpush3.bf16.msra.mxu1 %v3945_v1  ;;  %v23_v6 = vld [vmem:[%s4857_s0 + $0x10] sm:$0x1]  ;;  %v4116_v7 = vpack.c.bf16 %v22_v5, %v21_v4  ;;  %v3948_v8 = vld [vmem:[%s4856_s1 + $0x20] sm:$0xff]   ;;  %v3950_v11 = vld [vmem:[%s4856_s1 + $0x28] sm:$0xff]  }
   0x4   :  { %3553 = vmatprep.subr.bf16.mxu0 %v3946_v2  ;;  %3561 = vmatprep.subr.bf16.mxu1 %v3947_v3  ;;  %v4121_v9 = vpack.c.bf16 %v23_v6, %v23_v6  ;;  %v3949_v10 = vld [vmem:[%s4856_s1 + $0x30] sm:$0xff]   ;;  %v3951_v12 = vld [vmem:[%s4856_s1 + $0x38] sm:$0xff]   ;;  %v25_v14 = vld [vmem:[%s4857_s0 + $0x20] sm:$0xff] }
   0x5   :  { %3555 = vmatprep.mubr.msk.bf16.mxu0 %vm91_vm0, %v4116_v7  ;;  %3563 = vmatprep.mubr.msk.bf16.mxu1 %vm91_vm0, %v4116_v7  ;;  %v24_v13 = vld [vmem:[%s4857_s0 + $0x18] sm:$0xff]  ;;  %v26_v16 = vld [vmem:[%s4857_s0 + $0x28] sm:$0x1]  ;;  %v3952_v18 = vld [vmem:[%s4856_s1 + $0x40] sm:$0xff]  }
   0x6   :  { %v4150_v15 = vpack.c.bf16 %v25_v14, %v24_v13  ;;  %v4163_v17 = vpack.c.bf16 %v26_v16, %v26_v16  ;;  %v3953_v19 = vld [vmem:[%s4856_s1 + $0x50] sm:$0xff]   ;;  %v3954_v20 = vld [vmem:[%s4856_s1 + $0x48] sm:$0xff]   ;;  %v3955_v21 = vld [vmem:[%s4856_s1 + $0x58] sm:$0xff]  }
   0x7   :  { %3554 = vmatpush3.bf16.msra.mxu0 %v3946_v2  ;;  %3562 = vmatpush3.bf16.msra.mxu1 %v3947_v3  ;;  %v3956_v22 = vld [vmem:[%s4856_s1 + $0x60] sm:$0xff]   ;;  %v3957_v23 = vld [vmem:[%s4856_s1 + $0x70] sm:$0xff]   ;;  %v3958_v24 = vld [vmem:[%s4856_s1 + $0x68] sm:$0xff]  }
   0x8   :  { %3567 = vmatprep.subr.bf16.mxu0 %v3948_v8  ;;  %3575 = vmatprep.subr.bf16.mxu1 %v3949_v10  ;;  %v3959_v25 = vld [vmem:[%s4856_s1 + $0x78] sm:$0xff]   ;;  %v3960_v26 = vld [vmem:[%s4856_s1 + $0x80] sm:$0xff]   ;;  %v3961_v27 = vld [vmem:[%s4856_s1 + $0x90] sm:$0xff]  }
   0x9   :  { %v3962_v28 = vld [vmem:[%s4856_s1 + $0x88] sm:$0xff]   ;;  %v3963_v29 = vld [vmem:[%s4856_s1 + $0x98] sm:$0xff]   ;;  %v3964_v30 = vld [vmem:[%s4856_s1 + $0xa0] sm:$0xff]  }
   0xa   :  { %3556 = vmatmul.mubr.msk.bf16.vlgmr.msra.gmra.mrb[0].mxu0 %vm91_vm0, %v4121_v9  ;;  %3564 = vmatmul.mubr.msk.bf16.vlgmr.msra.gmra.mrb[0].mxu1 %vm91_vm0, %v4121_v9  ;;  %v3965_v31 = vld [vmem:[%s4856_s1 + $0xb0] sm:$0xff]   ;;  %v3966_v32 = vld [vmem:[%s4856_s1 + $0xa8] sm:$0xff]   ;;  %v3967_v33 = vld [vmem:[%s4856_s1 + $0xb8] sm:$0xff]  }
   0xb   :  { %3568 = vmatpush3.bf16.msra.mxu0 %v3948_v8  ;;  %3576 = vmatpush3.bf16.msra.mxu1 %v3949_v10 }
   0xc   :  { %3569 = vmatprep.subr.bf16.mxu0 %v3950_v11  ;;  %3577 = vmatprep.subr.bf16.mxu1 %v3951_v12 }
   0xd   :  { %3571 = vmatprep.mubr.msk.bf16.mxu0 %vm91_vm0, %v4116_v7  ;;  %3579 = vmatprep.mubr.msk.bf16.mxu1 %vm91_vm0, %v4116_v7 }
   0xf   :  { %3570 = vmatpush3.bf16.msra.mxu0 %v3950_v11  ;;  %3578 = vmatpush3.bf16.msra.mxu1 %v3951_v12 }
  0x10   :  { %3583 = vmatprep.subr.bf16.mxu0 %v3944_v0  ;;  %3591 = vmatprep.subr.bf16.mxu1 %v3945_v1 }
  0x12   :  { %3572 = vmatmul.mubr.msk.bf16.vlgmr.msra.gmra.mrb[4].mxu0 %vm91_vm0, %v4121_v9  ;;  %3580 = vmatmul.mubr.msk.bf16.vlgmr.msra.gmra.mrb[4].mxu1 %vm91_vm0, %v4121_v9 }
  0x13   :  { %3584 = vmatpush3.bf16.msra.mxu0 %v3944_v0  ;;  %3592 = vmatpush3.bf16.msra.mxu1 %v3945_v1 }
  0x14   :  { %3585 = vmatprep.subr.bf16.mxu0 %v3946_v2  ;;  %3593 = vmatprep.subr.bf16.mxu1 %v3947_v3 }
  0x15   :  { %3587 = vmatprep.mubr.msk.bf16.mxu0 %vm91_vm0, %v4150_v15  ;;  %3595 = vmatprep.mubr.msk.bf16.mxu1 %vm91_vm0, %v4150_v15 }
  0x17   :  { %3586 = vmatpush3.bf16.msra.mxu0 %v3946_v2  ;;  %3594 = vmatpush3.bf16.msra.mxu1 %v3947_v3 }
  0x18   :  { %3599 = vmatprep.subr.bf16.mxu0 %v3948_v8  ;;  %3607 = vmatprep.subr.bf16.mxu1 %v3949_v10 }
  0x1a   :  { %3588 = vmatmul.mubr.msk.bf16.vlgmr.msra.gmra.mrb[8].mxu0 %vm91_vm0, %v4163_v17  ;;  %3596 = vmatmul.mubr.msk.bf16.vlgmr.msra.gmra.mrb[8].mxu1 %vm91_vm0, %v4163_v17 }
  0x1b   :  { %3600 = vmatpush3.bf16.msra.mxu0 %v3948_v8  ;;  %3608 = vmatpush3.bf16.msra.mxu1 %v3949_v10 }
  0x1c   :  { %3601 = vmatprep.subr.bf16.mxu0 %v3950_v11  ;;  %3609 = vmatprep.subr.bf16.mxu1 %v3951_v12 }
  0x1d   :  { %3603 = vmatprep.mubr.msk.bf16.mxu0 %vm91_vm0, %v4150_v15  ;;  %3611 = vmatprep.mubr.msk.bf16.mxu1 %vm91_vm0, %v4150_v15 }
  0x1f   :  { %3602 = vmatpush3.bf16.msra.mxu0 %v3950_v11  ;;  %3610 = vmatpush3.bf16.msra.mxu1 %v3951_v12 }
  0x20   :  { %3615 = vmatprep.subr.bf16.mxu0 %v3952_v18  ;;  %3623 = vmatprep.subr.bf16.mxu1 %v3953_v19 }
  0x22   :  { %3604 = vmatmul.mubr.msk.bf16.vlgmr.msra.gmra.mrb[12].mxu0 %vm91_vm0, %v4163_v17  ;;  %3612 = vmatmul.mubr.msk.bf16.vlgmr.msra.gmra.mrb[12].mxu1 %vm91_vm0, %v4163_v17 }
  0x23   :  { %3616 = vmatpush3.bf16.msra.mxu0 %v3952_v18  ;;  %3624 = vmatpush3.bf16.msra.mxu1 %v3953_v19 }
  0x24   :  { %3617 = vmatprep.subr.bf16.mxu0 %v3954_v20  ;;  %3625 = vmatprep.subr.bf16.mxu1 %v3955_v21 }
  0x25   :  { %3619 = vmatprep.mubr.msk.bf16.mxu0 %vm91_vm0, %v4116_v7  ;;  %3627 = vmatprep.mubr.msk.bf16.mxu1 %vm91_vm0, %v4116_v7 }
  0x27   :  { %3618 = vmatpush3.bf16.msra.mxu0 %v3954_v20  ;;  %3626 = vmatpush3.bf16.msra.mxu1 %v3955_v21 }
  0x28   :  { %3631 = vmatprep.subr.bf16.mxu0 %v3956_v22  ;;  %3639 = vmatprep.subr.bf16.mxu1 %v3957_v23 }
  0x2a   :  { %3620 = vmatmul.mubr.msk.bf16.vlgmr.msra.gmra.mrb[16].mxu0 %vm91_vm0, %v4121_v9  ;;  %3628 = vmatmul.mubr.msk.bf16.vlgmr.msra.gmra.mrb[16].mxu1 %vm91_vm0, %v4121_v9 }
  0x2b   :  { %3632 = vmatpush3.bf16.msra.mxu0 %v3956_v22  ;;  %3640 = vmatpush3.bf16.msra.mxu1 %v3957_v23 }
  0x2c   :  { %3633 = vmatprep.subr.bf16.mxu0 %v3958_v24  ;;  %3641 = vmatprep.subr.bf16.mxu1 %v3959_v25 }
  0x2d   :  { %3635 = vmatprep.mubr.msk.bf16.mxu0 %vm91_vm0, %v4116_v7  ;;  %3643 = vmatprep.mubr.msk.bf16.mxu1 %vm91_vm0, %v4116_v7 }
  0x2f   :  { %3634 = vmatpush3.bf16.msra.mxu0 %v3958_v24  ;;  %3642 = vmatpush3.bf16.msra.mxu1 %v3959_v25 }
  0x30   :  { %3647 = vmatprep.subr.bf16.mxu0 %v3952_v18  ;;  %3655 = vmatprep.subr.bf16.mxu1 %v3953_v19 }
  0x32   :  { %3636 = vmatmul.mubr.msk.bf16.vlgmr.msra.gmra.mrb[20].mxu0 %vm91_vm0, %v4121_v9  ;;  %3644 = vmatmul.mubr.msk.bf16.vlgmr.msra.gmra.mrb[20].mxu1 %vm91_vm0, %v4121_v9 }
  0x33   :  { %3648 = vmatpush3.bf16.msra.mxu0 %v3952_v18  ;;  %3656 = vmatpush3.bf16.msra.mxu1 %v3953_v19 }
  0x34   :  { %3649 = vmatprep.subr.bf16.mxu0 %v3954_v20  ;;  %3657 = vmatprep.subr.bf16.mxu1 %v3955_v21 }
  0x35   :  { %3651 = vmatprep.mubr.msk.bf16.mxu0 %vm91_vm0, %v4150_v15  ;;  %3659 = vmatprep.mubr.msk.bf16.mxu1 %vm91_vm0, %v4150_v15 }
  0x37   :  { %3650 = vmatpush3.bf16.msra.mxu0 %v3954_v20  ;;  %3658 = vmatpush3.bf16.msra.mxu1 %v3955_v21 }
  0x38   :  { %3663 = vmatprep.subr.bf16.mxu0 %v3956_v22  ;;  %3671 = vmatprep.subr.bf16.mxu1 %v3957_v23 }
  0x3a   :  { %3652 = vmatmul.mubr.msk.bf16.vlgmr.msra.gmra.mrb[24].mxu0 %vm91_vm0, %v4163_v17  ;;  %3660 = vmatmul.mubr.msk.bf16.vlgmr.msra.gmra.mrb[24].mxu1 %vm91_vm0, %v4163_v17 }
  0x3b   :  { %3664 = vmatpush3.bf16.msra.mxu0 %v3956_v22  ;;  %3672 = vmatpush3.bf16.msra.mxu1 %v3957_v23 }
  0x3c   :  { %3665 = vmatprep.subr.bf16.mxu0 %v3958_v24  ;;  %3673 = vmatprep.subr.bf16.mxu1 %v3959_v25 }
  0x3d   :  { %3667 = vmatprep.mubr.msk.bf16.mxu0 %vm91_vm0, %v4150_v15  ;;  %3675 = vmatprep.mubr.msk.bf16.mxu1 %vm91_vm0, %v4150_v15 }
  0x3f   :  { %3666 = vmatpush3.bf16.msra.mxu0 %v3958_v24  ;;  %3674 = vmatpush3.bf16.msra.mxu1 %v3959_v25 }
  0x40   :  { %3679 = vmatprep.subr.bf16.mxu0 %v3960_v26  ;;  %3687 = vmatprep.subr.bf16.mxu1 %v3961_v27 }
  0x42   :  { %3668 = vmatmul.mubr.msk.bf16.vlgmr.msra.gmra.mrb[28].mxu0 %vm91_vm0, %v4163_v17  ;;  %3676 = vmatmul.mubr.msk.bf16.vlgmr.msra.gmra.mrb[28].mxu1 %vm91_vm0, %v4163_v17 }
  0x43   :  { %3680 = vmatpush3.bf16.msra.mxu0 %v3960_v26  ;;  %3688 = vmatpush3.bf16.msra.mxu1 %v3961_v27 }
  0x44   :  { %3681 = vmatprep.subr.bf16.mxu0 %v3962_v28  ;;  %3689 = vmatprep.subr.bf16.mxu1 %v3963_v29 }
  0x45   :  { %3683 = vmatprep.mubr.msk.bf16.mxu0 %vm91_vm0, %v4116_v7  ;;  %3691 = vmatprep.mubr.msk.bf16.mxu1 %vm91_vm0, %v4116_v7 }
  0x47   :  { %3682 = vmatpush3.bf16.msra.mxu0 %v3962_v28  ;;  %3690 = vmatpush3.bf16.msra.mxu1 %v3963_v29 }
  0x48   :  { %3695 = vmatprep.subr.bf16.mxu0 %v3964_v30  ;;  %3703 = vmatprep.subr.bf16.mxu1 %v3965_v31 }
  0x4a   :  { %3684 = vmatmul.mubr.msk.bf16.vlgmr.msra.gmra.mrb[32].mxu0 %vm91_vm0, %v4121_v9  ;;  %3692 = vmatmul.mubr.msk.bf16.vlgmr.msra.gmra.mrb[32].mxu1 %vm91_vm0, %v4121_v9 }
  0x4b   :  { %3696 = vmatpush3.bf16.msra.mxu0 %v3964_v30  ;;  %3704 = vmatpush3.bf16.msra.mxu1 %v3965_v31 }
  0x4c   :  { %3697 = vmatprep.subr.bf16.mxu0 %v3966_v32  ;;  %3705 = vmatprep.subr.bf16.mxu1 %v3967_v33 }
  0x4d   :  { %3699 = vmatprep.mubr.msk.bf16.mxu0 %vm91_vm0, %v4116_v7  ;;  %3707 = vmatprep.mubr.msk.bf16.mxu1 %vm91_vm0, %v4116_v7 }
  0x4f   :  { %3698 = vmatpush3.bf16.msra.mxu0 %v3966_v32  ;;  %3706 = vmatpush3.bf16.msra.mxu1 %v3967_v33 }
  0x50   :  { %3711 = vmatprep.subr.bf16.mxu0 %v3960_v26  ;;  %3719 = vmatprep.subr.bf16.mxu1 %v3961_v27 }
  0x52   :  { %3700 = vmatmul.mubr.msk.bf16.vlgmr.msra.gmra.mrb[36].mxu0 %vm91_vm0, %v4121_v9  ;;  %3708 = vmatmul.mubr.msk.bf16.vlgmr.msra.gmra.mrb[36].mxu1 %vm91_vm0, %v4121_v9 }
  0x53   :  { %3712 = vmatpush3.bf16.msra.mxu0 %v3960_v26  ;;  %3720 = vmatpush3.bf16.msra.mxu1 %v3961_v27 }
  0x54   :  { %3713 = vmatprep.subr.bf16.mxu0 %v3962_v28  ;;  %3721 = vmatprep.subr.bf16.mxu1 %v3963_v29 }
  0x55   :  { %3715 = vmatprep.mubr.msk.bf16.mxu0 %vm91_vm0, %v4150_v15  ;;  %3723 = vmatprep.mubr.msk.bf16.mxu1 %vm91_vm0, %v4150_v15 }
  0x57   :  { %3714 = vmatpush3.bf16.msra.mxu0 %v3962_v28  ;;  %3722 = vmatpush3.bf16.msra.mxu1 %v3963_v29 }
  0x58   :  { %3727 = vmatprep.subr.bf16.mxu0 %v3964_v30  ;;  %3735 = vmatprep.subr.bf16.mxu1 %v3965_v31 }
  0x5a   :  { %3716 = vmatmul.mubr.msk.bf16.vlgmr.msra.gmra.mrb[40].mxu0 %vm91_vm0, %v4163_v17  ;;  %3724 = vmatmul.mubr.msk.bf16.vlgmr.msra.gmra.mrb[40].mxu1 %vm91_vm0, %v4163_v17 }
  0x5b   :  { %3728 = vmatpush3.bf16.msra.mxu0 %v3964_v30  ;;  %3736 = vmatpush3.bf16.msra.mxu1 %v3965_v31 }
  0x5c   :  { %3729 = vmatprep.subr.bf16.mxu0 %v3966_v32  ;;  %3737 = vmatprep.subr.bf16.mxu1 %v3967_v33 }
  0x5d   :  { %3731 = vmatprep.mubr.msk.bf16.mxu0 %vm91_vm0, %v4150_v15  ;;  %3739 = vmatprep.mubr.msk.bf16.mxu1 %vm91_vm0, %v4150_v15 }
  0x5f   :  { %3730 = vmatpush3.bf16.msra.mxu0 %v3966_v32  ;;  %3738 = vmatpush3.bf16.msra.mxu1 %v3967_v33 }
  0x62   :  { %3732 = vmatmul.mubr.msk.bf16.vlgmr.msra.gmra.mrb[44].mxu0 %vm91_vm0, %v4163_v17  ;;  %3740 = vmatmul.mubr.msk.bf16.vlgmr.msra.gmra.mrb[44].mxu1 %vm91_vm0, %v4163_v17 }
  0xdd   :  { %v4289_v34 = vpop.f32.mrb[0].mxu0  ;;  %v4291_v35 = vpop.f32.mrb[0].mxu1 }
  0xde   :  { %v132_v36 = vpop.f32.mrb[1].mxu0  ;;  %v192_v37 = vpop.f32.mrb[1].mxu1 }
  0xdf   :  { %v3558_v38 = vpop.f32.mrb[2].mxu0  ;;  %v3566_v39 = vpop.f32.mrb[2].mxu1 }
  0xe0   :  { %v135_v40 = vpop.f32.mrb[3].mxu0  ;;  %v195_v42 = vpop.f32.mrb[3].mxu1 }
  0xe1   :  { %v524_v41 = vpack.c.bf16 %v135_v40, %v132_v36  ;;  %v526_v43 = vpack.c.bf16 %v195_v42, %v192_v37 }
  0xe3   :  { %3747 = vmatprep.mubr.msk.bf16.mxu0 %vm1436_vm1, %v524_v41  ;;  %3755 = vmatprep.mubr.msk.bf16.mxu1 %vm1436_vm1, %v526_v43 }
  0xe5   :  { %v4295_v44 = vpop.f32.mrb[4].mxu0  ;;  %v4297_v45 = vpop.f32.mrb[4].mxu1 }
  0xe6   :  { %v4299_v46 = vpop.f32.mrb[5].mxu0  ;;  %v4301_v47 = vpop.f32.mrb[5].mxu1 }
  0xe7   :  { %v3574_v48 = vpop.f32.mrb[6].mxu0  ;;  %v3582_v49 = vpop.f32.mrb[6].mxu1 }
  0xe8   :  { %v4303_v50 = vpop.f32.mrb[7].mxu0  ;;  %v4307_v52 = vpop.f32.mrb[7].mxu1  ;;  %v525_v49 = vpack.c.bf16 %v4289_v34, %v4289_v34 }
  0xe9   :  { %v528_v51 = vpack.c.bf16 %v4303_v50, %v4299_v46  ;;  %v530_v53 = vpack.c.bf16 %v4307_v52, %v4301_v47 }
  0xed   :  { %v4311_v54 = vpop.f32.mrb[8].mxu0  ;;  %v4313_v55 = vpop.f32.mrb[8].mxu1 }
  0xee   :  { %v4315_v56 = vpop.f32.mrb[9].mxu0  ;;  %v4317_v57 = vpop.f32.mrb[9].mxu1 }
  0xef   :  { %v3590_v58 = vpop.f32.mrb[10].mxu0  ;;  %v3598_v59 = vpop.f32.mrb[10].mxu1 }
  0xf0   :  { %v4319_v60 = vpop.f32.mrb[11].mxu0  ;;  %v4323_v62 = vpop.f32.mrb[11].mxu1 }
  0xf1   :  { %v532_v61 = vpack.c.bf16 %v4319_v60, %v4315_v56  ;;  %v534_v63 = vpack.c.bf16 %v4323_v62, %v4317_v57 }
  0xf5   :  { %v4327_v0 = vpop.f32.mrb[12].mxu0  ;;  %v4329_v1 = vpop.f32.mrb[12].mxu1 }
  0xf6   :  { %v4331_v2 = vpop.f32.mrb[13].mxu0  ;;  %v4333_v3 = vpop.f32.mrb[13].mxu1 }
  0xf7   :  { %v3606_v4 = vpop.f32.mrb[14].mxu0  ;;  %v3614_v5 = vpop.f32.mrb[14].mxu1 }
  0xf8   :  { %v4335_v6 = vpop.f32.mrb[15].mxu0  ;;  %v4339_v8 = vpop.f32.mrb[15].mxu1  ;;  %v527_v4 = vpack.c.bf16 %v4291_v35, %v4291_v35 }
  0xf9   :  { %v536_v7 = vpack.c.bf16 %v4335_v6, %v4331_v2  ;;  %v538_v9 = vpack.c.bf16 %v4339_v8, %v4333_v3 }
  0xfd   :  { %v3621_v10 = vpop.f32.mrb[16].mxu0  ;;  %v3629_v11 = vpop.f32.mrb[16].mxu1 }
  0xfe   :  { %v586_v12 = vpop.f32.mrb[17].mxu0  ;;  %v646_v13 = vpop.f32.mrb[17].mxu1  ;;  %v973_v20 = vpack.c.bf16 %v3621_v10, %v3621_v10  ;;  %v975_v22 = vpack.c.bf16 %v3629_v11, %v3629_v11 }
  0xff   :  { %v3622_v14 = vpop.f32.mrb[18].mxu0  ;;  %v3630_v15 = vpop.f32.mrb[18].mxu1 }
 0x100   :  { %v589_v16 = vpop.f32.mrb[19].mxu0  ;;  %v649_v18 = vpop.f32.mrb[19].mxu1  ;;  %v1447_v36 = vsel %vm1436_vm1, %v973_v20, 0  ;;  %v1507_v37 = vsel %vm1436_vm1, %v975_v22, 0 }
 0x101   :  { %v972_v17 = vpack.c.bf16 %v589_v16, %v586_v12  ;;  %v974_v19 = vpack.c.bf16 %v649_v18, %v646_v13 }
 0x103   :  { %v1444_v21 = vsel %vm1436_vm1, %v972_v17, 0  ;;  %3919 = vmatprep.subr.msk.bf16.mxu0 %vm1436_vm1, %v972_v17  ;;  %v1504_v23 = vsel %vm1436_vm1, %v974_v19, 0  ;;  %3921 = vmatprep.subr.msk.bf16.mxu1 %vm1436_vm1, %v974_v19 }
 0x104   :  { %3744 = vmatpush3.bf16.xpose.msra.mxu0 %v1444_v21  ;;  %3752 = vmatpush3.bf16.xpose.msra.mxu1 %v1504_v23 }
 0x105   :  { %3920 = vmatprep.subr.msk.bf16.mxu0 %vm1436_vm1, %v973_v20  ;;  %v3637_v24 = vpop.f32.mrb[20].mxu0  ;;  %3922 = vmatprep.subr.msk.bf16.mxu1 %vm1436_vm1, %v975_v22  ;;  %v3645_v25 = vpop.f32.mrb[20].mxu1 }
 0x106   :  { %v706_v26 = vpop.f32.mrb[21].mxu0  ;;  %v766_v27 = vpop.f32.mrb[21].mxu1  ;;  %v977_v11 = vpack.c.bf16 %v3637_v24, %v3637_v24  ;;  %v979_v13 = vpack.c.bf16 %v3645_v25, %v3645_v25  ;;  %v529_v25 = vpack.c.bf16 %v4295_v44, %v4295_v44 }
 0x107   :  { %v3638_v28 = vpop.f32.mrb[22].mxu0  ;;  %v3646_v29 = vpop.f32.mrb[22].mxu1 }
 0x108   :  { %v709_v30 = vpop.f32.mrb[23].mxu0  ;;  %v769_v32 = vpop.f32.mrb[23].mxu1  ;;  %v1567_v47 = vsel %vm1436_vm1, %v977_v11, 0  ;;  %v1627_v52 = vsel %vm1436_vm1, %v979_v13, 0  ;;  %v531_v28 = vpack.c.bf16 %v4297_v45, %v4297_v45 }
 0x109   :  { %v976_v31 = vpack.c.bf16 %v709_v30, %v706_v26  ;;  %v978_v33 = vpack.c.bf16 %v769_v32, %v766_v27 }
 0x10b   :  { %v1564_v10 = vsel %vm1436_vm1, %v976_v31, 0  ;;  %v1624_v12 = vsel %vm1436_vm1, %v978_v33, 0 }
 0x10c   :  { %3746 = vmatpush3.bf16.xpose.msra.mxu0 %v1447_v36  ;;  %3754 = vmatpush3.bf16.xpose.msra.mxu1 %v1507_v37 }
 0x10d   :  { %3923 = vmatprep.subr.msk.bf16.mxu0 %vm1436_vm1, %v976_v31  ;;  %v3653_v38 = vpop.f32.mrb[24].mxu0  ;;  %3925 = vmatprep.subr.msk.bf16.mxu1 %vm1436_vm1, %v978_v33  ;;  %v3661_v39 = vpop.f32.mrb[24].mxu1 }
 0x10e   :  { %v814_v40 = vpop.f32.mrb[25].mxu0  ;;  %v862_v41 = vpop.f32.mrb[25].mxu1  ;;  %v981_v31 = vpack.c.bf16 %v3653_v38, %v3653_v38  ;;  %v983_v44 = vpack.c.bf16 %v3661_v39, %v3661_v39  ;;  %v4064_v38 = vmov 0  }
 0x10f   :  { %v3654_v42 = vpop.f32.mrb[26].mxu0  ;;  %v3662_v43 = vpop.f32.mrb[26].mxu1  ;;  %v4409_v39 = vsel %vm2229_vm2, 65535, %v4064_v38 }
 0x110   :  { %v817_v48 = vpop.f32.mrb[27].mxu0  ;;  %v865_v59 = vpop.f32.mrb[27].mxu1 }
 0x111   :  { %v980_v58 = vpack.c.bf16 %v817_v48, %v814_v40  ;;  %v982_v5 = vpack.c.bf16 %v865_v59, %v862_v41  ;;  %v1687_v48 = vsel %vm1436_vm1, %v981_v31, 0 }
 0x113   :  { %3748 = vmatmul.mubr.msk.bf16.vlgmr.msra.gmra.mrb[48].mxu0 %vm1436_vm1, %v525_v49  ;;  %3756 = vmatmul.mubr.msk.bf16.vlgmr.msra.gmra.mrb[48].mxu1 %vm1436_vm1, %v527_v4  ;;  %v1684_v30 = vsel %vm1436_vm1, %v980_v58, 0  ;;  %v1744_v32 = vsel %vm1436_vm1, %v982_v5, 0  ;;  %v1747_v49 = vsel %vm1436_vm1, %v983_v44, 0 }
 0x114   :  { %3760 = vmatpush3.bf16.xpose.msra.mxu0 %v1564_v10  ;;  %3763 = vmatprep.mubr.msk.bf16.mxu0 %vm1436_vm1, %v528_v51 }
 0x115   :  { %3768 = vmatpush3.bf16.xpose.msra.mxu1 %v1624_v12  ;;  %v4365_v34 = vpop.f32.mrb[28].mxu0  ;;  %3771 = vmatprep.mubr.msk.bf16.mxu1 %vm1436_vm1, %v530_v53  ;;  %v4372_v35 = vpop.f32.mrb[28].mxu1 }
 0x116   :  { %3924 = vmatprep.subr.msk.bf16.mxu0 %vm1436_vm1, %v977_v11  ;;  %v910_v14 = vpop.f32.mrb[29].mxu0  ;;  %3926 = vmatprep.subr.msk.bf16.mxu1 %vm1436_vm1, %v979_v13  ;;  %v958_v15 = vpop.f32.mrb[29].mxu1 }
 0x117   :  { %v3670_v16 = vpop.f32.mrb[30].mxu0  ;;  %v3678_v46 = vpop.f32.mrb[30].mxu1 }
 0x118   :  { %v913_v50 = vpop.f32.mrb[31].mxu0  ;;  %v961_v17 = vpop.f32.mrb[31].mxu1  ;;  %v533_v16 = vpack.c.bf16 %v4311_v54, %v4311_v54 }
 0x119   :  { %v4375_v51 = vpack.c.bf16 %v913_v50, %v910_v14  ;;  %v4377_v18 = vpack.c.bf16 %v961_v17, %v958_v15 }
 0x11b   :  { %v1864_v54 = vsel %vm1436_vm1, %v4377_v18, 0 }
 0x11c   :  { %3762 = vmatpush3.bf16.xpose.msra.mxu0 %v1567_v47  ;;  %v535_v47 = vpack.c.bf16 %v4313_v55, %v4313_v55 }
 0x11d   :  { %3770 = vmatpush3.bf16.xpose.msra.mxu1 %v1627_v52  ;;  %3927 = vmatprep.subr.msk.bf16.mxu0 %vm1436_vm1, %v980_v58  ;;  %v4382_v53 = vpop.f32.mrb[32].mxu0  ;;  %v4385_v19 = vpop.f32.mrb[32].mxu1 }
 0x11e   :  { %3929 = vmatprep.subr.msk.bf16.mxu1 %vm1436_vm1, %v982_v5  ;;  %v1034_v20 = vpop.f32.mrb[33].mxu0  ;;  %v1094_v21 = vpop.f32.mrb[33].mxu1 }
 0x11f   :  { %v3686_v22 = vpop.f32.mrb[34].mxu0  ;;  %v3694_v23 = vpop.f32.mrb[34].mxu1 }
 0x120   :  { %v1037_v24 = vpop.f32.mrb[35].mxu0  ;;  %v1097_v27 = vpop.f32.mrb[35].mxu1  ;;  %v987_v22 = vpack.c.bf16 %v4372_v35, %v4372_v35 }
 0x121   :  { %v4389_v26 = vpack.c.bf16 %v1037_v24, %v1034_v20  ;;  %v4393_v29 = vpack.c.bf16 %v1097_v27, %v1094_v21  ;;  %v1804_v20 = vsel %vm1436_vm1, %v4375_v51, 0  ;;  %v985_v21 = vpack.c.bf16 %v4365_v34, %v4365_v34 }
 0x123   :  { %3764 = vmatmul.mubr.msk.bf16.vlgmr.msra.gmra.mrb[52].mxu0 %vm1436_vm1, %v529_v25  ;;  %v1807_v27 = vsel %vm1436_vm1, %v985_v21, 0 }
 0x124   :  { %3772 = vmatmul.mubr.msk.bf16.vlgmr.msra.gmra.mrb[52].mxu1 %vm1436_vm1, %v531_v28  ;;  %3776 = vmatpush3.bf16.xpose.msra.mxu0 %v1684_v30  ;;  %v1867_v28 = vsel %vm1436_vm1, %v987_v22, 0  ;;  %v1421_v30 = vpack.c.bf16 %v4382_v53, %v4382_v53  ;;  %v4504_v53 = vld [vmem:[%s4858_s4 + $0x14] sm:$0x1] }
 0x125   :  { %3779 = vmatprep.mubr.msk.bf16.mxu0 %vm1436_vm1, %v532_v61  ;;  %3784 = vmatpush3.bf16.xpose.msra.mxu1 %v1744_v32  ;;  %v3701_v45 = vpop.f32.mrb[36].mxu0  ;;  %v3709_v36 = vpop.f32.mrb[36].mxu1  ;;  %v537_v32 = vpack.c.bf16 %v4327_v0, %v4327_v0  ;;  %v4494_v0 = vld [vmem:[%s4858_s4 + $0x8] sm:$0x1] }
 0x126   :  { %3787 = vmatprep.mubr.msk.bf16.mxu1 %vm1436_vm1, %v534_v63  ;;  %3928 = vmatprep.subr.msk.bf16.mxu0 %vm1436_vm1, %v981_v31  ;;  %v1425_v33 = vpack.c.bf16 %v3701_v45, %v3701_v45  ;;  %v1154_v37 = vpop.f32.mrb[37].mxu0  ;;  %v1427_v56 = vpack.c.bf16 %v3709_v36, %v3709_v36  ;;  %v1214_v60 = vpop.f32.mrb[37].mxu1  ;;  %v1423_v31 = vpack.c.bf16 %v4385_v19, %v4385_v19  ;;  %v1931_v19 = vunpack.c.l.bf16 %v4494_v0 }
 0x127   :  { %3930 = vmatprep.subr.msk.bf16.mxu1 %vm1436_vm1, %v983_v44  ;;  %v3702_v61 = vpop.f32.mrb[38].mxu0  ;;  %v3710_v41 = vpop.f32.mrb[38].mxu1  ;;  %v2233_v44 = vand.u32 %v4409_v39, %v1421_v30  ;;  %v539_v45 = vpack.c.bf16 %v4329_v1, %v4329_v1  ;;  %v4499_v1 = vld [vmem:[%s4858_s4] sm:$0xff]  }
 0x128   :  { %v4412_v40 = vand.u32 %v4409_v39, %v1425_v33  ;;  %v1157_v57 = vpop.f32.mrb[39].mxu0  ;;  %v4415_v62 = vand.u32 %v4409_v39, %v1427_v56  ;;  %v1217_v42 = vpop.f32.mrb[39].mxu1  ;;  %v2290_v33 = vand.u32 %v4409_v39, %v1423_v31  ;;  %v3361_v38 = vunpack.c.h.bf16 %v4499_v1 }
 0x129   :  { %v4417_v63 = vpack.c.bf16 %v1157_v57, %v1154_v37  ;;  %v4419_v43 = vpack.c.bf16 %v1217_v42, %v1214_v60  ;;  %v4512_v37 = vld [vmem:[%s4858_s4 + $0xc] sm:$0xff]  }
 0x12c   :  { %3778 = vmatpush3.bf16.xpose.msra.mxu0 %v1687_v48  ;;  %v1932_v48 = vunpack.c.l.bf16 %v4512_v37 }
 0x12d   :  { %3786 = vmatpush3.bf16.xpose.msra.mxu1 %v1747_v49  ;;  %3931 = vmatprep.subr.msk.bf16.mxu0 %vm1436_vm1, %v4375_v51  ;;  %v3717_v58 = vpop.f32.mrb[40].mxu0  ;;  %v3725_v4 = vpop.f32.mrb[40].mxu1 }
 0x12e   :  { %3933 = vmatprep.subr.msk.bf16.mxu1 %vm1436_vm1, %v4377_v18  ;;  %v1429_v59 = vpack.c.bf16 %v3717_v58, %v3717_v58  ;;  %v1262_v5 = vpop.f32.mrb[41].mxu0  ;;  %v1431_v10 = vpack.c.bf16 %v3725_v4, %v3725_v4  ;;  %v1310_v11 = vpop.f32.mrb[41].mxu1 }
 0x12f   :  { %v3718_v12 = vpop.f32.mrb[42].mxu0  ;;  %v3726_v14 = vpop.f32.mrb[42].mxu1 }
 0x130   :  { %v4428_v13 = vand.u32 %v4409_v39, %v1429_v59  ;;  %v1265_v15 = vpop.f32.mrb[43].mxu0  ;;  %v4433_v46 = vand.u32 %v4409_v39, %v1431_v10  ;;  %v1313_v17 = vpop.f32.mrb[43].mxu1  ;;  %v1933_v10 = vunpack.c.h.bf16 %v4512_v37 }
 0x131   :  { %v4435_v50 = vpack.c.bf16 %v1265_v15, %v1262_v5  ;;  %v4439_v52 = vpack.c.bf16 %v1313_v17, %v1310_v11  ;;  %v4552_v17 = vld [vmem:[%s4858_s4 + $0x20] sm:$0x1] }
 0x133   :  { %3780 = vmatmul.mubr.msk.bf16.vlgmr.msra.gmra.mrb[56].mxu0 %vm1436_vm1, %v533_v16 }
 0x134   :  { %3788 = vmatmul.mubr.msk.bf16.vlgmr.msra.gmra.mrb[56].mxu1 %vm1436_vm1, %v535_v47  ;;  %3792 = vmatpush3.bf16.xpose.msra.mxu0 %v1804_v20  ;;  %v4559_v20 = vld [vmem:[%s4858_s4 + $0x2c] sm:$0x1] }
 0x135   :  { %3795 = vmatprep.mubr.msk.bf16.mxu0 %vm1436_vm1, %v536_v7  ;;  %3800 = vmatpush3.bf16.xpose.msra.mxu1 %v1864_v54  ;;  %v3733_v55 = vpop.f32.mrb[44].mxu0  ;;  %v3741_v51 = vpop.f32.mrb[44].mxu1  ;;  %v4566_v54 = vld [vmem:[%s4858_s4 + $0x18] sm:$0xff]  }
 0x136   :  { %3803 = vmatprep.mubr.msk.bf16.mxu1 %vm1436_vm1, %v538_v9  ;;  %3932 = vmatprep.subr.msk.bf16.mxu0 %vm1436_vm1, %v985_v21  ;;  %v1433_v34 = vpack.c.bf16 %v3733_v55, %v3733_v55  ;;  %v1358_v18 = vpop.f32.mrb[45].mxu0  ;;  %v1435_v35 = vpack.c.bf16 %v3741_v51, %v3741_v51  ;;  %v1406_v23 = vpop.f32.mrb[45].mxu1  ;;  %v4572_v55 = vld [vmem:[%s4858_s4 + $0x24] sm:$0xff]   ;;  %v3364_v51 = vunpack.c.l.bf16 %v4566_v54 }
 0x137   :  { %3934 = vmatprep.subr.msk.bf16.mxu1 %vm1436_vm1, %v987_v22  ;;  %v3734_v24 = vpop.f32.mrb[46].mxu0  ;;  %v3742_v6 = vpop.f32.mrb[46].mxu1  ;;  %v1937_v22 = vunpack.c.l.bf16 %v4552_v17 }
 0x138   :  { %v4462_v2 = vand.u32 %v4409_v39, %v1433_v34  ;;  %v1361_v7 = vpop.f32.mrb[47].mxu0  ;;  %v4465_v25 = vand.u32 %v4409_v39, %v1435_v35  ;;  %v1409_v8 = vpop.f32.mrb[47].mxu1  ;;  %v1940_v34 = vunpack.c.l.bf16 %v4559_v20  ;;  %v1938_v35 = vunpack.c.l.bf16 %v4572_v55 }
 0x139   :  { %v4467_v3 = vpack.c.bf16 %v1361_v7, %v1358_v18  ;;  %v4469_v9 = vpack.c.bf16 %v1409_v8, %v1406_v23 }
 0x13c   :  { %3794 = vmatpush3.bf16.xpose.msra.mxu0 %v1807_v27 }
 0x13d   :  { %3802 = vmatpush3.bf16.xpose.msra.mxu1 %v1867_v28  ;;  %3807 = vmatprep.subr.bf16.mxu0 %v4389_v26 }
 0x13e   :  { %3815 = vmatprep.subr.bf16.mxu1 %v4393_v29 }
 0x143   :  { %3796 = vmatmul.mubr.msk.bf16.vlgmr.msra.gmra.mrb[60].mxu0 %vm1436_vm1, %v537_v32  ;;  %v1939_v32 = vunpack.c.h.bf16 %v4572_v55 }
 0x144   :  { %3804 = vmatmul.mubr.msk.bf16.vlgmr.msra.gmra.mrb[60].mxu1 %vm1436_vm1, %v539_v45  ;;  %3808 = vmatpush3.bf16.msra.mxu0 %v4389_v26  ;;  %v3360_v26 = vunpack.c.l.bf16 %v4499_v1 }
 0x145   :  { %3816 = vmatpush3.bf16.msra.mxu1 %v4393_v29  ;;  %3809 = vmatprep.subr.bf16.mxu0 %v2233_v44  ;;  %v1934_v29 = vunpack.c.l.bf16 %v4504_v53 }
 0x146   :  { %3817 = vmatprep.subr.bf16.mxu1 %v2290_v33 }
 0x148   :  { %3810 = vmatpush3.bf16.msra.mxu0 %v2233_v44 }
 0x149   :  { %3818 = vmatpush3.bf16.msra.mxu1 %v2290_v33  ;;  %3823 = vmatprep.subr.bf16.mxu0 %v4417_v63  ;;  %v3365_v33 = vunpack.c.h.bf16 %v4566_v54 }
 0x14a   :  { %3831 = vmatprep.subr.bf16.mxu1 %v4419_v43 }
 0x1e6   :  { %v3749_v36 = vpop.f32.mrb[48].mxu0  ;;  %v3757_v56 = vpop.f32.mrb[48].mxu1 }
 0x1e7   :  { %v4517_v39 = vadd.f32 %v3749_v36, %v1931_v19  ;;  %v1483_v60 = vpop.f32.mrb[49].mxu0  ;;  %v1543_v41 = vpop.f32.mrb[49].mxu1  ;;  %v4525_v42 = vadd.f32 %v3757_v56, %v1934_v29 }
 0x1e8   :  { %v4521_v61 = vadd.f32 %v3360_v26, %v1483_v60  ;;  %v3750_v57 = vpop.f32.mrb[50].mxu0  ;;  %v3758_v49 = vpop.f32.mrb[50].mxu1  ;;  %v4539_v12 = vadd.f32 %v1932_v48, %v1543_v41 }
 0x1e9   :  { %v1486_v58 = vpop.f32.mrb[51].mxu0  ;;  %v1973_v59 = vsel %vm1972_vm3, %v4517_v39, -inf  ;;  %v1546_v5 = vpop.f32.mrb[51].mxu1  ;;  %v1982_v14 = vsel %vm1972_vm3, %v4525_v42, -inf }
 0x1ea   :  { %v4532_v4 = vadd.f32 %v3361_v38, %v1486_v58  ;;  %1974 = vmax.xlane.f32.xlu1 %v1973_v59  ;;  %v1966_v11 = vsel %vm1965_vm4, %v4521_v61, -inf  ;;  %v4545_v15 = vadd.f32 %v1933_v10, %v1546_v5  ;;  %v1976_v47 = vsel %vm1965_vm4, %v4539_v12, -inf }
 0x1eb   :  { %1967 = vmax.xlane.f32.xlu0 %v1966_v11 }
 0x1ec   :  { %v1969_v16 = vsel %vm1965_vm4, %v4532_v4, -inf  ;;  %v1979_v21 = vsel %vm1965_vm4, %v4545_v15, -inf }
 0x1ee   :  { %1983 = vmax.xlane.f32.xlu1 %v1982_v14 }
 0x1ef   :  { %1970 = vmax.xlane.f32.xlu0 %v1969_v16 }
 0x1f2   :  { %1977 = vmax.xlane.f32.xlu1 %v1976_v47 }
 0x1f3   :  { %1980 = vmax.xlane.f32.xlu0 %v1979_v21 }
 0x1f6   :  { %v3765_v18 = vpop.f32.mrb[52].mxu0 }
 0x1f7   :  { %v4577_v23 = vadd.f32 %v3765_v18, %v1937_v22  ;;  %v3773_v24 = vpop.f32.mrb[52].mxu1  ;;  %v1603_v6 = vpop.f32.mrb[53].mxu0 }
 0x1f8   :  { %v4581_v7 = vadd.f32 %v3773_v24, %v1940_v34  ;;  %v1663_v8 = vpop.f32.mrb[53].mxu1  ;;  %v3766_v27 = vpop.f32.mrb[54].mxu0  ;;  %v4583_v28 = vadd.f32 %v3364_v51, %v1603_v6 }
 0x1f9   :  { %v3774_v30 = vpop.f32.mrb[54].mxu1  ;;  %v1606_v31 = vpop.f32.mrb[55].mxu0  ;;  %v1991_v44 = vsel %vm1972_vm3, %v4577_v23, -inf  ;;  %v4588_v45 = vadd.f32 %v1938_v35, %v1663_v8 }
 0x1fa   :  { %v1666_v36 = vpop.f32.mrb[55].mxu1  ;;  %v2000_v56 = vsel %vm1972_vm3, %v4581_v7, -inf  ;;  %1992 = vmax.xlane.f32.xlu0 %v1991_v44  ;;  %v1985_v41 = vsel %vm1965_vm4, %v4583_v28, -inf  ;;  %v4597_v57 = vadd.f32 %v3365_v33, %v1606_v31 }
 0x1fb   :  { %2001 = vmax.xlane.f32.xlu1 %v2000_v56  ;;  %v4593_v60 = vadd.f32 %v1939_v32, %v1666_v36  ;;  %v1994_v49 = vsel %vm1965_vm4, %v4588_v45, -inf }
 0x1fc   :  { %v1988_v59 = vsel %vm1965_vm4, %v4597_v57, -inf }
 0x1fd   :  { %v1997_v58 = vsel %vm1965_vm4, %v4593_v60, -inf }
 0x1fe   :  { %1986 = vmax.xlane.f32.xlu0 %v1985_v41 }
 0x1ff   :  { %1995 = vmax.xlane.f32.xlu1 %v1994_v49 }
 0x202   :  { %1998 = vmax.xlane.f32.xlu0 %v1997_v58 }
 0x203   :  { %1989 = vmax.xlane.f32.xlu1 %v1988_v59 }
 0x206   :  { %v3781_v5 = vpop.f32.mrb[56].mxu0 }
 0x207   :  { %v4607_v11 = vadd.f32 %v3781_v5, %v1931_v19  ;;  %v3789_v14 = vpop.f32.mrb[56].mxu1  ;;  %v1723_v16 = vpop.f32.mrb[57].mxu0 }
 0x208   :  { %v4611_v17 = vadd.f32 %v3789_v14, %v1934_v29  ;;  %v1783_v47 = vpop.f32.mrb[57].mxu1  ;;  %v3782_v21 = vpop.f32.mrb[58].mxu0  ;;  %v4615_v54 = vadd.f32 %v3360_v26, %v1723_v16 }
 0x209   :  { %v3790_v55 = vpop.f32.mrb[58].mxu1  ;;  %v1726_v18 = vpop.f32.mrb[59].mxu0  ;;  %v2009_v24 = vsel %vm1972_vm3, %v4607_v11, -inf  ;;  %v4621_v0 = vadd.f32 %v1932_v48, %v1783_v47 }
 0x20a   :  { %v1786_v19 = vpop.f32.mrb[59].mxu1  ;;  %v2018_v53 = vsel %vm1972_vm3, %v4611_v17, -inf  ;;  %2010 = vmax.xlane.f32.xlu0 %v2009_v24  ;;  %v2003_v26 = vsel %vm1965_vm4, %v4615_v54, -inf  ;;  %v4633_v6 = vadd.f32 %v3361_v38, %v1726_v18 }
 0x20b   :  { %2019 = vmax.xlane.f32.xlu1 %v2018_v53  ;;  %v4627_v29 = vadd.f32 %v1933_v10, %v1786_v19  ;;  %v2012_v48 = vsel %vm1965_vm4, %v4621_v0, -inf }
 0x20c   :  { %v2006_v37 = vsel %vm1965_vm4, %v4633_v6, -inf }
 0x20d   :  { %v2015_v8 = vsel %vm1965_vm4, %v4627_v29, -inf }
 0x20e   :  { %2004 = vmax.xlane.f32.xlu0 %v2003_v26 }
 0x20f   :  { %2013 = vmax.xlane.f32.xlu1 %v2012_v48 }
 0x212   :  { %2016 = vmax.xlane.f32.xlu0 %v2015_v8 }
 0x213   :  { %2007 = vmax.xlane.f32.xlu1 %v2006_v37 }
 0x216   :  { %v3797_v10 = vpop.f32.mrb[60].mxu0 }
 0x217   :  { %v4641_v27 = vadd.f32 %v3797_v10, %v1937_v22  ;;  %v3805_v30 = vpop.f32.mrb[60].mxu1  ;;  %v1843_v1 = vpop.f32.mrb[61].mxu0 }
 0x218   :  { %v1903_v38 = vpop.f32.mrb[61].mxu1  ;;  %v3798_v31 = vpop.f32.mrb[62].mxu0  ;;  %v4643_v44 = vadd.f32 %v3364_v51, %v1843_v1 }
 0x219   :  { %v4645_v36 = vadd.f32 %v1938_v35, %v1903_v38  ;;  %v3806_v56 = vpop.f32.mrb[62].mxu1  ;;  %v1846_v41 = vpop.f32.mrb[63].mxu0  ;;  %v2027_v49 = vsel %vm1972_vm3, %v4641_v27, -inf  ;;  %v4659_v35 = vadd.f32 %v3805_v30, %v1940_v34 }
 0x21a   :  { %v1906_v58 = vpop.f32.mrb[63].mxu1  ;;  %2028 = vmax.xlane.f32.xlu0 %v2027_v49  ;;  %v4649_v59 = vadd.f32 %v3365_v33, %v1846_v41  ;;  %v2021_v51 = vsel %vm1965_vm4, %v4643_v44, -inf }
 0x21b   :  { %v2030_v22 = vsel %vm1965_vm4, %v4645_v36, -inf  ;;  %v4653_v5 = vadd.f32 %v1939_v32, %v1906_v58  ;;  %v2036_v32 = vsel %vm1972_vm3, %v4659_v35, -inf }
 0x21c   :  { %2031 = vmax.xlane.f32.xlu1 %v2030_v22  ;;  %v2024_v14 = vsel %vm1965_vm4, %v4649_v59, -inf }
 0x21d   :  { %v2033_v33 = vsel %vm1965_vm4, %v4653_v5, -inf }
 0x21e   :  { %2022 = vmax.xlane.f32.xlu0 %v2021_v51 }
 0x220   :  { %2025 = vmax.xlane.f32.xlu1 %v2024_v14 }
 0x222   :  { %2034 = vmax.xlane.f32.xlu0 %v2033_v33 }
 0x224   :  { %2037 = vmax.xlane.f32.xlu1 %v2036_v32 }
 0x277   :  { %v1975_v16 = vpop.xlane.xlu1 %1974 }
 0x278   :  { %v2041_v47 = vsub.f32 %v4517_v39, %v1975_v16  ;;  %v1968_v21 = vpop.xlane.xlu0 %1967 }
 0x279   :  { %v2039_v20 = vsub.f32 %v4521_v61, %v1968_v21 }
 0x27a   :  { %v2067_v34 = vmul.f32 1.442695, %v2041_v47 }
 0x27b   :  { %v2063_v55 = vmul.f32 1.442695, %v2039_v20  ;;  %v1984_v18 = vpop.xlane.xlu1 %1983 }
 0x27c   :  { %3968 = vpow2.f32 %v2067_v34  ;;  %v2044_v24 = vsub.f32 %v4525_v42, %v1984_v18  ;;  %v1971_v19 = vpop.xlane.xlu0 %1970 }
 0x27d   :  { %v2040_v53 = vsub.f32 %v4532_v4, %v1971_v19  ;;  %3970 = vpow2.f32 %v2063_v55 }
 0x27e   :  { %v2073_v26 = vmul.f32 1.442695, %v2044_v24 }
 0x27f   :  { %v2065_v48 = vmul.f32 1.442695, %v2040_v53  ;;  %v1978_v8 = vpop.xlane.xlu1 %1977 }
 0x280   :  { %3972 = vpow2.f32 %v2073_v26  ;;  %v2042_v37 = vsub.f32 %v4539_v12, %v1978_v8  ;;  %v1981_v39 = vpop.xlane.xlu0 %1980 }
 0x281   :  { %3974 = vpow2.f32 %v2065_v48  ;;  %v2043_v61 = vsub.f32 %v4545_v15, %v1981_v39 }
 0x282   :  { %v2069_v10 = vmul.f32 1.442695, %v2042_v37 }
 0x283   :  { %v2071_v30 = vmul.f32 1.442695, %v2043_v61 }
 0x284   :  { %3976 = vpow2.f32 %v2069_v10 }
 0x285   :  { %3978 = vpow2.f32 %v2071_v30 }
 0x286   :  { %v3969_v1 = vpop.eup %3968 }
 0x287   :  { %v2112_v42 = vpack.c.bf16 %v3969_v1, %v3969_v1  ;;  %v1993_v38 = vpop.xlane.xlu0 %1992  ;;  %v3971_v56 = vpop.eup %3970 }
 0x288   :  { %v2002_v31 = vpop.xlane.xlu1 %2001  ;;  %v2047_v4 = vsub.f32 %v4577_v23, %v1993_v38 }
 0x289   :  { %v2050_v41 = vsub.f32 %v4581_v7, %v2002_v31  ;;  %v2129_v49 = vunpack.c.l.bf16 %v2112_v42 }
 0x28a   :  { %v3973_v58 = vpop.eup %3972  ;;  %v2079_v12 = vmul.f32 1.442695, %v2047_v4 }
 0x28b   :  { %v3975_v22 = vpop.eup %3974  ;;  %v2114_v51 = vpack.c.bf16 %v3973_v58, %v3973_v58  ;;  %v2085_v14 = vmul.f32 1.442695, %v2050_v41  ;;  %v1987_v15 = vpop.xlane.xlu0 %1986  ;;  %v2157_v33 = vsel %vm1972_vm3, %v2129_v49, 0.0 }
 0x28c   :  { %3980 = vpow2.f32 %v2079_v12  ;;  %v1996_v32 = vpop.xlane.xlu1 %1995  ;;  %v2045_v16 = vsub.f32 %v4583_v28, %v1987_v15  ;;  %2158 = vadd.xlane.f32.xlu0 %v2157_v33  ;;  %v2111_v47 = vpack.c.bf16 %v3975_v22, %v3971_v56 }
 0x28d   :  { %3982 = vpow2.f32 %v2085_v14  ;;  %v2048_v23 = vsub.f32 %v4588_v45, %v1996_v32  ;;  %v2132_v21 = vunpack.c.l.bf16 %v2114_v51 }
 0x28e   :  { %v3977_v7 = vpop.eup %3976  ;;  %v2075_v20 = vmul.f32 1.442695, %v2045_v16  ;;  %3811 = vmatprep.mubr.msk.bf16.mxu0 %vm1965_vm4, %v2111_v47  ;;  %v2127_v34 = vunpack.c.l.bf16 %v2111_v47  ;;  %v2128_v8 = vunpack.c.h.bf16 %v2111_v47 }
 0x28f   :  { %v3979_v55 = vpop.eup %3978  ;;  %v2081_v18 = vmul.f32 1.442695, %v2048_v23  ;;  %v1999_v24 = vpop.xlane.xlu0 %1998  ;;  %3812 = vmatmul.mubr.msk.bf16.vlgmr.msra.gmra.mrb[64].mxu0 %vm1965_vm4, %v2112_v42  ;;  %v2166_v19 = vsel %vm1972_vm3, %v2132_v21, 0.0 }
 0x290   :  { %v2049_v28 = vsub.f32 %v4593_v60, %v1999_v24  ;;  %v1990_v53 = vpop.xlane.xlu1 %1989  ;;  %3824 = vmatpush3.bf16.msra.mxu0 %v4417_v63  ;;  %2167 = vadd.xlane.f32.xlu1 %v2166_v19  ;;  %v2151_v45 = vsel %vm1965_vm4, %v2127_v34, 0.0  ;;  %v2113_v26 = vpack.c.bf16 %v3979_v55, %v3977_v7  ;;  %3984 = vpow2.f32 %v2075_v20 }
 0x291   :  { %v2046_v48 = vsub.f32 %v4597_v57, %v1990_v53  ;;  %3825 = vmatprep.subr.bf16.mxu0 %v4412_v40  ;;  %2152 = vadd.xlane.f32.xlu0 %v2151_v45  ;;  %3986 = vpow2.f32 %v2081_v18  ;;  %v2154_v57 = vsel %vm1965_vm4, %v2128_v8, 0.0 }
 0x292   :  { %v2083_v37 = vmul.f32 1.442695, %v2049_v28  ;;  %3819 = vmatprep.mubr.msk.bf16.mxu1 %vm1965_vm4, %v2113_v26  ;;  %v2131_v39 = vunpack.c.h.bf16 %v2113_v26  ;;  %v2130_v61 = vunpack.c.l.bf16 %v2113_v26 }
 0x293   :  { %v2077_v60 = vmul.f32 1.442695, %v2046_v48  ;;  %3820 = vmatmul.mubr.msk.bf16.vlgmr.msra.gmra.mrb[64].mxu1 %vm1965_vm4, %v2114_v51 }
 0x294   :  { %3988 = vpow2.f32 %v2083_v37  ;;  %3826 = vmatpush3.bf16.msra.mxu0 %v4412_v40  ;;  %3832 = vmatpush3.bf16.msra.mxu1 %v4419_v43  ;;  %v2163_v63 = vsel %vm1965_vm4, %v2131_v39, 0.0  ;;  %v2160_v4 = vsel %vm1965_vm4, %v2130_v61, 0.0 }
 0x295   :  { %3990 = vpow2.f32 %v2077_v60  ;;  %3833 = vmatprep.subr.bf16.mxu1 %v4415_v62  ;;  %3839 = vmatprep.subr.bf16.mxu0 %v4435_v50 }
 0x296   :  { %v3981_v10 = vpop.eup %3980  ;;  %2155 = vadd.xlane.f32.xlu1 %v2154_v57  ;;  %2164 = vadd.xlane.f32.xlu0 %v2163_v63 }
 0x297   :  { %v3983_v30 = vpop.eup %3982  ;;  %v2116_v1 = vpack.c.bf16 %v3981_v10, %v3981_v10  ;;  %v2011_v42 = vpop.xlane.xlu0 %2010 }
 0x298   :  { %v2118_v38 = vpack.c.bf16 %v3983_v30, %v3983_v30  ;;  %3834 = vmatpush3.bf16.msra.mxu1 %v4415_v62  ;;  %v2020_v40 = vpop.xlane.xlu1 %2019  ;;  %v2053_v43 = vsub.f32 %v4607_v11, %v2011_v42 }
 0x299   :  { %v2056_v31 = vsub.f32 %v4611_v17, %v2020_v40  ;;  %3847 = vmatprep.subr.bf16.mxu1 %v4439_v52  ;;  %v2135_v56 = vunpack.c.l.bf16 %v2116_v1 }
 0x29a   :  { %v2091_v41 = vmul.f32 1.442695, %v2053_v43  ;;  %2161 = vadd.xlane.f32.xlu1 %v2160_v4  ;;  %v2138_v49 = vunpack.c.l.bf16 %v2118_v38  ;;  %v3985_v51 = vpop.eup %3984 }
 0x29b   :  { %v2097_v58 = vmul.f32 1.442695, %v2056_v31  ;;  %v2005_v12 = vpop.xlane.xlu0 %2004  ;;  %v2175_v22 = vsel %vm1972_vm3, %v2135_v56, 0.0  ;;  %v3987_v17 = vpop.eup %3986 }
 0x29c   :  { %3992 = vpow2.f32 %v2091_v41  ;;  %v2014_v62 = vpop.xlane.xlu1 %2013  ;;  %v2051_v14 = vsub.f32 %v4615_v54, %v2005_v12  ;;  %2176 = vadd.xlane.f32.xlu0 %v2175_v22  ;;  %v2184_v11 = vsel %vm1972_vm3, %v2138_v49, 0.0 }
 0x29d   :  { %3994 = vpow2.f32 %v2097_v58  ;;  %v2054_v15 = vsub.f32 %v4621_v0, %v2014_v62 }
 0x29e   :  { %v3989_v33 = vpop.eup %3988  ;;  %v2087_v32 = vmul.f32 1.442695, %v2051_v14  ;;  %2185 = vadd.xlane.f32.xlu1 %v2184_v11 }
 0x29f   :  { %v3991_v16 = vpop.eup %3990  ;;  %v2093_v47 = vmul.f32 1.442695, %v2054_v15  ;;  %v2017_v23 = vpop.xlane.xlu0 %2016  ;;  %v2117_v21 = vpack.c.bf16 %v3989_v33, %v3987_v17 }
 0x2a0   :  { %v2055_v7 = vsub.f32 %v4627_v29, %v2017_v23  ;;  %v2008_v20 = vpop.xlane.xlu1 %2007  ;;  %v2115_v34 = vpack.c.bf16 %v3991_v16, %v3985_v51  ;;  %3996 = vpow2.f32 %v2087_v32 }
 0x2a1   :  { %v2052_v54 = vsub.f32 %v4633_v6, %v2008_v20  ;;  %3835 = vmatprep.mubr.msk.bf16.mxu1 %vm1965_vm4, %v2117_v21  ;;  %3998 = vpow2.f32 %v2093_v47  ;;  %v2137_v19 = vunpack.c.h.bf16 %v2117_v21  ;;  %v2136_v28 = vunpack.c.l.bf16 %v2117_v21 }
 0x2a2   :  { %v2095_v55 = vmul.f32 1.442695, %v2055_v7  ;;  %3827 = vmatprep.mubr.msk.bf16.mxu0 %vm1965_vm4, %v2115_v34  ;;  %3836 = vmatmul.mubr.msk.bf16.vlgmr.msra.gmra.mrb[68].mxu1 %vm1965_vm4, %v2118_v38  ;;  %v2133_v0 = vunpack.c.l.bf16 %v2115_v34  ;;  %v2134_v18 = vunpack.c.h.bf16 %v2115_v34 }
 0x2a3   :  { %v2089_v24 = vmul.f32 1.442695, %v2052_v54  ;;  %3828 = vmatmul.mubr.msk.bf16.vlgmr.msra.gmra.mrb[68].mxu0 %vm1965_vm4, %v2116_v1  ;;  %3848 = vmatpush3.bf16.msra.mxu1 %v4439_v52  ;;  %v2181_v8 = vsel %vm1965_vm4, %v2137_v19, 0.0  ;;  %v2178_v39 = vsel %vm1965_vm4, %v2136_v28, 0.0 }
 0x2a4   :  { %4000 = vpow2.f32 %v2095_v55  ;;  %3840 = vmatpush3.bf16.msra.mxu0 %v4435_v50  ;;  %3849 = vmatprep.subr.bf16.mxu1 %v4433_v46  ;;  %v2169_v29 = vsel %vm1965_vm4, %v2133_v0, 0.0  ;;  %v2172_v6 = vsel %vm1965_vm4, %v2134_v18, 0.0 }
 0x2a5   :  { %4002 = vpow2.f32 %v2089_v24  ;;  %3841 = vmatprep.subr.bf16.mxu0 %v4428_v13  ;;  %2170 = vadd.xlane.f32.xlu0 %v2169_v29 }
 0x2a6   :  { %v3993_v53 = vpop.eup %3992  ;;  %2173 = vadd.xlane.f32.xlu1 %v2172_v6 }
 0x2a7   :  { %v3995_v45 = vpop.eup %3994  ;;  %v2120_v26 = vpack.c.bf16 %v3993_v53, %v3993_v53  ;;  %3850 = vmatpush3.bf16.msra.mxu1 %v4433_v46  ;;  %v2029_v52 = vpop.xlane.xlu0 %2028  ;;  %v4756_v53 = vld [vmem:[%s4859_s2] sm:$0xf] }
 0x2a8   :  { %v2122_v50 = vpack.c.bf16 %v3995_v45, %v3995_v45  ;;  %3842 = vmatpush3.bf16.msra.mxu0 %v4428_v13  ;;  %3863 = vmatprep.subr.bf16.mxu1 %v4469_v9  ;;  %v2059_v48 = vsub.f32 %v4641_v27, %v2029_v52  ;;  %v4762_v45 = vsel %vm2756_vm5, %v4756_v53, 0 }
 0x2a9   :  { %3855 = vmatprep.subr.bf16.mxu0 %v4467_v3  ;;  %v2032_v37 = vpop.xlane.xlu1 %2031  ;;  %2182 = vadd.xlane.f32.xlu0 %v2181_v8  ;;  %v2141_v60 = vunpack.c.l.bf16 %v2120_v26 }
 0x2aa   :  { %v2103_v63 = vmul.f32 1.442695, %v2059_v48  ;;  %2179 = vadd.xlane.f32.xlu1 %v2178_v39  ;;  %v2144_v46 = vunpack.c.l.bf16 %v2122_v50  ;;  %v2060_v57 = vsub.f32 %v4645_v36, %v2032_v37  ;;  %v3997_v10 = vpop.eup %3996  ;;  %v4785_v48 = vld [vmem:[%s4859_s2 + $0xc] sm:$0xf] }
 0x2ab   :  { %v2023_v61 = vpop.xlane.xlu0 %2022  ;;  %v2193_v13 = vsel %vm1972_vm3, %v2141_v60, 0.0  ;;  %v3999_v1 = vpop.eup %3998 }
 0x2ac   :  { %4004 = vpow2.f32 %v2103_v63  ;;  %v2057_v27 = vsub.f32 %v4643_v44, %v2023_v61  ;;  %v2202_v30 = vsel %vm1972_vm3, %v2144_v46, 0.0  ;;  %v2105_v4 = vmul.f32 1.442695, %v2060_v57 }
 0x2ad   :  { %2194 = vadd.xlane.f32.xlu0 %v2193_v13  ;;  %v2026_v42 = vpop.xlane.xlu1 %2025 }
 0x2ae   :  { %v4001_v38 = vpop.eup %4000  ;;  %v2099_v40 = vmul.f32 1.442695, %v2057_v27  ;;  %2203 = vadd.xlane.f32.xlu1 %v2202_v30  ;;  %v2058_v43 = vsub.f32 %v4649_v59, %v2026_v42 }
 0x2af   :  { %v4003_v31 = vpop.eup %4002  ;;  %v2035_v36 = vpop.xlane.xlu0 %2034  ;;  %v2121_v56 = vpack.c.bf16 %v4001_v38, %v3999_v1 }
 0x2b0   :  { %4006 = vpow2.f32 %v2099_v40  ;;  %v2101_v41 = vmul.f32 1.442695, %v2058_v43  ;;  %v2061_v49 = vsub.f32 %v4653_v5, %v2035_v36  ;;  %v2119_v58 = vpack.c.bf16 %v4003_v31, %v3997_v10 }
 0x2b1   :  { %v2038_v44 = vpop.xlane.xlu1 %2037  ;;  %3851 = vmatprep.mubr.msk.bf16.mxu1 %vm1965_vm4, %v2121_v56  ;;  %v2142_v11 = vunpack.c.l.bf16 %v2121_v56 }
 0x2b2   :  { %4008 = vpow2.f32 %v2101_v41  ;;  %v2107_v12 = vmul.f32 1.442695, %v2061_v49  ;;  %v2062_v22 = vsub.f32 %v4659_v35, %v2038_v44  ;;  %3843 = vmatprep.mubr.msk.bf16.mxu0 %vm1965_vm4, %v2119_v58  ;;  %3852 = vmatmul.mubr.msk.bf16.vlgmr.msra.gmra.mrb[72].mxu1 %vm1965_vm4, %v2122_v50  ;;  %v2139_v59 = vunpack.c.l.bf16 %v2119_v58  ;;  %v4780_v50 = vld [vmem:[%s4859_s2 + $0x8] sm:$0xf] }
 0x2b3   :  { %4010 = vpow2.f32 %v2105_v4  ;;  %3844 = vmatmul.mubr.msk.bf16.vlgmr.msra.gmra.mrb[72].mxu0 %vm1965_vm4, %v2120_v26  ;;  %3864 = vmatpush3.bf16.msra.mxu1 %v4469_v9  ;;  %v2140_v51 = vunpack.c.h.bf16 %v2119_v58  ;;  %v2143_v35 = vunpack.c.h.bf16 %v2121_v56  ;;  %v2196_v15 = vsel %vm1965_vm4, %v2142_v11, 0.0  ;;  %v4768_v26 = vld [vmem:[%s4859_s2 + $0x4] sm:$0xf] }
 0x2b4   :  { %4012 = vpow2.f32 %v2107_v12  ;;  %v2109_v5 = vmul.f32 1.442695, %v2062_v22  ;;  %3856 = vmatpush3.bf16.msra.mxu0 %v4467_v3  ;;  %3865 = vmatprep.subr.bf16.mxu1 %v4465_v25  ;;  %v2187_v62 = vsel %vm1965_vm4, %v2139_v59, 0.0  ;;  %v4774_v52 = vsel %vm2756_vm5, %v4768_v26, 0 }
 0x2b5   :  { %3857 = vmatprep.subr.bf16.mxu0 %v4462_v2  ;;  %2188 = vadd.xlane.f32.xlu0 %v2187_v62  ;;  %v2190_v14 = vsel %vm1965_vm4, %v2140_v51, 0.0  ;;  %v2199_v3 = vsel %vm1965_vm4, %v2143_v35, 0.0  ;;  %v4793_v35 = vsel %vm2756_vm5, %v4780_v50, 0 }
 0x2b6   :  { %v4005_v17 = vpop.eup %4004  ;;  %4014 = vpow2.f32 %v2109_v5  ;;  %2191 = vadd.xlane.f32.xlu1 %v2190_v14 }
 0x2b7   :  { %v2124_v9 = vpack.c.bf16 %v4005_v17, %v4005_v17  ;;  %3866 = vmatpush3.bf16.msra.mxu1 %v4465_v25 }
 0x2b8   :  { %3858 = vmatpush3.bf16.msra.mxu0 %v4462_v2  ;;  %3936 = vmatprep.subr.msk.bf16.mxu1 %vm2756_vm5, %v4768_v26 }
 0x2b9   :  { %2200 = vadd.xlane.f32.xlu0 %v2199_v3  ;;  %v2147_v33 = vunpack.c.l.bf16 %v2124_v9  ;;  %3935 = vmatprep.subr.msk.bf16.mxu0 %vm2756_vm5, %v4756_v53 }
 0x2ba   :  { %v4007_v32 = vpop.eup %4006  ;;  %2197 = vadd.xlane.f32.xlu1 %v2196_v15 }
 0x2bb   :  { %v2211_v16 = vsel %vm1972_vm3, %v2147_v33, 0.0  ;;  %v4800_v33 = vsel %vm2756_vm5, %v4785_v48, 0 }
 0x2bc   :  { %v4009_v47 = vpop.eup %4008 }
 0x2bd   :  { %v4011_v23 = vpop.eup %4010  ;;  %2212 = vadd.xlane.f32.xlu0 %v2211_v16  ;;  %v2123_v21 = vpack.c.bf16 %v4009_v47, %v4007_v32 }
 0x2be   :  { %v4013_v7 = vpop.eup %4012 }
 0x2bf   :  { %3859 = vmatprep.mubr.msk.bf16.mxu0 %vm1965_vm4, %v2123_v21  ;;  %v2125_v25 = vpack.c.bf16 %v4013_v7, %v4011_v23  ;;  %v2146_v20 = vunpack.c.h.bf16 %v2123_v21  ;;  %v2145_v2 = vunpack.c.l.bf16 %v2123_v21 }
 0x2c0   :  { %v4015_v34 = vpop.eup %4014  ;;  %3860 = vmatmul.mubr.msk.bf16.vlgmr.msra.gmra.mrb[76].mxu0 %vm1965_vm4, %v2124_v9 }
 0x2c1   :  { %v2126_v54 = vpack.c.bf16 %v4015_v34, %v4015_v34  ;;  %3867 = vmatprep.mubr.msk.bf16.mxu1 %vm1965_vm4, %v2125_v25  ;;  %v2208_v55 = vsel %vm1965_vm4, %v2146_v20, 0.0  ;;  %v2205_v0 = vsel %vm1965_vm4, %v2145_v2, 0.0  ;;  %v2148_v18 = vunpack.c.l.bf16 %v2125_v25  ;;  %3872 = vmatpush3.bf16.msra.mxu0 %v4762_v45 }
 0x2c2   :  { %2209 = vadd.xlane.f32.xlu1 %v2208_v55  ;;  %2206 = vadd.xlane.f32.xlu0 %v2205_v0  ;;  %v2149_v24 = vunpack.c.h.bf16 %v2125_v25 }
 0x2c3   :  { %3868 = vmatmul.mubr.msk.bf16.vlgmr.msra.gmra.mrb[76].mxu1 %vm1965_vm4, %v2126_v54  ;;  %v2214_v29 = vsel %vm1965_vm4, %v2148_v18, 0.0  ;;  %v2150_v19 = vunpack.c.l.bf16 %v2126_v54  ;;  %3937 = vmatprep.subr.msk.bf16.mxu0 %vm2756_vm5, %v4780_v50 }
 0x2c4   :  { %v2217_v6 = vsel %vm1965_vm4, %v2149_v24, 0.0  ;;  %3878 = vmatpush3.bf16.msra.mxu1 %v4774_v52 }
 0x2c5   :  { %v2220_v28 = vsel %vm1972_vm3, %v2150_v19, 0.0  ;;  %3938 = vmatprep.subr.msk.bf16.mxu1 %vm2756_vm5, %v4785_v48 }
 0x2c6   :  { %2215 = vadd.xlane.f32.xlu1 %v2214_v29  ;;  %2218 = vadd.xlane.f32.xlu0 %v2217_v6 }
 0x2ca   :  { %2221 = vadd.xlane.f32.xlu1 %v2220_v28 }
 0x319   :  { %v2159_v8 = vpop.xlane.xlu0 %2158 }
 0x31a   :  { %4016 = vrcp.f32 %v2159_v8 }
 0x31d   :  { %v2168_v37 = vpop.xlane.xlu1 %2167 }
 0x31e   :  { %v2153_v39 = vpop.xlane.xlu0 %2152 }
 0x31f   :  { %4018 = vrcp.f32 %v2153_v39 }
 0x323   :  { %v2156_v60 = vpop.xlane.xlu1 %2155  ;;  %v2165_v63 = vpop.xlane.xlu0 %2164 }
 0x324   :  { %4020 = vrcp.f32 %v2156_v60  ;;  %v4017_v27 = vpop.eup %4016 }
 0x325   :  { %4022 = vrcp.f32 %v2168_v37 }
 0x326   :  { %4024 = vrcp.f32 %v2165_v63 }
 0x327   :  { %v2162_v46 = vpop.xlane.xlu1 %2161 }
 0x328   :  { %4026 = vrcp.f32 %v2162_v46 }
 0x329   :  { %v2177_v57 = vpop.xlane.xlu0 %2176  ;;  %v4019_v1 = vpop.eup %4018 }
 0x32a   :  { %4028 = vrcp.f32 %v2177_v57 }
 0x32b   :  { %v2186_v13 = vpop.xlane.xlu1 %2185 }
 0x32c   :  { %4030 = vrcp.f32 %v2186_v13 }
 0x32e   :  { %v4021_v40 = vpop.eup %4020 }
 0x32f   :  { %v4023_v49 = vpop.eup %4022 }
 0x330   :  { %v4025_v44 = vpop.eup %4024 }
 0x332   :  { %v2171_v61 = vpop.xlane.xlu0 %2170  ;;  %v4027_v59 = vpop.eup %4026 }
 0x333   :  { %v2174_v42 = vpop.xlane.xlu1 %2173  ;;  %4032 = vrcp.f32 %v2171_v61 }
 0x334   :  { %v4029_v47 = vpop.eup %4028 }
 0x336   :  { %v2183_v43 = vpop.xlane.xlu0 %2182  ;;  %v4031_v21 = vpop.eup %4030 }
 0x337   :  { %v2180_v14 = vpop.xlane.xlu1 %2179  ;;  %4034 = vrcp.f32 %v2183_v43 }
 0x338   :  { %4036 = vrcp.f32 %v2180_v14 }
 0x339   :  { %4038 = vrcp.f32 %v2174_v42 }
 0x33a   :  { %v2195_v9 = vpop.xlane.xlu0 %2194 }
 0x33b   :  { %v2204_v16 = vpop.xlane.xlu1 %2203  ;;  %4040 = vrcp.f32 %v2195_v9 }
 0x33c   :  { %4042 = vrcp.f32 %v2204_v16 }
 0x33d   :  { %v4033_v20 = vpop.eup %4032 }
 0x341   :  { %v4035_v54 = vpop.eup %4034 }
 0x342   :  { %v2189_v32 = vpop.xlane.xlu0 %2188  ;;  %v4037_v18 = vpop.eup %4036 }
 0x343   :  { %v2192_v23 = vpop.xlane.xlu1 %2191  ;;  %v4039_v19 = vpop.eup %4038  ;;  %4044 = vrcp.f32 %v2189_v32 }
 0x346   :  { %v2201_v7 = vpop.xlane.xlu0 %2200 }
 0x347   :  { %v2198_v60 = vpop.xlane.xlu1 %2197  ;;  %4046 = vrcp.f32 %v2201_v7 }
 0x348   :  { %4048 = vrcp.f32 %v2198_v60 }
 0x349   :  { %4050 = vrcp.f32 %v2192_v23 }
 0x34a   :  { %v2213_v13 = vpop.xlane.xlu0 %2212 }
 0x34b   :  { %4052 = vrcp.f32 %v2213_v13 }
 0x362   :  { %v3813_v10 = vpop.f32.mrb[64].mxu0 }
 0x363   :  { %v2269_v30 = vpop.f32.mrb[65].mxu0  ;;  %v2708_v31 = vmul.f32 %v4017_v27, %v3813_v10  ;;  %v2210_v10 = vpop.xlane.xlu1 %2209 }
 0x364   :  { %v3814_v38 = vpop.f32.mrb[66].mxu0  ;;  %v2706_v36 = vmul.f32 %v4019_v1, %v2269_v30  ;;  %v4041_v27 = vpop.eup %4040 }
 0x365   :  { %v2272_v4 = vpop.f32.mrb[67].mxu0  ;;  %v2731_v51 = vpack.c.bf16 %v2708_v31, %v2708_v31  ;;  %v2207_v30 = vpop.xlane.xlu0 %2206 }
 0x366   :  { %v2707_v56 = vmul.f32 %v4021_v40, %v2272_v4  ;;  %v3821_v41 = vpop.f32.mrb[64].mxu1  ;;  %v4043_v1 = vpop.eup %4042  ;;  %4054 = vrcp.f32 %v2207_v30 }
 0x367   :  { %v2326_v58 = vpop.f32.mrb[65].mxu1  ;;  %v2711_v5 = vmul.f32 %v4023_v49, %v3821_v41  ;;  %v2216_v42 = vpop.xlane.xlu1 %2215  ;;  %4056 = vrcp.f32 %v2210_v10 }
 0x368   :  { %v2730_v12 = vpack.c.bf16 %v2707_v56, %v2706_v36  ;;  %v3822_v22 = vpop.f32.mrb[66].mxu1  ;;  %v2709_v11 = vmul.f32 %v4027_v59, %v2326_v58  ;;  %v4045_v40 = vpop.eup %4044 }
 0x369   :  { %v2329_v62 = vpop.f32.mrb[67].mxu1  ;;  %v2733_v15 = vpack.c.bf16 %v2711_v5, %v2711_v5  ;;  %v4047_v4 = vpop.eup %4046 }
 0x36a   :  { %v2710_v17 = vmul.f32 %v4025_v44, %v2329_v62  ;;  %3873 = vmatprep.mubr.msk.bf16.mxu0 %vm1436_vm1, %v2730_v12  ;;  %v2219_v22 = vpop.xlane.xlu0 %2218 }
 0x36b   :  { %3874 = vmatmul.mubr.msk.bf16.vlgmr.msra.gmra.mrb[80].mxu0 %vm1436_vm1, %v2731_v51  ;;  %v2222_v5 = vpop.xlane.xlu1 %2221  ;;  %4058 = vrcp.f32 %v2219_v22 }
 0x36c   :  { %v2732_v3 = vpack.c.bf16 %v2710_v17, %v2709_v11  ;;  %3884 = vmatpush3.bf16.msra.mxu0 %v4793_v35  ;;  %4060 = vrcp.f32 %v2222_v5 }
 0x36d   :  { %3939 = vmatprep.subr.msk.bf16.mxu0 %vm2756_vm5, %v4756_v53  ;;  %4062 = vrcp.f32 %v2216_v42 }
 0x36e   :  { %3879 = vmatprep.mubr.msk.bf16.mxu1 %vm1436_vm1, %v2732_v3 }
 0x36f   :  { %3880 = vmatmul.mubr.msk.bf16.vlgmr.msra.gmra.mrb[80].mxu1 %vm1436_vm1, %v2733_v15 }
 0x370   :  { %3890 = vmatpush3.bf16.msra.mxu1 %v4800_v33 }
 0x371   :  { %3940 = vmatprep.subr.msk.bf16.mxu1 %vm2756_vm5, %v4768_v26 }
 0x375   :  { %v3837_v25 = vpop.f32.mrb[68].mxu1 }
 0x376   :  { %v3829_v2 = vpop.f32.mrb[68].mxu0  ;;  %v2440_v34 = vpop.f32.mrb[69].mxu1  ;;  %v2717_v24 = vmul.f32 %v4031_v21, %v3837_v25 }
 0x377   :  { %v2383_v55 = vpop.f32.mrb[69].mxu0  ;;  %v3838_v0 = vpop.f32.mrb[70].mxu1  ;;  %v2714_v28 = vmul.f32 %v4029_v47, %v3829_v2  ;;  %v2715_v53 = vmul.f32 %v4037_v18, %v2440_v34 }
 0x378   :  { %v3830_v29 = vpop.f32.mrb[70].mxu0  ;;  %v2443_v6 = vpop.f32.mrb[71].mxu1  ;;  %v2712_v37 = vmul.f32 %v4033_v20, %v2383_v55  ;;  %v2737_v46 = vpack.c.bf16 %v2717_v24, %v2717_v24 }
 0x379   :  { %v2386_v8 = vpop.f32.mrb[71].mxu0  ;;  %v2716_v26 = vmul.f32 %v4035_v54, %v2443_v6  ;;  %v2735_v61 = vpack.c.bf16 %v2714_v28, %v2714_v28 }
 0x37a   :  { %v2713_v39 = vmul.f32 %v4039_v19, %v2386_v8 }
 0x37b   :  { %v2736_v63 = vpack.c.bf16 %v2716_v26, %v2715_v53 }
 0x37c   :  { %v2734_v57 = vpack.c.bf16 %v2713_v39, %v2712_v37 }
 0x37d   :  { %3891 = vmatprep.mubr.msk.bf16.mxu1 %vm1436_vm1, %v2736_v63 }
 0x37e   :  { %3885 = vmatprep.mubr.msk.bf16.mxu0 %vm1436_vm1, %v2734_v57  ;;  %3892 = vmatmul.mubr.msk.bf16.vlgmr.msra.gmra.mrb[84].mxu1 %vm1436_vm1, %v2737_v46 }
 0x37f   :  { %3886 = vmatmul.mubr.msk.bf16.vlgmr.msra.gmra.mrb[84].mxu0 %vm1436_vm1, %v2735_v61  ;;  %3902 = vmatpush3.bf16.msra.mxu1 %v4774_v52  ;;  %v4049_v52 = vpop.eup %4048 }
 0x380   :  { %3896 = vmatpush3.bf16.msra.mxu0 %v4762_v45  ;;  %3942 = vmatprep.subr.msk.bf16.mxu1 %vm2756_vm5, %v4785_v48  ;;  %v4051_v58 = vpop.eup %4050 }
 0x381   :  { %3941 = vmatprep.subr.msk.bf16.mxu0 %vm2756_vm5, %v4780_v50  ;;  %v4053_v3 = vpop.eup %4052 }
 0x382   :  { %v4055_v32 = vpop.eup %4054 }
 0x383   :  { %v4057_v47 = vpop.eup %4056 }
 0x384   :  { %v4059_v25 = vpop.eup %4058 }
 0x385   :  { %v3853_v38 = vpop.f32.mrb[72].mxu1  ;;  %v4061_v54 = vpop.eup %4060 }
 0x386   :  { %v3845_v43 = vpop.f32.mrb[72].mxu0  ;;  %v2554_v31 = vpop.f32.mrb[73].mxu1  ;;  %v2723_v41 = vmul.f32 %v4043_v1, %v3853_v38 }
 0x387   :  { %v2497_v36 = vpop.f32.mrb[73].mxu0  ;;  %v3854_v56 = vpop.f32.mrb[74].mxu1  ;;  %v2720_v48 = vmul.f32 %v4041_v27, %v3845_v43  ;;  %v2721_v44 = vmul.f32 %v4049_v52, %v2554_v31 }
 0x388   :  { %v3846_v45 = vpop.f32.mrb[74].mxu0  ;;  %v2557_v49 = vpop.f32.mrb[75].mxu1  ;;  %v2718_v59 = vmul.f32 %v4045_v40, %v2497_v36  ;;  %v2741_v14 = vpack.c.bf16 %v2723_v41, %v2723_v41  ;;  %v3357_v40 = vld [vmem:[%s4860_s3] ss:$0 sm:$0xff] }
 0x389   :  { %v2500_v12 = vpop.f32.mrb[75].mxu0  ;;  %v2722_v50 = vmul.f32 %v4047_v4, %v2557_v49  ;;  %v2739_v17 = vpack.c.bf16 %v2720_v48, %v2720_v48  ;;  %v4063_v0 = vpop.eup %4062 }
 0x38a   :  { %v2719_v51 = vmul.f32 %v4051_v58, %v2500_v12 }
 0x38b   :  { %v2740_v62 = vpack.c.bf16 %v2722_v50, %v2721_v44 }
 0x38c   :  { %v2738_v11 = vpack.c.bf16 %v2719_v51, %v2718_v59 }
 0x38d   :  { %3903 = vmatprep.mubr.msk.bf16.mxu1 %vm1436_vm1, %v2740_v62 }
 0x38e   :  { %3897 = vmatprep.mubr.msk.bf16.mxu0 %vm1436_vm1, %v2738_v11  ;;  %3904 = vmatmul.mubr.msk.bf16.vlgmr.msra.gmra.mrb[88].mxu1 %vm1436_vm1, %v2741_v14 }
 0x38f   :  { %3898 = vmatmul.mubr.msk.bf16.vlgmr.msra.gmra.mrb[88].mxu0 %vm1436_vm1, %v2739_v17  ;;  %3914 = vmatpush3.bf16.msra.mxu1 %v4800_v33 }
 0x390   :  { %3908 = vmatpush3.bf16.msra.mxu0 %v4793_v35 }
 0x393   :  { %v3861_v9 = vpop.f32.mrb[76].mxu0 }
 0x394   :  { %v2611_v15 = vpop.f32.mrb[77].mxu0  ;;  %v2726_v23 = vmul.f32 %v4053_v3, %v3861_v9 }
 0x395   :  { %v3862_v16 = vpop.f32.mrb[78].mxu0  ;;  %v2724_v20 = vmul.f32 %v4055_v32, %v2611_v15 }
 0x396   :  { %v2614_v21 = vpop.f32.mrb[79].mxu0  ;;  %v3869_v7 = vpop.f32.mrb[76].mxu1  ;;  %v2743_v35 = vpack.c.bf16 %v2726_v23, %v2726_v23 }
 0x397   :  { %v2725_v2 = vmul.f32 %v4057_v47, %v2614_v21  ;;  %v2668_v34 = vpop.f32.mrb[77].mxu1  ;;  %v2729_v33 = vmul.f32 %v4061_v54, %v3869_v7 }
 0x398   :  { %v3870_v55 = vpop.f32.mrb[78].mxu1  ;;  %v2727_v29 = vmul.f32 %v4063_v0, %v2668_v34 }
 0x399   :  { %v2742_v18 = vpack.c.bf16 %v2725_v2, %v2724_v20  ;;  %v2671_v24 = vpop.f32.mrb[79].mxu1  ;;  %v2745_v28 = vpack.c.bf16 %v2729_v33, %v2729_v33 }
 0x39a   :  { %v2728_v6 = vmul.f32 %v4059_v25, %v2671_v24 }
 0x39b   :  { %3909 = vmatprep.mubr.msk.bf16.mxu0 %vm1436_vm1, %v2742_v18 }
 0x39c   :  { %v2744_v19 = vpack.c.bf16 %v2728_v6, %v2727_v29  ;;  %3910 = vmatmul.mubr.msk.bf16.vlgmr.msra.gmra.mrb[92].mxu0 %vm1436_vm1, %v2743_v35 }
 0x39e   :  { %3915 = vmatprep.mubr.msk.bf16.mxu1 %vm1436_vm1, %v2744_v19 }
 0x39f   :  { %3916 = vmatmul.mubr.msk.bf16.vlgmr.msra.gmra.mrb[92].mxu1 %vm1436_vm1, %v2745_v28 }
 0x43e   :  { %v3875_v53 = vpop.f32.mrb[80].mxu0 }
 0x43f   :  { %v2794_v8 = vpop.f32.mrb[81].mxu0 }
 0x440   :  { %v3876_v26 = vpop.f32.mrb[82].mxu0 }
 0x441   :  { %v2797_v37 = vpop.f32.mrb[83].mxu0 }
 0x442   :  { %v3881_v39 = vpop.f32.mrb[80].mxu1 }
 0x443   :  { %v3197_v60 = vadd.f32 %v3881_v39, %v3875_v53  ;;  %v2851_v63 = vpop.f32.mrb[81].mxu1 }
 0x444   :  { %v3195_v46 = vadd.f32 %v2851_v63, %v2794_v8  ;;  %v3882_v57 = vpop.f32.mrb[82].mxu1 }
 0x445   :  { %v2854_v61 = vpop.f32.mrb[83].mxu1 }
 0x446   :  { %v3196_v13 = vadd.f32 %v2854_v61, %v2797_v37 }
 0x451   :  { %v3893_v10 = vpop.f32.mrb[84].mxu1 }
 0x452   :  { %v3887_v27 = vpop.f32.mrb[84].mxu0  ;;  %v2965_v30 = vpop.f32.mrb[85].mxu1 }
 0x453   :  { %v3203_v1 = vadd.f32 %v3887_v27, %v3197_v60  ;;  %v2908_v42 = vpop.f32.mrb[85].mxu0  ;;  %v3894_v38 = vpop.f32.mrb[86].mxu1 }
 0x454   :  { %v3201_v43 = vadd.f32 %v3195_v46, %v2908_v42  ;;  %v3888_v31 = vpop.f32.mrb[86].mxu0  ;;  %v2968_v4 = vpop.f32.mrb[87].mxu1 }
 0x455   :  { %v3209_v36 = vadd.f32 %v3893_v10, %v3203_v1  ;;  %v2911_v56 = vpop.f32.mrb[87].mxu0 }
 0x456   :  { %v3207_v52 = vadd.f32 %v3201_v43, %v2965_v30  ;;  %v3202_v41 = vadd.f32 %v3196_v13, %v2911_v56 }
 0x457   :  { %v3222_v45 = vadd.f32 %v3357_v40, %v3209_v36 }
 0x458   :  { %v3220_v49 = vadd.f32 %v3357_v40, %v3207_v52  ;;  %v3208_v58 = vadd.f32 %v3202_v41, %v2968_v4 }
 0x459   :  { %3229 = vst.msk [vmem:[%s4861_s5 + $0x10] sm:$0x1] %vm3228_vm6, %v3222_v45 }
 0x45a   :  { %3226 = vst.msk [vmem:[%s4861_s5] sm:$0xff] %vm91_vm0, %v3220_v49  ;;  %v3221_v48 = vadd.f32 %v3357_v40, %v3208_v58 }
 0x45c   :  { %3227 = vst.msk [vmem:[%s4861_s5 + $0x8] sm:$0xff] %vm91_vm0, %v3221_v48 }
 0x461   :  { %v3905_v44 = vpop.f32.mrb[88].mxu1 }
 0x462   :  { %v3899_v12 = vpop.f32.mrb[88].mxu0  ;;  %v3073_v50 = vpop.f32.mrb[89].mxu1 }
 0x463   :  { %v3200_v22 = vadd.f32 %v3905_v44, %v3899_v12  ;;  %v3019_v59 = vpop.f32.mrb[89].mxu0  ;;  %v3906_v51 = vpop.f32.mrb[90].mxu1 }
 0x464   :  { %v3198_v5 = vadd.f32 %v3073_v50, %v3019_v59  ;;  %v3900_v62 = vpop.f32.mrb[90].mxu0  ;;  %v3076_v14 = vpop.f32.mrb[91].mxu1 }
 0x465   :  { %v3022_v11 = vpop.f32.mrb[91].mxu0 }
 0x466   :  { %v3199_v17 = vadd.f32 %v3076_v14, %v3022_v11 }
 0x46f   :  { %v3911_v9 = vpop.f32.mrb[92].mxu0 }
 0x470   :  { %v3206_v3 = vadd.f32 %v3911_v9, %v3200_v22  ;;  %v3127_v15 = vpop.f32.mrb[93].mxu0 }
 0x471   :  { %v3204_v32 = vadd.f32 %v3198_v5, %v3127_v15  ;;  %v3912_v16 = vpop.f32.mrb[94].mxu0 }
 0x472   :  { %v3130_v47 = vpop.f32.mrb[95].mxu0  ;;  %v3917_v23 = vpop.f32.mrb[92].mxu1 }
 0x473   :  { %v3205_v21 = vadd.f32 %v3199_v17, %v3130_v47  ;;  %v3212_v7 = vadd.f32 %v3917_v23, %v3206_v3  ;;  %v3181_v25 = vpop.f32.mrb[93].mxu1 }
 0x474   :  { %v3210_v20 = vadd.f32 %v3204_v32, %v3181_v25  ;;  %v3918_v2 = vpop.f32.mrb[94].mxu1 }
 0x475   :  { %v3225_v34 = vadd.f32 %v3357_v40, %v3212_v7  ;;  %v3184_v54 = vpop.f32.mrb[95].mxu1 }
 0x476   :  { %v3223_v55 = vadd.f32 %v3357_v40, %v3210_v20  ;;  %v3211_v0 = vadd.f32 %v3205_v21, %v3184_v54 }
 0x477   :  { %3232 = vst.msk [vmem:[%s4861_s5 + $0x28] sm:$0x1] %vm3228_vm6, %v3225_v34 }
 0x478   :  { %3230 = vst.msk [vmem:[%s4861_s5 + $0x18] sm:$0xff] %vm91_vm0, %v3223_v55  ;;  %v3224_v18 = vadd.f32 %v3357_v40, %v3211_v0 }
 0x47a   :  { %3231 = vst.msk [vmem:[%s4861_s5 + $0x20] sm:$0xff] %vm91_vm0, %v3224_v18 }

</bundles_post_ra>
